<compile_context>
chip_gen: v7x
topology: tpu7x:2x2x1
jax: 0.10.0
libtpu: 0.0.40
codegen_flags: <defaults>
</compile_context>

<pallas_src>
import jax
import jax.numpy as jnp
from jax.experimental import pallas as pl
from jax.experimental.pallas import tpu as pltpu


def encoder_kernel(x_ref,
                   w1_ref, b1_ref,
                   w2_ref, b2_ref,
                   w3_ref, b3_ref,
                   w4_ref, b4_ref,
                   o1_ref, o2_ref, o3_ref, o4_ref):
    # Layer 1: Linear + ReLU
    h1 = jnp.dot(x_ref[...], w1_ref[...], preferred_element_type=jnp.float32)
    h1 = jnp.maximum(h1 + b1_ref[...], 0.0)
    o1_ref[...] = h1.astype(o1_ref.dtype)

    # Layer 2: Linear + ReLU
    h2 = jnp.dot(h1, w2_ref[...], preferred_element_type=jnp.float32)
    h2 = jnp.maximum(h2 + b2_ref[...], 0.0)
    o2_ref[...] = h2.astype(o2_ref.dtype)

    # Layer 3: Linear + ReLU
    h3 = jnp.dot(h2, w3_ref[...], preferred_element_type=jnp.float32)
    h3 = jnp.maximum(h3 + b3_ref[...], 0.0)
    o3_ref[...] = h3.astype(o3_ref.dtype)

    # Layer 4: Linear (no activation)
    h4 = jnp.dot(h3, w4_ref[...], preferred_element_type=jnp.float32)
    h4 = h4 + b4_ref[...]
    o4_ref[...] = h4.astype(o4_ref.dtype)


def _round_up(n, m):
    return ((n + m - 1) // m) * m


def _pad2(a, rows, cols):
    r, c = a.shape
    if r == rows and c == cols:
        return a
    return jnp.pad(a, ((0, rows - r), (0, cols - c)))


def encoder_forward(x, params):
    """x: (B, input_dim) f32.  params: dict with w1..w4 (in,out) and b1..b4 (1,out)."""
    B, Din = x.shape
    D1 = params["w1"].shape[1]   # 500
    D2 = params["w2"].shape[1]   # 500
    D3 = params["w3"].shape[1]   # 2000
    D4 = params["w4"].shape[1]   # feature_dim

    # Lane-dense padded dims (multiples of 128).  Zero padding is exact here.
    Din_p = _round_up(Din, 128)
    D1_p = _round_up(D1, 128)    # 500 -> 512
    D2_p = _round_up(D2, 128)    # 500 -> 512
    D3_p = _round_up(D3, 128)    # 2000 -> 2048
    D4_p = _round_up(D4, 128)    # feature_dim -> >=128

    # Batch tile: multiples of 8 sublanes, capped at 256 so activation tiles
    # (TM x 2048 f32, double-buffered) + ~7 MiB of resident weights stay well
    # under the v7x 64 MiB / default 32 MiB scoped VMEM.
    TM = min(256, _round_up(B, 8))
    B_p = _round_up(B, TM)
    grid = (B_p // TM,)

    # Zero-pad inputs / params.
    x_p = _pad2(x, B_p, Din_p)
    w1 = _pad2(params["w1"], Din_p, D1_p)
    b1 = _pad2(params["b1"], 1, D1_p)
    w2 = _pad2(params["w2"], D1_p, D2_p)
    b2 = _pad2(params["b2"], 1, D2_p)
    w3 = _pad2(params["w3"], D2_p, D3_p)
    b3 = _pad2(params["b3"], 1, D3_p)
    w4 = _pad2(params["w4"], D3_p, D4_p)
    b4 = _pad2(params["b4"], 1, D4_p)

    def tile_spec(cols):
        # batch-tiled: new row-block per grid step
        return pl.BlockSpec((TM, cols), lambda i: (i, 0))

    def resident_spec(shape):
        # full array, same block every step -> stays in VMEM
        return pl.BlockSpec(shape, lambda i: (0, 0))

    out_shapes = (
        jax.ShapeDtypeStruct((B_p, D1_p), jnp.float32),
        jax.ShapeDtypeStruct((B_p, D2_p), jnp.float32),
        jax.ShapeDtypeStruct((B_p, D3_p), jnp.float32),
        jax.ShapeDtypeStruct((B_p, D4_p), jnp.float32),
    )

    o1, o2, o3, o4 = pl.pallas_call(
        encoder_kernel,
        out_shape=out_shapes,
        grid_spec=pltpu.PrefetchScalarGridSpec(
            num_scalar_prefetch=0,
            grid=grid,
            in_specs=[
                tile_spec(Din_p),
                resident_spec(w1.shape), resident_spec(b1.shape),
                resident_spec(w2.shape), resident_spec(b2.shape),
                resident_spec(w3.shape), resident_spec(b3.shape),
                resident_spec(w4.shape), resident_spec(b4.shape),
            ],
            out_specs=[
                tile_spec(D1_p),
                tile_spec(D2_p),
                tile_spec(D3_p),
                tile_spec(D4_p),
            ],
        ),
        compiler_params=pltpu.CompilerParams(
            dimension_semantics=("parallel",),   # megacore sharding on v7x
            vmem_limit_bytes=48 << 20,           # < 64 MiB v7x VMEM; ~20 MiB used
        ),
    )(x_p, w1, b1, w2, b2, w3, b3, w4, b4)

    # Slice padded rows/lanes back to the true shapes.
    return (o1[:B, :D1], o2[:B, :D2], o3[:B, :D3], o4[:B, :D4])


def init_params(key, input_dim, feature_dim):
    """Deterministic synthetic init (PyTorch-style uniform bounds)."""
    dims = [(input_dim, 500), (500, 500), (500, 2000), (2000, feature_dim)]
    params = {}
    for i, (fan_in, fan_out) in enumerate(dims, start=1):
        key, kw, kb = jax.random.split(key, 3)
        bound = 1.0 / (fan_in ** 0.5)
        # stored directly as (in, out), i.e. the transpose of torch's (out, in)
        params[f"w{i}"] = jax.random.uniform(
            kw, (fan_in, fan_out), jnp.float32, minval=-bound, maxval=bound)
        params[f"b{i}"] = jax.random.uniform(
            kb, (1, fan_out), jnp.float32, minval=-bound, maxval=bound)
    return params


def reference_forward(x, params):
    h1 = jnp.maximum(x @ params["w1"] + params["b1"], 0.0)
    h2 = jnp.maximum(h1 @ params["w2"] + params["b2"], 0.0)
    h3 = jnp.maximum(h2 @ params["w3"] + params["b3"], 0.0)
    h4 = h3 @ params["w4"] + params["b4"]
    return h1, h2, h3, h4


if __name__ == "__main__":
    key = jax.random.PRNGKey(0)
    k_x, k_p = jax.random.split(key)

    batch, input_dim, feature_dim = 8, 32, 16
    x = jax.random.normal(k_x, (batch, input_dim), jnp.float32)
    params = init_params(k_p, input_dim, feature_dim)

    outs = encoder_forward(x, params)
    outs = jax.block_until_ready(outs)

    refs = reference_forward(x, params)
    for o, r in zip(outs, refs):
        assert o.shape == r.shape and o.dtype == r.dtype
        assert jnp.allclose(o, r, atol=1e-4, rtol=1e-4), "mismatch vs reference"

    print("KERNEL_OK")
</pallas_src>

<mosaic_0001>
module attributes {stable_mosaic.version = 11 : i64} {
  func.func @encoder_kernel(%arg0: i32, %arg1: memref<8x128xf32, #tpu.memory_space<vmem>>, %arg2: memref<128x512xf32, #tpu.memory_space<vmem>>, %arg3: memref<1x512xf32, #tpu.memory_space<vmem>>, %arg4: memref<512x512xf32, #tpu.memory_space<vmem>>, %arg5: memref<1x512xf32, #tpu.memory_space<vmem>>, %arg6: memref<512x2048xf32, #tpu.memory_space<vmem>>, %arg7: memref<1x2048xf32, #tpu.memory_space<vmem>>, %arg8: memref<2048x128xf32, #tpu.memory_space<vmem>>, %arg9: memref<1x128xf32, #tpu.memory_space<vmem>>, %arg10: memref<8x512xf32, #tpu.memory_space<vmem>>, %arg11: memref<8x512xf32, #tpu.memory_space<vmem>>, %arg12: memref<8x2048xf32, #tpu.memory_space<vmem>>, %arg13: memref<8x128xf32, #tpu.memory_space<vmem>>) attributes {dimension_semantics = [#tpu.dimension_semantics<parallel>], iteration_bounds = array<i64: 1>, scalar_prefetch = 0 : i64, scratch_operands = 0 : i64, tpu.core_type = #tpu.core_type<tc>, window_params = [{transform_indices = @transform_0, window_bounds = array<i64: 8, 128>}, {pipeline_mode = #tpu.pipeline_mode<synchronous>, transform_indices = @transform_1, window_bounds = array<i64: 128, 512>}, {pipeline_mode = #tpu.pipeline_mode<synchronous>, transform_indices = @transform_2, window_bounds = array<i64: 1, 512>}, {pipeline_mode = #tpu.pipeline_mode<synchronous>, transform_indices = @transform_3, window_bounds = array<i64: 512, 512>}, {pipeline_mode = #tpu.pipeline_mode<synchronous>, transform_indices = @transform_4, window_bounds = array<i64: 1, 512>}, {pipeline_mode = #tpu.pipeline_mode<synchronous>, transform_indices = @transform_5, window_bounds = array<i64: 512, 2048>}, {pipeline_mode = #tpu.pipeline_mode<synchronous>, transform_indices = @transform_6, window_bounds = array<i64: 1, 2048>}, {pipeline_mode = #tpu.pipeline_mode<synchronous>, transform_indices = @transform_7, window_bounds = array<i64: 2048, 128>}, {pipeline_mode = #tpu.pipeline_mode<synchronous>, transform_indices = @transform_8, window_bounds = array<i64: 1, 128>}, {transform_indices = @transform_9, window_bounds = array<i64: 8, 512>}, {transform_indices = @transform_10, window_bounds = array<i64: 8, 512>}, {transform_indices = @transform_11, window_bounds = array<i64: 8, 2048>}, {transform_indices = @transform_12, window_bounds = array<i64: 8, 128>}]} {
    %c0 = arith.constant 0 : index
    %c0_0 = arith.constant 0 : index
    %0 = vector.load %arg1[%c0, %c0_0] : memref<8x128xf32, #tpu.memory_space<vmem>>, vector<8x128xf32>
    %c0_1 = arith.constant 0 : index
    %c0_2 = arith.constant 0 : index
    %1 = vector.load %arg2[%c0_1, %c0_2] : memref<128x512xf32, #tpu.memory_space<vmem>>, vector<128x512xf32>
    %cst = arith.constant dense<0.000000e+00> : vector<8x512xf32>
    %2 = tpu.matmul %0, %1, %cst {dimension_numbers = #tpu.dot_dimension_numbers<[1], [0], [0], [1], [0, 0, 1, 1], [], []>} : vector<8x128xf32>, vector<128x512xf32>, vector<8x512xf32> -> vector<8x512xf32>
    %c0_3 = arith.constant 0 : index
    %c0_4 = arith.constant 0 : index
    %3 = vector.load %arg3[%c0_3, %c0_4] : memref<1x512xf32, #tpu.memory_space<vmem>>, vector<1x512xf32>
    %4 = vector.broadcast %3 : vector<1x512xf32> to vector<8x512xf32>
    %5 = arith.addf %2, %4 : vector<8x512xf32>
    %cst_5 = arith.constant 0.000000e+00 : f32
    %6 = vector.broadcast %cst_5 : f32 to vector<8x512xf32>
    %7 = arith.maximumf %5, %6 : vector<8x512xf32>
    %c0_6 = arith.constant 0 : index
    %c0_7 = arith.constant 0 : index
    %8 = vector.load %arg10[%c0_6, %c0_7] : memref<8x512xf32, #tpu.memory_space<vmem>>, vector<8x512xf32>
    tpu.vector_store %arg10[%c0_6, %c0_7], %7 {strides = array<i32>} : memref<8x512xf32, #tpu.memory_space<vmem>>, vector<8x512xf32>,
    %c0_8 = arith.constant 0 : index
    %c0_9 = arith.constant 0 : index
    %9 = vector.load %arg4[%c0_8, %c0_9] : memref<512x512xf32, #tpu.memory_space<vmem>>, vector<512x512xf32>
    %cst_10 = arith.constant dense<0.000000e+00> : vector<8x512xf32>
    %10 = tpu.matmul %7, %9, %cst_10 {dimension_numbers = #tpu.dot_dimension_numbers<[1], [0], [0], [1], [0, 0, 1, 1], [], []>} : vector<8x512xf32>, vector<512x512xf32>, vector<8x512xf32> -> vector<8x512xf32>
    %c0_11 = arith.constant 0 : index
    %c0_12 = arith.constant 0 : index
    %11 = vector.load %arg5[%c0_11, %c0_12] : memref<1x512xf32, #tpu.memory_space<vmem>>, vector<1x512xf32>
    %12 = vector.broadcast %11 : vector<1x512xf32> to vector<8x512xf32>
    %13 = arith.addf %10, %12 : vector<8x512xf32>
    %cst_13 = arith.constant 0.000000e+00 : f32
    %14 = vector.broadcast %cst_13 : f32 to vector<8x512xf32>
    %15 = arith.maximumf %13, %14 : vector<8x512xf32>
    %c0_14 = arith.constant 0 : index
    %c0_15 = arith.constant 0 : index
    %16 = vector.load %arg11[%c0_14, %c0_15] : memref<8x512xf32, #tpu.memory_space<vmem>>, vector<8x512xf32>
    tpu.vector_store %arg11[%c0_14, %c0_15], %15 {strides = array<i32>} : memref<8x512xf32, #tpu.memory_space<vmem>>, vector<8x512xf32>,
    %c0_16 = arith.constant 0 : index
    %c0_17 = arith.constant 0 : index
    %17 = vector.load %arg6[%c0_16, %c0_17] : memref<512x2048xf32, #tpu.memory_space<vmem>>, vector<512x2048xf32>
    %cst_18 = arith.constant dense<0.000000e+00> : vector<8x2048xf32>
    %18 = tpu.matmul %15, %17, %cst_18 {dimension_numbers = #tpu.dot_dimension_numbers<[1], [0], [0], [1], [0, 0, 1, 1], [], []>} : vector<8x512xf32>, vector<512x2048xf32>, vector<8x2048xf32> -> vector<8x2048xf32>
    %c0_19 = arith.constant 0 : index
    %c0_20 = arith.constant 0 : index
    %19 = vector.load %arg7[%c0_19, %c0_20] : memref<1x2048xf32, #tpu.memory_space<vmem>>, vector<1x2048xf32>
    %20 = vector.broadcast %19 : vector<1x2048xf32> to vector<8x2048xf32>
    %21 = arith.addf %18, %20 : vector<8x2048xf32>
    %cst_21 = arith.constant 0.000000e+00 : f32
    %22 = vector.broadcast %cst_21 : f32 to vector<8x2048xf32>
    %23 = arith.maximumf %21, %22 : vector<8x2048xf32>
    %c0_22 = arith.constant 0 : index
    %c0_23 = arith.constant 0 : index
    %24 = vector.load %arg12[%c0_22, %c0_23] : memref<8x2048xf32, #tpu.memory_space<vmem>>, vector<8x2048xf32>
    tpu.vector_store %arg12[%c0_22, %c0_23], %23 {strides = array<i32>} : memref<8x2048xf32, #tpu.memory_space<vmem>>, vector<8x2048xf32>,
    %c0_24 = arith.constant 0 : index
    %c0_25 = arith.constant 0 : index
    %25 = vector.load %arg8[%c0_24, %c0_25] : memref<2048x128xf32, #tpu.memory_space<vmem>>, vector<2048x128xf32>
    %cst_26 = arith.constant dense<0.000000e+00> : vector<8x128xf32>
    %26 = tpu.matmul %23, %25, %cst_26 {dimension_numbers = #tpu.dot_dimension_numbers<[1], [0], [0], [1], [0, 0, 1, 1], [], []>} : vector<8x2048xf32>, vector<2048x128xf32>, vector<8x128xf32> -> vector<8x128xf32>
    %c0_27 = arith.constant 0 : index
    %c0_28 = arith.constant 0 : index
    %27 = vector.load %arg9[%c0_27, %c0_28] : memref<1x128xf32, #tpu.memory_space<vmem>>, vector<1x128xf32>
    %28 = vector.broadcast %27 : vector<1x128xf32> to vector<8x128xf32>
    %29 = arith.addf %26, %28 : vector<8x128xf32>
    %c0_29 = arith.constant 0 : index
    %c0_30 = arith.constant 0 : index
    %30 = vector.load %arg13[%c0_29, %c0_30] : memref<8x128xf32, #tpu.memory_space<vmem>>, vector<8x128xf32>
    tpu.vector_store %arg13[%c0_29, %c0_30], %29 {strides = array<i32>} : memref<8x128xf32, #tpu.memory_space<vmem>>, vector<8x128xf32>,
    return
  }
  func.func @transform_0(%arg0: i32) -> (i32, i32) {
    %c0_i32 = arith.constant 0 : i32
    %c0_i32_0 = arith.constant 0 : i32
    return %arg0, %c0_i32 : i32, i32
  }
  func.func @transform_1(%arg0: i32) -> (i32, i32) {
    %c0_i32 = arith.constant 0 : i32
    %c0_i32_0 = arith.constant 0 : i32
    %c0_i32_1 = arith.constant 0 : i32
    return %c0_i32, %c0_i32_0 : i32, i32
  }
  func.func @transform_2(%arg0: i32) -> (i32, i32) {
    %c0_i32 = arith.constant 0 : i32
    %c0_i32_0 = arith.constant 0 : i32
    %c0_i32_1 = arith.constant 0 : i32
    return %c0_i32, %c0_i32_0 : i32, i32
  }
  func.func @transform_3(%arg0: i32) -> (i32, i32) {
    %c0_i32 = arith.constant 0 : i32
    %c0_i32_0 = arith.constant 0 : i32
    %c0_i32_1 = arith.constant 0 : i32
    return %c0_i32, %c0_i32_0 : i32, i32
  }
  func.func @transform_4(%arg0: i32) -> (i32, i32) {
    %c0_i32 = arith.constant 0 : i32
    %c0_i32_0 = arith.constant 0 : i32
    %c0_i32_1 = arith.constant 0 : i32
    return %c0_i32, %c0_i32_0 : i32, i32
  }
  func.func @transform_5(%arg0: i32) -> (i32, i32) {
    %c0_i32 = arith.constant 0 : i32
    %c0_i32_0 = arith.constant 0 : i32
    %c0_i32_1 = arith.constant 0 : i32
    return %c0_i32, %c0_i32_0 : i32, i32
  }
  func.func @transform_6(%arg0: i32) -> (i32, i32) {
    %c0_i32 = arith.constant 0 : i32
    %c0_i32_0 = arith.constant 0 : i32
    %c0_i32_1 = arith.constant 0 : i32
    return %c0_i32, %c0_i32_0 : i32, i32
  }
  func.func @transform_7(%arg0: i32) -> (i32, i32) {
    %c0_i32 = arith.constant 0 : i32
    %c0_i32_0 = arith.constant 0 : i32
    %c0_i32_1 = arith.constant 0 : i32
    return %c0_i32, %c0_i32_0 : i32, i32
  }
  func.func @transform_8(%arg0: i32) -> (i32, i32) {
    %c0_i32 = arith.constant 0 : i32
    %c0_i32_0 = arith.constant 0 : i32
    %c0_i32_1 = arith.constant 0 : i32
    return %c0_i32, %c0_i32_0 : i32, i32
  }
  func.func @transform_9(%arg0: i32) -> (i32, i32) {
    %c0_i32 = arith.constant 0 : i32
    %c0_i32_0 = arith.constant 0 : i32
    return %arg0, %c0_i32 : i32, i32
  }
  func.func @transform_10(%arg0: i32) -> (i32, i32) {
    %c0_i32 = arith.constant 0 : i32
    %c0_i32_0 = arith.constant 0 : i32
    return %arg0, %c0_i32 : i32, i32
  }
  func.func @transform_11(%arg0: i32) -> (i32, i32) {
    %c0_i32 = arith.constant 0 : i32
    %c0_i32_0 = arith.constant 0 : i32
    return %arg0, %c0_i32 : i32, i32
  }
  func.func @transform_12(%arg0: i32) -> (i32, i32) {
    %c0_i32 = arith.constant 0 : i32
    %c0_i32_0 = arith.constant 0 : i32
    return %arg0, %c0_i32 : i32, i32
  }
}

</mosaic_0001>

<bundles_post_ra>
// kernel: tpu_custom_call.1
= control target key start
LH: loop header
LB: loop body
LE: loop exit
PB: predicated region body
PF: predicated region fallthrough
CT: control target
= control target key end

     0   :  { %18 = vsyncpa [#allocation3], 0  ;;  %s6737_s0 = inlined_call_operand.hbm [shape: f32[8,128], index: 0, kind: input, shape index: {}]   ;;  %s6738_s1 = inlined_call_operand.hbm [shape: f32[128,512], index: 1, kind: input, shape index: {}]   ;;  %s6739_s2 = inlined_call_operand.hbm [shape: f32[1,512], index: 2, kind: input, shape index: {}]   ;;  %s6740_s3 = inlined_call_operand.hbm [shape: f32[512,512], index: 3, kind: input, shape index: {}]   ;;  %s6741_s4 = inlined_call_operand.hbm [shape: f32[1,512], index: 4, kind: input, shape index: {}]   ;;  %s6742_s5 = inlined_call_operand.hbm [shape: f32[512,2048], index: 5, kind: input, shape index: {}]   ;;  %s6743_s6 = inlined_call_operand.hbm [shape: f32[1,2048], index: 6, kind: input, shape index: {}]   ;;  %s6744_s7 = inlined_call_operand.hbm [shape: f32[2048,128], index: 7, kind: input, shape index: {}]   ;;  %s6745_s8 = inlined_call_operand.hbm [shape: f32[1,128], index: 8, kind: input, shape index: {}]   ;;  %s6746_s9 = inlined_call_operand.hbm [shape: f32[8,512], index: 9, kind: output, shape index: {0}]   ;;  %s6747_s10 = inlined_call_operand.hbm [shape: f32[8,512], index: 10, kind: output, shape index: {1}]   ;;  %s6748_s11 = inlined_call_operand.hbm [shape: f32[8,2048], index: 11, kind: output, shape index: {2}]   ;;  %s6749_s12 = inlined_call_operand.hbm [shape: f32[8,128], index: 12, kind: output, shape index: {3}]  }
   0x1   :  { %19 = vsyncpa [#allocation6], 0 }
   0x2   :  { %20 = vsyncpa [#allocation9], 0 }
   0x3   :  { %21 = vsyncpa [#allocation12], 0 }
   0x4   :  { %22 = vsyncpa [#allocation15], 0 }
   0x5   :  { %23 = vsyncpa [#allocation4], 0 }
   0x6   :  { %24 = vsyncpa [#allocation19], 0 }
   0x7   :  { %25 = vsyncpa [#allocation22], 0  ;;  %s6376_s21 = smov [#allocation5]   ;;  %s6074_s25 = scalar_lea.hbm %s6738_s1, 8192 }
   0x8   :  { %s41_s22 = sshll.u32 %s6376_s21, 4  ;;  %p6075_p0 = scmp.ne.s32.totalorder %s6738_s1, %s6074_s25  ;;  %s42_s22 = int_to_ptr.vmem [resolvable:$true] %s41_s22 }
   0x9   :  { %p6078_p1 = scmp.lt.u32.totalorder %s6074_s25, %s6738_s1 }
   0xb   :  { %p6080_p2 = pnand %p6078_p1, %p6075_p0 }
   0xd   :  { %6083 = shalt.err (!%p6080_p2)
}
   0xe   :  { %s6084_s30 = scalar_lea.vmem %s42_s22, 8192  ;;  %p6089_p4 = scmp.lt.s32.totalorder %s42_s22, %s42_s22 }
   0xf   :  { %p6085_p3 = scmp.ne.s32.totalorder %s42_s22, %s6084_s30  ;;  %p6090_p5 = scmp.lt.s32.totalorder %s6084_s30, %s6084_s30 }
  0x11   :  { %p6091_p6 = por %p6090_p5, %p6089_p4 }
  0x13   :  { %p6092_p7 = pnand %p6091_p6, %p6085_p3 }
  0x15   :  { %6095 = shalt.err (!%p6092_p7)
}
  0x16   :  { %s6377_s13 = smov 512   ;;  %s6378_s14 = smov 32  }
  0x17   :  { %47 = dma.hbm_to_vmem [thread:$0]  %s6738_s1, 8192, %s42_s22, [#allocation6], %s6377_s13, %s6377_s13, %s6378_s14  }
  0x18   :  { %s6379_s17 = smov [#allocation8]   ;;  %s6380_s19 = smov [#allocation11]  }
  0x19   :  { %s63_s18 = sshll.u32 %s6379_s17, 4  ;;  %s85_s20 = sshll.u32 %s6380_s19, 4  ;;  %s64_s18 = int_to_ptr.vmem [resolvable:$true] %s63_s18  ;;  %s86_s20 = int_to_ptr.vmem [resolvable:$true] %s85_s20 }
  0x1a   :  { %s6096_s24 = scalar_lea.hbm %s6740_s3, 32768 }
  0x1b   :  { %p6097_p8 = scmp.ne.s32.totalorder %s6740_s3, %s6096_s24  ;;  %p6100_p9 = scmp.lt.u32.totalorder %s6096_s24, %s6740_s3 }
  0x1d   :  { %p6102_p10 = pnand %p6100_p9, %p6097_p8 }
  0x1f   :  { %6105 = shalt.err (!%p6102_p10)
}
  0x20   :  { %s6106_s1 = scalar_lea.vmem %s64_s18, 32768  ;;  %p6111_p12 = scmp.lt.s32.totalorder %s64_s18, %s64_s18 }
  0x21   :  { %p6107_p11 = scmp.ne.s32.totalorder %s64_s18, %s6106_s1  ;;  %p6112_p13 = scmp.lt.s32.totalorder %s6106_s1, %s6106_s1 }
  0x23   :  { %p6113_p0 = por %p6112_p13, %p6111_p12 }
  0x25   :  { %p6114_p1 = pnand %p6113_p0, %p6107_p11 }
  0x27   :  { %6117 = shalt.err (!%p6114_p1)
}
  0x28   :  { %69 = dma.hbm_to_vmem [thread:$0]  %s6740_s3, 32768, %s64_s18, [#allocation9], %s6377_s13, %s6377_s13, %s6378_s14  }
  0x29   :  { %s6118_s16 = scalar_lea.hbm %s6742_s5, 131072 }
  0x2a   :  { %p6119_p2 = scmp.ne.s32.totalorder %s6742_s5, %s6118_s16  ;;  %p6122_p3 = scmp.lt.u32.totalorder %s6118_s16, %s6742_s5 }
  0x2c   :  { %p6124_p4 = pnand %p6122_p3, %p6119_p2 }
  0x2e   :  { %6127 = shalt.err (!%p6124_p4)
}
  0x2f   :  { %s6128_s24 = scalar_lea.vmem %s86_s20, 131072  ;;  %p6133_p6 = scmp.lt.s32.totalorder %s86_s20, %s86_s20 }
  0x30   :  { %p6129_p5 = scmp.ne.s32.totalorder %s86_s20, %s6128_s24  ;;  %p6134_p7 = scmp.lt.s32.totalorder %s6128_s24, %s6128_s24 }
  0x32   :  { %p6135_p8 = por %p6134_p7, %p6133_p6 }
  0x34   :  { %p6136_p9 = pnand %p6135_p8, %p6129_p5 }
  0x36   :  { %6139 = shalt.err (!%p6136_p9)
}
  0x37   :  { %s6381_s3 = smov 2048   ;;  %s6382_s13 = smov 128  }
  0x38   :  { %91 = dma.hbm_to_vmem [thread:$0]  %s6742_s5, 131072, %s86_s20, [#allocation12], %s6381_s3, %s6381_s3, %s6382_s13  }
  0x39   :  { %s6383_s25 = smov [#allocation14]   ;;  %s6140_s1 = scalar_lea.hbm %s6744_s7, 32768 }
  0x3a   :  { %s107_s26 = sshll.u32 %s6383_s25, 4  ;;  %p6141_p10 = scmp.ne.s32.totalorder %s6744_s7, %s6140_s1  ;;  %s108_s26 = int_to_ptr.vmem [resolvable:$true] %s107_s26 }
  0x3b   :  { %p6144_p11 = scmp.lt.u32.totalorder %s6140_s1, %s6744_s7 }
  0x3d   :  { %p6146_p12 = pnand %p6144_p11, %p6141_p10 }
  0x3f   :  { %6149 = shalt.err (!%p6146_p12)
}
  0x40   :  { %s6150_s16 = scalar_lea.vmem %s108_s26, 32768  ;;  %p6155_p0 = scmp.lt.s32.totalorder %s108_s26, %s108_s26 }
  0x41   :  { %p6151_p13 = scmp.ne.s32.totalorder %s108_s26, %s6150_s16  ;;  %p6156_p1 = scmp.lt.s32.totalorder %s6150_s16, %s6150_s16 }
  0x43   :  { %p6157_p2 = por %p6156_p1, %p6155_p0 }
  0x45   :  { %p6158_p3 = pnand %p6157_p2, %p6151_p13 }
  0x47   :  { %6161 = shalt.err (!%p6158_p3)
}
  0x48   :  { %s6384_s5 = smov 8   ;;  %s6385_s19 = smov [#allocation2]  }
  0x49   :  { %113 = dma.hbm_to_vmem [thread:$0]  %s6744_s7, 32768, %s108_s26, [#allocation15], %s6382_s13, %s6382_s13, %s6384_s5  }
  0x4a   :  { %s32_s21 = sshll.u32 %s6385_s19, 4  ;;  %s6386_s23 = smov [#allocation7]   ;;  %s33_s21 = int_to_ptr.vmem [resolvable:$true] %s32_s21 }
  0x4b   :  { %s54_s24 = sshll.u32 %s6386_s23, 4  ;;  %s6162_s18 = scalar_lea.hbm %s6737_s0, 128  ;;  %s55_s24 = int_to_ptr.vmem [resolvable:$true] %s54_s24 }
  0x4c   :  { %p6163_p4 = scmp.ne.s32.totalorder %s6737_s0, %s6162_s18  ;;  %p6166_p5 = scmp.lt.u32.totalorder %s6162_s18, %s6737_s0 }
  0x4e   :  { %p6168_p6 = pnand %p6166_p5, %p6163_p4 }
  0x50   :  { %6171 = shalt.err (!%p6168_p6)
}
  0x51   :  { %s6172_s7 = scalar_lea.vmem %s33_s21, 128  ;;  %p6177_p8 = scmp.lt.s32.totalorder %s33_s21, %s33_s21 }
  0x52   :  { %p6173_p7 = scmp.ne.s32.totalorder %s33_s21, %s6172_s7  ;;  %p6178_p9 = scmp.lt.s32.totalorder %s6172_s7, %s6172_s7 }
  0x54   :  { %p6179_p10 = por %p6178_p9, %p6177_p8 }
  0x56   :  { %p6180_p11 = pnand %p6179_p10, %p6173_p7 }
  0x58   :  { %6183 = shalt.err (!%p6180_p11)
}
  0x59   :  { %35 = dma.hbm_to_vmem [thread:$0]  %s6737_s0, 128, %s33_s21, [#allocation3]  }
  0x5a   :  { %s6184_s30 = scalar_lea.hbm %s6739_s2, 64 }
  0x5b   :  { %p6185_p12 = scmp.ne.s32.totalorder %s6739_s2, %s6184_s30  ;;  %p6188_p13 = scmp.lt.u32.totalorder %s6184_s30, %s6739_s2 }
  0x5d   :  { %p6190_p0 = pnand %p6188_p13, %p6185_p12 }
  0x5f   :  { %6193 = shalt.err (!%p6190_p0)
}
  0x60   :  { %s6194_s17 = scalar_lea.vmem %s55_s24, 64  ;;  %p6199_p2 = scmp.lt.s32.totalorder %s55_s24, %s55_s24 }
  0x61   :  { %p6195_p1 = scmp.ne.s32.totalorder %s55_s24, %s6194_s17  ;;  %p6200_p3 = scmp.lt.s32.totalorder %s6194_s17, %s6194_s17 }
  0x63   :  { %p6201_p4 = por %p6200_p3, %p6199_p2 }
  0x65   :  { %p6202_p5 = pnand %p6201_p4, %p6195_p1 }
  0x67   :  { %6205 = shalt.err (!%p6202_p5)
}
  0x68   :  { %57 = dma.hbm_to_vmem [thread:$0]  %s6739_s2, 64, %s55_s24, [#allocation6]  }
  0x69   :  { %s6387_s21 = smov [#allocation10]   ;;  %s6388_s3 = smov [#allocation13]  }
  0x6a   :  { %s76_s23 = sshll.u32 %s6387_s21, 4  ;;  %s98_s14 = sshll.u32 %s6388_s3, 4  ;;  %s77_s23 = int_to_ptr.vmem [resolvable:$true] %s76_s23  ;;  %s99_s14 = int_to_ptr.vmem [resolvable:$true] %s98_s14 }
  0x6b   :  { %s6206_s27 = scalar_lea.hbm %s6741_s4, 64 }
  0x6c   :  { %p6207_p6 = scmp.ne.s32.totalorder %s6741_s4, %s6206_s27  ;;  %p6210_p7 = scmp.lt.u32.totalorder %s6206_s27, %s6741_s4 }
  0x6e   :  { %p6212_p8 = pnand %p6210_p7, %p6207_p6 }
  0x70   :  { %6215 = shalt.err (!%p6212_p8)
}
  0x71   :  { %s6216_s2 = scalar_lea.vmem %s77_s23, 64  ;;  %p6221_p10 = scmp.lt.s32.totalorder %s77_s23, %s77_s23 }
  0x72   :  { %p6217_p9 = scmp.ne.s32.totalorder %s77_s23, %s6216_s2  ;;  %p6222_p11 = scmp.lt.s32.totalorder %s6216_s2, %s6216_s2 }
  0x74   :  { %p6223_p12 = por %p6222_p11, %p6221_p10 }
  0x76   :  { %p6224_p13 = pnand %p6223_p12, %p6217_p9 }
  0x78   :  { %6227 = shalt.err (!%p6224_p13)
}
  0x79   :  { %79 = dma.hbm_to_vmem [thread:$0]  %s6741_s4, 64, %s77_s23, [#allocation9]  }
  0x7a   :  { %s6228_s30 = scalar_lea.hbm %s6743_s6, 256 }
  0x7b   :  { %p6229_p0 = scmp.ne.s32.totalorder %s6743_s6, %s6228_s30  ;;  %p6232_p1 = scmp.lt.u32.totalorder %s6228_s30, %s6743_s6 }
  0x7d   :  { %p6234_p2 = pnand %p6232_p1, %p6229_p0 }
  0x7f   :  { %6237 = shalt.err (!%p6234_p2)
}
  0x80   :  { %s6238_s17 = scalar_lea.vmem %s99_s14, 256  ;;  %p6243_p4 = scmp.lt.s32.totalorder %s99_s14, %s99_s14 }
  0x81   :  { %p6239_p3 = scmp.ne.s32.totalorder %s99_s14, %s6238_s17  ;;  %p6244_p5 = scmp.lt.s32.totalorder %s6238_s17, %s6238_s17 }
  0x83   :  { %p6245_p6 = por %p6244_p5, %p6243_p4 }
  0x85   :  { %p6246_p7 = pnand %p6245_p6, %p6239_p3 }
  0x87   :  { %6249 = shalt.err (!%p6246_p7)
}
  0x88   :  { %101 = dma.hbm_to_vmem [thread:$0]  %s6743_s6, 256, %s99_s14, [#allocation12]  }
  0x89   :  { %s6389_s19 = smov [#allocation16]   ;;  %s6250_s18 = scalar_lea.hbm %s6745_s8, 16 }
  0x8a   :  { %s120_s21 = sshll.u32 %s6389_s19, 4  ;;  %p6251_p8 = scmp.ne.s32.totalorder %s6745_s8, %s6250_s18  ;;  %s121_s21 = int_to_ptr.vmem [resolvable:$true] %s120_s21 }
  0x8b   :  { %p6254_p9 = scmp.lt.u32.totalorder %s6250_s18, %s6745_s8 }
  0x8d   :  { %p6256_p10 = pnand %p6254_p9, %p6251_p8 }
  0x8f   :  { %6259 = shalt.err (!%p6256_p10)
}
  0x90   :  { %s6260_s7 = scalar_lea.vmem %s121_s21, 16  ;;  %s6264_s6 = scalar_lea.vmem %s121_s21, 32 }
  0x91   :  { %p6261_p11 = scmp.ne.s32.totalorder %s121_s21, %s6260_s7  ;;  %p6265_p12 = scmp.lt.s32.totalorder %s121_s21, %s121_s21 }
  0x92   :  { %p6266_p13 = scmp.lt.s32.totalorder %s6264_s6, %s6260_s7 }
  0x94   :  { %p6267_p0 = por %p6266_p13, %p6265_p12 }
  0x96   :  { %p6268_p1 = pnand %p6267_p0, %p6261_p11 }
  0x98   :  { %6271 = shalt.err (!%p6268_p1)
}
  0x99   :  { %123 = dma.hbm_to_vmem [thread:$0]  %s6745_s8, 16, %s121_s21, [#allocation15]  }
  0x9a   :  { %6360 = dma.done.wait [#allocation3], 128  }
  0x9b   :  { %6361 = vsyncadd [#allocation3], 4294967168 }
  0x9c   :  { %6362 = dma.done.wait [#allocation6], 8256  }
  0x9d   :  { %6363 = vsyncadd [#allocation6], 4294959040 }
  0x9e   :  { %6364 = dma.done.wait [#allocation9], 32832  }
  0x9f   :  { %6365 = vsyncadd [#allocation9], 4294934464 }
  0xa0   :  { %6366 = dma.done.wait [#allocation12], 131328  }
  0xa1   :  { %6367 = vsyncadd [#allocation12], 4294835968 }
  0xa2   :  { %6368 = dma.done.wait [#allocation15], 32784  }
  0xa3   :  { %6369 = vsyncadd [#allocation15], 4294934512  ;;  %v6390_v0 = vmov 0.0   ;;  %v153_v1 = vld [vmem:[#allocation5 + $0x8] sm:$0xff]  ;;  %v152_v3 = vld [vmem:[#allocation5] sm:$0xff]  ;;  %s6391_s8 = smov [#allocation18]  }
  0xa4   :  { %302 = vmatprep.mubr.f32.mxu0 %v6390_v0  ;;  %373 = vmatprep.mubr.f32.mxu1 %v6390_v0  ;;  %v157_v2 = vld [vmem:[#allocation5 + $0x28] sm:$0xff]  ;;  %v156_v5 = vld [vmem:[#allocation5 + $0x20] sm:$0xff]  ;;  %v155_v28 = vld [vmem:[#allocation5 + $0x18] sm:$0xff]  ;;  %s4074_s2 = sshll.u32 %s6391_s8, 4  ;;  %s6392_s24 = smov [#allocation17]   ;;  %s4075_s2 = int_to_ptr.vmem [resolvable:$true] %s4074_s2 }
  0xa5   :  { %v4399_v4 = vpack.c.bf16 %v157_v2, %v153_v1  ;;  %v161_v6 = vld [vmem:[#allocation5 + $0x48] sm:$0xff]  ;;  %v4401_v8 = vpack.c.bf16 %v156_v5, %v152_v3  ;;  %v160_v10 = vld [vmem:[#allocation5 + $0x40] sm:$0xff]  ;;  %v159_v29 = vld [vmem:[#allocation5 + $0x38] sm:$0xff]  ;;  %s4064_s26 = sshll.u32 %s6392_s24, 4  ;;  %s6272_s22 = scalar_lea.vmem %s4075_s2, 512  ;;  %s4065_s26 = int_to_ptr.vmem [resolvable:$true] %s4064_s26 }
  0xa6   :  { %v165_v7 = vld [vmem:[#allocation5 + $0x68] sm:$0xff]  ;;  %v164_v11 = vld [vmem:[#allocation5 + $0x60] sm:$0xff]  ;;  %v154_v30 = vld [vmem:[#allocation5 + $0x10] sm:$0xff]  ;;  %v4431_v32 = vpack.c.bf16 %v159_v29, %v155_v28  ;;  %p6273_p2 = scmp.ne.s32.totalorder %s4075_s2, %s6272_s22  ;;  %p6277_p3 = scmp.lt.s32.totalorder %s4075_s2, %s4075_s2 }
  0xa7   :  { %v4403_v9 = vpack.c.bf16 %v165_v7, %v161_v6  ;;  %v169_v12 = vld [vmem:[#allocation5 + $0x88] sm:$0xff]  ;;  %4400 = vmatprep.subr.bf16.mxu0 %v4399_v4  ;;  %v4405_v14 = vpack.c.bf16 %v164_v11, %v160_v10  ;;  %v168_v16 = vld [vmem:[#allocation5 + $0x80] sm:$0xff]  ;;  %v158_v33 = vld [vmem:[#allocation5 + $0x30] sm:$0xff]  ;;  %p6278_p4 = scmp.lt.s32.totalorder %s6272_s22, %s6272_s22 }
  0xa8   :  { %v173_v13 = vld [vmem:[#allocation5 + $0xa8] sm:$0xff]  ;;  %4402 = vmatpush1.bf16.msra.mxu0 %v4401_v8  ;;  %v172_v17 = vld [vmem:[#allocation5 + $0xa0] sm:$0xff]  ;;  %v163_v34 = vld [vmem:[#allocation5 + $0x58] sm:$0xff]  ;;  %v4433_v37 = vpack.c.bf16 %v158_v33, %v154_v30  ;;  %4432 = vmatprep.subr.bf16.mxu1 %v4431_v32 }
  0xa9   :  { %4404 = vmatprep.subr.bf16.mxu0 %v4403_v9  ;;  %v4407_v15 = vpack.c.bf16 %v173_v13, %v169_v12  ;;  %v177_v18 = vld [vmem:[#allocation5 + $0xc8] sm:$0xff]  ;;  %v4409_v20 = vpack.c.bf16 %v172_v17, %v168_v16  ;;  %v176_v22 = vld [vmem:[#allocation5 + $0xc0] sm:$0xff]  ;;  %v167_v35 = vld [vmem:[#allocation5 + $0x78] sm:$0xff]  ;;  %p6279_p5 = por %p6278_p4, %p6277_p3 }
  0xaa   :  { %v181_v19 = vld [vmem:[#allocation5 + $0xe8] sm:$0xff]  ;;  %v180_v23 = vld [vmem:[#allocation5 + $0xe0] sm:$0xff]  ;;  %v4435_v38 = vpack.c.bf16 %v167_v35, %v163_v34  ;;  %v162_v39 = vld [vmem:[#allocation5 + $0x50] sm:$0xff]  ;;  %4434 = vmatpush1.bf16.msra.mxu1 %v4433_v37 }
  0xab   :  { %v4411_v21 = vpack.c.bf16 %v181_v19, %v177_v18  ;;  %v185_v24 = vld [vmem:[#allocation5 + $0x108] sm:$0xff]  ;;  %v184_v26 = vld [vmem:[#allocation5 + $0x100] sm:$0xff]  ;;  %v4413_v31 = vpack.c.bf16 %v180_v23, %v176_v22  ;;  %v166_v40 = vld [vmem:[#allocation5 + $0x70] sm:$0xff]  ;;  %p6280_p6 = pnand %p6279_p5, %p6273_p2 }
  0xac   :  { %4406 = vmatpush1.bf16.msra.mxu0 %v4405_v14  ;;  %v189_v25 = vld [vmem:[#allocation5 + $0x128] sm:$0xff]  ;;  %v188_v27 = vld [vmem:[#allocation5 + $0x120] sm:$0xff]  ;;  %v171_v41 = vld [vmem:[#allocation5 + $0x98] sm:$0xff]  ;;  %v4437_v45 = vpack.c.bf16 %v166_v40, %v162_v39  ;;  %4436 = vmatprep.subr.bf16.mxu1 %v4435_v38 }
  0xad   :  { %4408 = vmatprep.subr.bf16.mxu0 %v4407_v15  ;;  %v4415_v36 = vpack.c.bf16 %v189_v25, %v185_v24  ;;  %v193_v42 = vld [vmem:[#allocation5 + $0x148] sm:$0xff]  ;;  %v175_v44 = vld [vmem:[#allocation5 + $0xb8] sm:$0xff]  ;;  %v4417_v46 = vpack.c.bf16 %v188_v27, %v184_v26  ;;  %v192_v47 = vld [vmem:[#allocation5 + $0x140] sm:$0xff] }
  0xae   :  { %v197_v43 = vld [vmem:[#allocation5 + $0x168] sm:$0xff]  ;;  %v4439_v48 = vpack.c.bf16 %v175_v44, %v171_v41  ;;  %v170_v49 = vld [vmem:[#allocation5 + $0x90] sm:$0xff]  ;;  %v196_v52 = vld [vmem:[#allocation5 + $0x160] sm:$0xff]  ;;  %4438 = vmatpush1.bf16.msra.mxu1 %v4437_v45 }
  0xaf   :  { %v174_v50 = vld [vmem:[#allocation5 + $0xb0] sm:$0xff]  ;;  %v4419_v51 = vpack.c.bf16 %v197_v43, %v193_v42  ;;  %v179_v53 = vld [vmem:[#allocation5 + $0xd8] sm:$0xff]  ;;  %v201_v55 = vld [vmem:[#allocation5 + $0x188] sm:$0xff]  ;;  %v4421_v58 = vpack.c.bf16 %v196_v52, %v192_v47 }
  0xb0   :  { %4410 = vmatpush1.bf16.msra.mxu0 %v4409_v20  ;;  %v183_v54 = vld [vmem:[#allocation5 + $0xf8] sm:$0xff]  ;;  %v205_v56 = vld [vmem:[#allocation5 + $0x1a8] sm:$0xff]  ;;  %v4441_v57 = vpack.c.bf16 %v174_v50, %v170_v49  ;;  %v200_v59 = vld [vmem:[#allocation5 + $0x180] sm:$0xff]  ;;  %4440 = vmatprep.subr.bf16.mxu1 %v4439_v48 }
  0xb1   :  { %4412 = vmatprep.subr.bf16.mxu0 %v4411_v21  ;;  %v4443_v60 = vpack.c.bf16 %v183_v54, %v179_v53  ;;  %v178_v61 = vld [vmem:[#allocation5 + $0xd0] sm:$0xff]  ;;  %v4423_v63 = vpack.c.bf16 %v205_v56, %v201_v55  ;;  %v204_v0 = vld [vmem:[#allocation5 + $0x1a0] sm:$0xff]  ;;  %v187_v1 = vld [vmem:[#allocation5 + $0x118] sm:$0xff] }
  0xb2   :  { %v182_v62 = vld [vmem:[#allocation5 + $0xf0] sm:$0xff]  ;;  %v191_v2 = vld [vmem:[#allocation5 + $0x138] sm:$0xff]  ;;  %v209_v3 = vld [vmem:[#allocation5 + $0x1c8] sm:$0xff]  ;;  %4442 = vmatpush1.bf16.msra.mxu1 %v4441_v57  ;;  %v4425_v6 = vpack.c.bf16 %v204_v0, %v200_v59 }
  0xb3   :  { %v213_v4 = vld [vmem:[#allocation5 + $0x1e8] sm:$0xff]  ;;  %v4445_v5 = vpack.c.bf16 %v182_v62, %v178_v61  ;;  %v208_v7 = vld [vmem:[#allocation5 + $0x1c0] sm:$0xff]  ;;  %4444 = vmatprep.subr.bf16.mxu1 %v4443_v60  ;;  %v4447_v8 = vpack.c.bf16 %v191_v2, %v187_v1  ;;  %v186_v9 = vld [vmem:[#allocation5 + $0x110] sm:$0xff] }
  0xb4   :  { %4414 = vmatpush1.bf16.msra.mxu0 %v4413_v31  ;;  %v190_v10 = vld [vmem:[#allocation5 + $0x130] sm:$0xff]  ;;  %v4427_v11 = vpack.c.bf16 %v213_v4, %v209_v3  ;;  %v212_v12 = vld [vmem:[#allocation5 + $0x1e0] sm:$0xff]  ;;  %v195_v13 = vld [vmem:[#allocation5 + $0x158] sm:$0xff] }
  0xb5   :  { %4416 = vmatprep.subr.bf16.mxu0 %v4415_v36  ;;  %v199_v14 = vld [vmem:[#allocation5 + $0x178] sm:$0xff]  ;;  %v389_v15 = vld [vmem:[#allocation8 + $0x8] sm:$0xff]  ;;  %v4449_v17 = vpack.c.bf16 %v190_v10, %v186_v9  ;;  %v4429_v18 = vpack.c.bf16 %v212_v12, %v208_v7  ;;  %v388_v25 = vld [vmem:[#allocation8] sm:$0xff] }
  0xb6   :  { %v393_v16 = vld [vmem:[#allocation8 + $0x28] sm:$0xff]  ;;  %4446 = vmatpush1.bf16.msra.mxu1 %v4445_v5  ;;  %v4451_v19 = vpack.c.bf16 %v199_v14, %v195_v13  ;;  %v203_v22 = vld [vmem:[#allocation5 + $0x198] sm:$0xff]  ;;  %v392_v26 = vld [vmem:[#allocation8 + $0x20] sm:$0xff] }
  0xb7   :  { %4448 = vmatprep.subr.bf16.mxu1 %v4447_v8  ;;  %v194_v20 = vld [vmem:[#allocation5 + $0x150] sm:$0xff]  ;;  %v207_v23 = vld [vmem:[#allocation5 + $0x1b8] sm:$0xff]  ;;  %v4463_v24 = vpack.c.bf16 %v393_v16, %v389_v15  ;;  %v4465_v35 = vpack.c.bf16 %v392_v26, %v388_v25  ;;  %v396_v38 = vld [vmem:[#allocation8 + $0x40] sm:$0xff] }
  0xb8   :  { %4418 = vmatpush1.bf16.msra.mxu0 %v4417_v46  ;;  %v198_v21 = vld [vmem:[#allocation5 + $0x170] sm:$0xff]  ;;  %v6568_v29 = vld [vmem:[#allocation2] sm:$0xff]  ;;  %v4455_v31 = vpack.c.bf16 %v207_v23, %v203_v22  ;;  %v400_v39 = vld [vmem:[#allocation8 + $0x60] sm:$0xff] }
  0xb9   :  { %4420 = vmatprep.subr.bf16.mxu0 %v4419_v51  ;;  %v397_v27 = vld [vmem:[#allocation8 + $0x48] sm:$0xff]  ;;  %v4453_v30 = vpack.c.bf16 %v198_v21, %v194_v20  ;;  %v211_v34 = vld [vmem:[#allocation5 + $0x1d8] sm:$0xff]  ;;  %v4469_v47 = vpack.c.bf16 %v400_v39, %v396_v38  ;;  %v404_v50 = vld [vmem:[#allocation8 + $0x80] sm:$0xff] }
  0xba   :  { %v401_v28 = vld [vmem:[#allocation8 + $0x68] sm:$0xff]  ;;  %4450 = vmatpush1.bf16.msra.mxu1 %v4449_v17  ;;  %v215_v36 = vld [vmem:[#allocation5 + $0x1f8] sm:$0xff]  ;;  %v408_v51 = vld [vmem:[#allocation8 + $0xa0] sm:$0xff] }
  0xbb   :  { %4452 = vmatprep.subr.bf16.mxu1 %v4451_v19  ;;  %v202_v32 = vld [vmem:[#allocation5 + $0x190] sm:$0xff]  ;;  %v4467_v37 = vpack.c.bf16 %v401_v28, %v397_v27  ;;  %v4459_v43 = vpack.c.bf16 %v215_v36, %v211_v34  ;;  %v391_v46 = vld [vmem:[#allocation8 + $0x18] sm:$0xff]  ;;  %v4473_v59 = vpack.c.bf16 %v408_v51, %v404_v50  ;;  %v412_v62 = vld [vmem:[#allocation8 + $0xc0] sm:$0xff] }
  0xbc   :  { %4422 = vmatpush1.bf16.msra.mxu0 %v4421_v58  ;;  %v206_v33 = vld [vmem:[#allocation5 + $0x1b0] sm:$0xff]  ;;  %v395_v48 = vld [vmem:[#allocation8 + $0x38] sm:$0xff]  ;;  %v420_v10 = vld [vmem:[#allocation8 + $0x100] sm:$0xff] }
  0xbd   :  { %4424 = vmatprep.subr.bf16.mxu0 %v4423_v63  ;;  %v405_v40 = vld [vmem:[#allocation8 + $0x88] sm:$0xff]  ;;  %v4457_v42 = vpack.c.bf16 %v206_v33, %v202_v32  ;;  %v4591_v55 = vpack.c.bf16 %v395_v48, %v391_v46  ;;  %v390_v56 = vld [vmem:[#allocation8 + $0x10] sm:$0xff]  ;;  %v399_v58 = vld [vmem:[#allocation8 + $0x58] sm:$0xff] }
  0xbe   :  { %v409_v41 = vld [vmem:[#allocation8 + $0xa8] sm:$0xff]  ;;  %4454 = vmatpush1.bf16.msra.mxu1 %v4453_v30  ;;  %v394_v57 = vld [vmem:[#allocation8 + $0x30] sm:$0xff]  ;;  %v403_v60 = vld [vmem:[#allocation8 + $0x78] sm:$0xff] }
  0xbf   :  { %4456 = vmatprep.subr.bf16.mxu1 %v4455_v31  ;;  %v210_v44 = vld [vmem:[#allocation5 + $0x1d0] sm:$0xff]  ;;  %v4471_v49 = vpack.c.bf16 %v409_v41, %v405_v40  ;;  %v416_v63 = vld [vmem:[#allocation8 + $0xe0] sm:$0xff]  ;;  %v4593_v2 = vpack.c.bf16 %v394_v57, %v390_v56  ;;  %v4595_v3 = vpack.c.bf16 %v403_v60, %v399_v58  ;;  %v411_v8 = vld [vmem:[#allocation8 + $0xb8] sm:$0xff] }
  0xc0   :  { %4426 = vmatpush1.bf16.msra.mxu0 %v4425_v6  ;;  %v214_v45 = vld [vmem:[#allocation5 + $0x1f0] sm:$0xff]  ;;  %v407_v6 = vld [vmem:[#allocation8 + $0x98] sm:$0xff]  ;;  %v4477_v7 = vpack.c.bf16 %v416_v63, %v412_v62  ;;  %v428_v22 = vld [vmem:[#allocation8 + $0x140] sm:$0xff] }
  0xc1   :  { %4428 = vmatprep.subr.bf16.mxu0 %v4427_v11  ;;  %v413_v52 = vld [vmem:[#allocation8 + $0xc8] sm:$0xff]  ;;  %v4461_v54 = vpack.c.bf16 %v214_v45, %v210_v44  ;;  %v398_v4 = vld [vmem:[#allocation8 + $0x50] sm:$0xff]  ;;  %v424_v11 = vld [vmem:[#allocation8 + $0x120] sm:$0xff]  ;;  %v4599_v15 = vpack.c.bf16 %v411_v8, %v407_v6 }
  0xc2   :  { %v417_v53 = vld [vmem:[#allocation8 + $0xe8] sm:$0xff]  ;;  %4458 = vmatpush1.bf16.msra.mxu1 %v4457_v42  ;;  %v402_v5 = vld [vmem:[#allocation8 + $0x70] sm:$0xff]  ;;  %v4481_v19 = vpack.c.bf16 %v424_v11, %v420_v10  ;;  %v419_v20 = vld [vmem:[#allocation8 + $0xf8] sm:$0xff] }
  0xc3   :  { %4460 = vmatprep.subr.bf16.mxu1 %v4459_v43  ;;  %v4475_v61 = vpack.c.bf16 %v417_v53, %v413_v52  ;;  %v421_v0 = vld [vmem:[#allocation8 + $0x108] sm:$0xff]  ;;  %v4597_v14 = vpack.c.bf16 %v402_v5, %v398_v4  ;;  %v406_v16 = vld [vmem:[#allocation8 + $0x90] sm:$0xff]  ;;  %v432_v23 = vld [vmem:[#allocation8 + $0x160] sm:$0xff] }
  0xc4   :  { %4430 = vmatpush1.bf16.msra.mxu0 %v4429_v18  ;;  %v425_v1 = vld [vmem:[#allocation8 + $0x128] sm:$0xff]  ;;  %v410_v17 = vld [vmem:[#allocation8 + $0xb0] sm:$0xff]  ;;  %v415_v18 = vld [vmem:[#allocation8 + $0xd8] sm:$0xff]  ;;  %v4485_v31 = vpack.c.bf16 %v432_v23, %v428_v22 }
  0xc5   :  { %4464 = vmatprep.subr.bf16.mxu0 %v4463_v24  ;;  %v4479_v9 = vpack.c.bf16 %v425_v1, %v421_v0  ;;  %v429_v12 = vld [vmem:[#allocation8 + $0x148] sm:$0xff]  ;;  %v4601_v26 = vpack.c.bf16 %v410_v17, %v406_v16  ;;  %v4603_v27 = vpack.c.bf16 %v419_v20, %v415_v18  ;;  %v414_v28 = vld [vmem:[#allocation8 + $0xd0] sm:$0xff]  ;;  %v423_v30 = vld [vmem:[#allocation8 + $0x118] sm:$0xff] }
  0xc6   :  { %4462 = vmatpush1.bf16.msra.mxu1 %v4461_v54  ;;  %v433_v13 = vld [vmem:[#allocation8 + $0x168] sm:$0xff]  ;;  %v427_v32 = vld [vmem:[#allocation8 + $0x138] sm:$0xff]  ;;  %v436_v34 = vld [vmem:[#allocation8 + $0x180] sm:$0xff] }
  0xc7   :  { %303 = vmatmul.mubr.f32.vlgmr.msra.gmra.mrb[0].mxu0 %v6568_v29  ;;  %4592 = vmatprep.subr.bf16.mxu1 %v4591_v55  ;;  %v4483_v21 = vpack.c.bf16 %v433_v13, %v429_v12  ;;  %v437_v24 = vld [vmem:[#allocation8 + $0x188] sm:$0xff]  ;;  %v4607_v39 = vpack.c.bf16 %v427_v32, %v423_v30  ;;  %v422_v40 = vld [vmem:[#allocation8 + $0x110] sm:$0xff]  ;;  %v431_v42 = vld [vmem:[#allocation8 + $0x158] sm:$0xff] }
  0xc8   :  { %4466 = vmatpush1.bf16.msra.mxu0 %v4465_v35  ;;  %v441_v25 = vld [vmem:[#allocation8 + $0x1a8] sm:$0xff]  ;;  %v440_v35 = vld [vmem:[#allocation8 + $0x1a0] sm:$0xff]  ;;  %v426_v41 = vld [vmem:[#allocation8 + $0x130] sm:$0xff] }
  0xc9   :  { %4468 = vmatprep.subr.bf16.mxu0 %v4467_v37  ;;  %374 = vmatmul.mubr.f32.vlgmr.msra.gmra.mrb[0].mxu1 %v6568_v29  ;;  %v418_v29 = vld [vmem:[#allocation8 + $0xf0] sm:$0xff]  ;;  %v4487_v33 = vpack.c.bf16 %v441_v25, %v437_v24  ;;  %v445_v36 = vld [vmem:[#allocation8 + $0x1c8] sm:$0xff]  ;;  %v4489_v43 = vpack.c.bf16 %v440_v35, %v436_v34  ;;  %v435_v44 = vld [vmem:[#allocation8 + $0x178] sm:$0xff]  ;;  %v4609_v50 = vpack.c.bf16 %v426_v41, %v422_v40 }
  0xca   :  { %4594 = vmatpush1.bf16.msra.mxu1 %v4593_v2  ;;  %v449_v37 = vld [vmem:[#allocation8 + $0x1e8] sm:$0xff]  ;;  %v4605_v38 = vpack.c.bf16 %v418_v29, %v414_v28  ;;  %v444_v46 = vld [vmem:[#allocation8 + $0x1c0] sm:$0xff]  ;;  %v4611_v51 = vpack.c.bf16 %v435_v44, %v431_v42  ;;  %v430_v52 = vld [vmem:[#allocation8 + $0x150] sm:$0xff] }
  0xcb   :  { %4596 = vmatprep.subr.bf16.mxu1 %v4595_v3  ;;  %v4491_v45 = vpack.c.bf16 %v449_v37, %v445_v36  ;;  %v453_v48 = vld [vmem:[#allocation8 + $0x208] sm:$0xff]  ;;  %v434_v53 = vld [vmem:[#allocation8 + $0x170] sm:$0xff]  ;;  %v439_v54 = vld [vmem:[#allocation8 + $0x198] sm:$0xff] }
  0xcc   :  { %4470 = vmatpush1.bf16.msra.mxu0 %v4469_v47  ;;  %v448_v47 = vld [vmem:[#allocation8 + $0x1e0] sm:$0xff]  ;;  %v443_v56 = vld [vmem:[#allocation8 + $0x1b8] sm:$0xff]  ;;  %v461_v60 = vld [vmem:[#allocation8 + $0x248] sm:$0xff]  ;;  %v4613_v62 = vpack.c.bf16 %v434_v53, %v430_v52 }
  0xcd   :  { %4472 = vmatprep.subr.bf16.mxu0 %v4471_v49  ;;  %v457_v49 = vld [vmem:[#allocation8 + $0x228] sm:$0xff]  ;;  %v4493_v55 = vpack.c.bf16 %v448_v47, %v444_v46  ;;  %v452_v58 = vld [vmem:[#allocation8 + $0x200] sm:$0xff]  ;;  %v4615_v63 = vpack.c.bf16 %v443_v56, %v439_v54  ;;  %v438_v0 = vld [vmem:[#allocation8 + $0x190] sm:$0xff] }
  0xce   :  { %4598 = vmatpush1.bf16.msra.mxu1 %v4597_v14  ;;  %v4495_v57 = vpack.c.bf16 %v457_v49, %v453_v48  ;;  %v442_v1 = vld [vmem:[#allocation8 + $0x1b0] sm:$0xff]  ;;  %v447_v2 = vld [vmem:[#allocation8 + $0x1d8] sm:$0xff]  ;;  %v460_v6 = vld [vmem:[#allocation8 + $0x240] sm:$0xff] }
  0xcf   :  { %4600 = vmatprep.subr.bf16.mxu1 %v4599_v15  ;;  %v451_v4 = vld [vmem:[#allocation8 + $0x1f8] sm:$0xff]  ;;  %v469_v8 = vld [vmem:[#allocation8 + $0x288] sm:$0xff]  ;;  %v4617_v10 = vpack.c.bf16 %v442_v1, %v438_v0  ;;  %v446_v12 = vld [vmem:[#allocation8 + $0x1d0] sm:$0xff] }
  0xd0   :  { %4474 = vmatpush1.bf16.msra.mxu0 %v4473_v59  ;;  %v456_v59 = vld [vmem:[#allocation8 + $0x220] sm:$0xff]  ;;  %v4619_v11 = vpack.c.bf16 %v451_v4, %v447_v2  ;;  %v450_v13 = vld [vmem:[#allocation8 + $0x1f0] sm:$0xff]  ;;  %v455_v14 = vld [vmem:[#allocation8 + $0x218] sm:$0xff] }
  0xd1   :  { %4476 = vmatprep.subr.bf16.mxu0 %v4475_v61  ;;  %v465_v61 = vld [vmem:[#allocation8 + $0x268] sm:$0xff]  ;;  %v4497_v3 = vpack.c.bf16 %v456_v59, %v452_v58  ;;  %v459_v16 = vld [vmem:[#allocation8 + $0x238] sm:$0xff]  ;;  %v468_v18 = vld [vmem:[#allocation8 + $0x280] sm:$0xff]  ;;  %v4621_v22 = vpack.c.bf16 %v450_v13, %v446_v12 }
  0xd2   :  { %4602 = vmatpush1.bf16.msra.mxu1 %v4601_v26  ;;  %v4499_v5 = vpack.c.bf16 %v465_v61, %v461_v60  ;;  %v477_v20 = vld [vmem:[#allocation8 + $0x2c8] sm:$0xff]  ;;  %v4623_v23 = vpack.c.bf16 %v459_v16, %v455_v14  ;;  %v454_v24 = vld [vmem:[#allocation8 + $0x210] sm:$0xff]  ;;  %v463_v26 = vld [vmem:[#allocation8 + $0x258] sm:$0xff] }
  0xd3   :  { %4604 = vmatprep.subr.bf16.mxu1 %v4603_v27  ;;  %v458_v25 = vld [vmem:[#allocation8 + $0x230] sm:$0xff]  ;;  %v467_v28 = vld [vmem:[#allocation8 + $0x278] sm:$0xff]  ;;  %v476_v30 = vld [vmem:[#allocation8 + $0x2c0] sm:$0xff] }
  0xd4   :  { %4478 = vmatpush1.bf16.msra.mxu0 %v4477_v7  ;;  %v464_v7 = vld [vmem:[#allocation8 + $0x260] sm:$0xff]  ;;  %v485_v32 = vld [vmem:[#allocation8 + $0x308] sm:$0xff]  ;;  %v4625_v34 = vpack.c.bf16 %v458_v25, %v454_v24  ;;  %v4627_v35 = vpack.c.bf16 %v467_v28, %v463_v26  ;;  %v462_v36 = vld [vmem:[#allocation8 + $0x250] sm:$0xff] }
  0xd5   :  { %4480 = vmatprep.subr.bf16.mxu0 %v4479_v9  ;;  %v473_v9 = vld [vmem:[#allocation8 + $0x2a8] sm:$0xff]  ;;  %v4501_v15 = vpack.c.bf16 %v464_v7, %v460_v6  ;;  %v466_v37 = vld [vmem:[#allocation8 + $0x270] sm:$0xff]  ;;  %v475_v40 = vld [vmem:[#allocation8 + $0x2b8] sm:$0xff] }
  0xd6   :  { %4606 = vmatpush1.bf16.msra.mxu1 %v4605_v38  ;;  %v4503_v17 = vpack.c.bf16 %v473_v9, %v469_v8  ;;  %v471_v38 = vld [vmem:[#allocation8 + $0x298] sm:$0xff]  ;;  %v484_v42 = vld [vmem:[#allocation8 + $0x300] sm:$0xff]  ;;  %v493_v44 = vld [vmem:[#allocation8 + $0x348] sm:$0xff]  ;;  %v4629_v46 = vpack.c.bf16 %v466_v37, %v462_v36 }
  0xd7   :  { %4608 = vmatprep.subr.bf16.mxu1 %v4607_v39  ;;  %v4631_v47 = vpack.c.bf16 %v475_v40, %v471_v38  ;;  %v470_v48 = vld [vmem:[#allocation8 + $0x290] sm:$0xff]  ;;  %v483_v52 = vld [vmem:[#allocation8 + $0x2f8] sm:$0xff]  ;;  %v492_v54 = vld [vmem:[#allocation8 + $0x340] sm:$0xff]  ;;  %v218_v40 = vlaneseq }
  0xd8   :  { %4482 = vmatpush1.bf16.msra.mxu0 %v4481_v19  ;;  %v472_v19 = vld [vmem:[#allocation8 + $0x2a0] sm:$0xff]  ;;  %v474_v49 = vld [vmem:[#allocation8 + $0x2b0] sm:$0xff]  ;;  %v501_v56 = vld [vmem:[#allocation8 + $0x388] sm:$0xff] }
  0xd9   :  { %4484 = vmatprep.subr.bf16.mxu0 %v4483_v21  ;;  %v481_v21 = vld [vmem:[#allocation8 + $0x2e8] sm:$0xff]  ;;  %v4505_v27 = vpack.c.bf16 %v472_v19, %v468_v18  ;;  %v4633_v58 = vpack.c.bf16 %v474_v49, %v470_v48  ;;  %v478_v60 = vld [vmem:[#allocation8 + $0x2d0] sm:$0xff]  ;;  %v491_v0 = vld [vmem:[#allocation8 + $0x338] sm:$0xff] }
  0xda   :  { %4610 = vmatpush1.bf16.msra.mxu1 %v4609_v50  ;;  %v4507_v29 = vpack.c.bf16 %v481_v21, %v477_v20  ;;  %v479_v50 = vld [vmem:[#allocation8 + $0x2d8] sm:$0xff]  ;;  %v482_v61 = vld [vmem:[#allocation8 + $0x2f0] sm:$0xff]  ;;  %v500_v2 = vld [vmem:[#allocation8 + $0x380] sm:$0xff] }
  0xdb   :  { %4612 = vmatprep.subr.bf16.mxu1 %v4611_v51  ;;  %v4635_v59 = vpack.c.bf16 %v483_v52, %v479_v50  ;;  %v4637_v4 = vpack.c.bf16 %v482_v61, %v478_v60  ;;  %v486_v6 = vld [vmem:[#allocation8 + $0x310] sm:$0xff]  ;;  %v495_v9 = vld [vmem:[#allocation8 + $0x358] sm:$0xff]  ;;  %v512_v28 = vld [vmem:[#allocation8 + $0x3e0] sm:$0xff] }
  0xdc   :  { %4486 = vmatpush1.bf16.msra.mxu0 %v4485_v31  ;;  %v480_v31 = vld [vmem:[#allocation8 + $0x2e0] sm:$0xff]  ;;  %v490_v7 = vld [vmem:[#allocation8 + $0x330] sm:$0xff]  ;;  %v507_v16 = vld [vmem:[#allocation8 + $0x3b8] sm:$0xff] }
  0xdd   :  { %4488 = vmatprep.subr.bf16.mxu0 %v4487_v33  ;;  %v489_v33 = vld [vmem:[#allocation8 + $0x328] sm:$0xff]  ;;  %v4509_v39 = vpack.c.bf16 %v480_v31, %v476_v30  ;;  %v494_v13 = vld [vmem:[#allocation8 + $0x350] sm:$0xff]  ;;  %v511_v24 = vld [vmem:[#allocation8 + $0x3d8] sm:$0xff] }
  0xde   :  { %4614 = vmatpush1.bf16.msra.mxu1 %v4613_v62  ;;  %v4511_v41 = vpack.c.bf16 %v489_v33, %v485_v32  ;;  %v487_v62 = vld [vmem:[#allocation8 + $0x318] sm:$0xff]  ;;  %v498_v14 = vld [vmem:[#allocation8 + $0x370] sm:$0xff]  ;;  %v516_v48 = vld [vmem:[#allocation8 + $0x400] sm:$0xff] }
  0xdf   :  { %4616 = vmatprep.subr.bf16.mxu1 %v4615_v63  ;;  %v502_v19 = vld [vmem:[#allocation8 + $0x390] sm:$0xff]  ;;  %v515_v26 = vld [vmem:[#allocation8 + $0x3f8] sm:$0xff]  ;;  %v520_v49 = vld [vmem:[#allocation8 + $0x420] sm:$0xff] }
  0xe0   :  { %4490 = vmatpush1.bf16.msra.mxu0 %v4489_v43  ;;  %v488_v43 = vld [vmem:[#allocation8 + $0x320] sm:$0xff]  ;;  %v506_v20 = vld [vmem:[#allocation8 + $0x3b0] sm:$0xff]  ;;  %v519_v36 = vld [vmem:[#allocation8 + $0x418] sm:$0xff]  ;;  %v4529_v61 = vpack.c.bf16 %v520_v49, %v516_v48 }
  0xe1   :  { %4492 = vmatprep.subr.bf16.mxu0 %v4491_v45  ;;  %v497_v45 = vld [vmem:[#allocation8 + $0x368] sm:$0xff]  ;;  %v4513_v51 = vpack.c.bf16 %v488_v43, %v484_v42  ;;  %v4649_v21 = vpack.c.bf16 %v506_v20, %v502_v19  ;;  %v510_v31 = vld [vmem:[#allocation8 + $0x3d0] sm:$0xff]  ;;  %v523_v38 = vld [vmem:[#allocation8 + $0x438] sm:$0xff] }
  0xe2   :  { %4618 = vmatpush1.bf16.msra.mxu1 %v4617_v10  ;;  %v4515_v53 = vpack.c.bf16 %v497_v45, %v493_v44  ;;  %v499_v10 = vld [vmem:[#allocation8 + $0x378] sm:$0xff]  ;;  %v514_v32 = vld [vmem:[#allocation8 + $0x3f0] sm:$0xff]  ;;  %v541_v20 = vld [vmem:[#allocation8 + $0x4c8] sm:$0xff] }
  0xe3   :  { %4620 = vmatprep.subr.bf16.mxu1 %v4619_v11  ;;  %v4641_v11 = vpack.c.bf16 %v490_v7, %v486_v6  ;;  %v4643_v12 = vpack.c.bf16 %v499_v10, %v495_v9  ;;  %v4653_v33 = vpack.c.bf16 %v514_v32, %v510_v31  ;;  %v6577_v43 = vld [vmem:[#allocation7] sm:$0xf]  ;;  %v518_v52 = vld [vmem:[#allocation8 + $0x410] sm:$0xff]  ;;  %v533_v6 = vld [vmem:[#allocation8 + $0x488] sm:$0xff] }
  0xe4   :  { %4494 = vmatpush1.bf16.msra.mxu0 %v4493_v55  ;;  %v496_v55 = vld [vmem:[#allocation8 + $0x360] sm:$0xff]  ;;  %v535_v9 = vld [vmem:[#allocation8 + $0x498] sm:$0xff]  ;;  %v538_v19 = vld [vmem:[#allocation8 + $0x4b0] sm:$0xff] }
  0xe5   :  { %4496 = vmatprep.subr.bf16.mxu0 %v4495_v57  ;;  %v505_v57 = vld [vmem:[#allocation8 + $0x3a8] sm:$0xff]  ;;  %v4517_v63 = vpack.c.bf16 %v496_v55, %v492_v54  ;;  %v539_v10 = vld [vmem:[#allocation8 + $0x4b8] sm:$0xff]  ;;  %v548_v48 = vld [vmem:[#allocation8 + $0x500] sm:$0xff] }
  0xe6   :  { %4622 = vmatpush1.bf16.msra.mxu1 %v4621_v22  ;;  %v4519_v1 = vpack.c.bf16 %v505_v57, %v501_v56  ;;  %v509_v22 = vld [vmem:[#allocation8 + $0x3c8] sm:$0xff]  ;;  %v527_v57 = vld [vmem:[#allocation8 + $0x458] sm:$0xff]  ;;  %v552_v49 = vld [vmem:[#allocation8 + $0x520] sm:$0xff] }
  0xe7   :  { %4624 = vmatprep.subr.bf16.mxu1 %v4623_v23  ;;  %v513_v23 = vld [vmem:[#allocation8 + $0x3e8] sm:$0xff] }
  0xe8   :  { %4498 = vmatpush1.bf16.msra.mxu0 %v4497_v3  ;;  %v504_v3 = vld [vmem:[#allocation8 + $0x3a0] sm:$0xff]  ;;  %v4523_v25 = vpack.c.bf16 %v513_v23, %v509_v22  ;;  %v525_v54 = vld [vmem:[#allocation8 + $0x448] sm:$0xff]  ;;  %v543_v23 = vld [vmem:[#allocation8 + $0x4d8] sm:$0xff] }
  0xe9   :  { %4500 = vmatprep.subr.bf16.mxu0 %v4499_v5  ;;  %v4639_v5 = vpack.c.bf16 %v491_v0, %v487_v62  ;;  %v4521_v8 = vpack.c.bf16 %v504_v3, %v500_v2  ;;  %v529_v56 = vld [vmem:[#allocation8 + $0x468] sm:$0xff]  ;;  %v528_v0 = vld [vmem:[#allocation8 + $0x460] sm:$0xff] }
  0xea   :  { %4626 = vmatpush1.bf16.msra.mxu1 %v4625_v34  ;;  %v517_v34 = vld [vmem:[#allocation8 + $0x408] sm:$0xff]  ;;  %v4531_v2 = vpack.c.bf16 %v529_v56, %v525_v54  ;;  %v559_v56 = vld [vmem:[#allocation8 + $0x558] sm:$0xff] }
  0xeb   :  { %4628 = vmatprep.subr.bf16.mxu1 %v4627_v35  ;;  %v521_v35 = vld [vmem:[#allocation8 + $0x428] sm:$0xff] }
  0xec   :  { %4502 = vmatpush1.bf16.msra.mxu0 %v4501_v15  ;;  %v503_v15 = vld [vmem:[#allocation8 + $0x398] sm:$0xff]  ;;  %v4527_v37 = vpack.c.bf16 %v521_v35, %v517_v34  ;;  %v545_v22 = vld [vmem:[#allocation8 + $0x4e8] sm:$0xff]  ;;  %v542_v34 = vld [vmem:[#allocation8 + $0x4d0] sm:$0xff] }
  0xed   :  { %4504 = vmatprep.subr.bf16.mxu0 %v4503_v17  ;;  %v4645_v17 = vpack.c.bf16 %v498_v14, %v494_v13  ;;  %v4647_v18 = vpack.c.bf16 %v507_v16, %v503_v15  ;;  %v532_v13 = vld [vmem:[#allocation8 + $0x480] sm:$0xff]  ;;  %v4539_v32 = vpack.c.bf16 %v545_v22, %v541_v20  ;;  %v546_v35 = vld [vmem:[#allocation8 + $0x4f0] sm:$0xff]  ;;  %v557_v54 = vld [vmem:[#allocation8 + $0x548] sm:$0xff] }
  0xee   :  { %4630 = vmatpush1.bf16.msra.mxu1 %v4629_v46  ;;  %v536_v14 = vld [vmem:[#allocation8 + $0x4a0] sm:$0xff] }
  0xef   :  { %4632 = vmatprep.subr.bf16.mxu1 %v4631_v47  ;;  %v572_v22 = vld [vmem:[#allocation8 + $0x5c0] sm:$0xff] }
  0xf0   :  { %4506 = vmatpush1.bf16.msra.mxu0 %v4505_v27  ;;  %v508_v27 = vld [vmem:[#allocation8 + $0x3c0] sm:$0xff] }
  0xf1   :  { %4508 = vmatprep.subr.bf16.mxu0 %v4507_v29  ;;  %v4651_v29 = vpack.c.bf16 %v515_v26, %v511_v24  ;;  %v4525_v30 = vpack.c.bf16 %v512_v28, %v508_v27  ;;  %v547_v24 = vld [vmem:[#allocation8 + $0x4f8] sm:$0xff]  ;;  %v4537_v26 = vpack.c.bf16 %v536_v14, %v532_v13  ;;  %v540_v28 = vld [vmem:[#allocation8 + $0x4c0] sm:$0xff]  ;;  %v566_v14 = vld [vmem:[#allocation8 + $0x590] sm:$0xff] }
  0xf2   :  { %4634 = vmatpush1.bf16.msra.mxu1 %v4633_v58  ;;  %v531_v58 = vld [vmem:[#allocation8 + $0x478] sm:$0xff] }
  0xf3   :  { %4636 = vmatprep.subr.bf16.mxu1 %v4635_v59  ;;  %v4659_v3 = vpack.c.bf16 %v531_v58, %v527_v57  ;;  %v563_v57 = vld [vmem:[#allocation8 + $0x578] sm:$0xff]  ;;  %v4545_v58 = vpack.c.bf16 %v552_v49, %v548_v48 }
  0xf4   :  { %4510 = vmatpush1.bf16.msra.mxu0 %v4509_v39  ;;  %v4655_v39 = vpack.c.bf16 %v523_v38, %v519_v36  ;;  %v549_v36 = vld [vmem:[#allocation8 + $0x508] sm:$0xff] }
  0xf5   :  { %4512 = vmatprep.subr.bf16.mxu0 %v4511_v41  ;;  %v6572_v41 = vshrl.u32 %v218_v40, 7  ;;  %v553_v38 = vld [vmem:[#allocation8 + $0x528] sm:$0xff]  ;;  %v555_v40 = vld [vmem:[#allocation8 + $0x538] sm:$0xff] }
  0xf6   :  { %4638 = vmatpush1.bf16.msra.mxu1 %v4637_v4  ;;  %v526_v4 = vld [vmem:[#allocation8 + $0x450] sm:$0xff] }
  0xf7   :  { %4640 = vmatprep.subr.bf16.mxu1 %v4639_v5  ;;  %v6575_v42 = vsub.s32 0, %v6572_v41  ;;  %v6580_v44 = vsub.s32 1, %v6572_v41  ;;  %v530_v5 = vld [vmem:[#allocation8 + $0x470] sm:$0xff]  ;;  %v6590_v7 = vsub.s32 3, %v6572_v41 }
  0xf8   :  { %4514 = vmatpush1.bf16.msra.mxu0 %v4513_v51 }
  0xf9   :  { %4516 = vmatprep.subr.bf16.mxu0 %v4515_v53  ;;  %v221_v45 = vrot.slane %v6577_v43, %v6575_v42  ;;  %v225_v46 = vrot.slane %v6577_v43, %v6580_v44  ;;  %v522_v53 = vld [vmem:[#allocation8 + $0x430] sm:$0xff] }
  0xfa   :  { %4642 = vmatpush1.bf16.msra.mxu1 %v4641_v11  ;;  %v4657_v62 = vpack.c.bf16 %v522_v53, %v518_v52  ;;  %v550_v52 = vld [vmem:[#allocation8 + $0x510] sm:$0xff] }
  0xfb   :  { %4644 = vmatprep.subr.bf16.mxu1 %v4643_v12  ;;  %v4661_v12 = vpack.c.bf16 %v530_v5, %v526_v4  ;;  %v554_v53 = vld [vmem:[#allocation8 + $0x530] sm:$0xff]  ;;  %v569_v4 = vld [vmem:[#allocation8 + $0x5a8] sm:$0xff]  ;;  %v567_v5 = vld [vmem:[#allocation8 + $0x598] sm:$0xff] }
  0xfc   :  { %4518 = vmatpush1.bf16.msra.mxu0 %v4517_v63  ;;  %v524_v63 = vld [vmem:[#allocation8 + $0x440] sm:$0xff] }
  0xfd   :  { %4520 = vmatprep.subr.bf16.mxu0 %v4519_v1  ;;  %v6587_v1 = vsub.s32 2, %v6572_v41  ;;  %v4533_v11 = vpack.c.bf16 %v528_v0, %v524_v63  ;;  %v4675_v63 = vpack.c.bf16 %v563_v57, %v559_v56  ;;  %v558_v0 = vld [vmem:[#allocation8 + $0x550] sm:$0xff]  ;;  %v597_v56 = vld [vmem:[#allocation8 + $0x688] sm:$0xff] }
  0xfe   :  { %4646 = vmatpush1.bf16.msra.mxu1 %v4645_v17  ;;  %v4663_v17 = vpack.c.bf16 %v539_v10, %v535_v9  ;;  %v564_v10 = vld [vmem:[#allocation8 + $0x580] sm:$0xff]  ;;  %v601_v57 = vld [vmem:[#allocation8 + $0x6a8] sm:$0xff] }
  0xff   :  { %4648 = vmatprep.subr.bf16.mxu1 %v4647_v18  ;;  %v229_v15 = vrot.slane %v6577_v43, %v6587_v1  ;;  %v534_v18 = vld [vmem:[#allocation8 + $0x490] sm:$0xff] }
 0x100   :  { %4522 = vmatpush1.bf16.msra.mxu0 %v4521_v8  ;;  %v537_v8 = vld [vmem:[#allocation8 + $0x4a8] sm:$0xff]  ;;  %v4665_v27 = vpack.c.bf16 %v538_v19, %v534_v18  ;;  %v575_v18 = vld [vmem:[#allocation8 + $0x5d8] sm:$0xff] }
 0x101   :  { %4524 = vmatprep.subr.bf16.mxu0 %v4523_v25  ;;  %v4535_v16 = vpack.c.bf16 %v537_v8, %v533_v6  ;;  %v571_v6 = vld [vmem:[#allocation8 + $0x5b8] sm:$0xff] }
 0x102   :  { %4650 = vmatpush1.bf16.msra.mxu1 %v4649_v21  ;;  %v233_v21 = vrot.slane %v6577_v43, %v6590_v7  ;;  %v4679_v13 = vpack.c.bf16 %v571_v6, %v567_v5  ;;  %v579_v19 = vld [vmem:[#allocation8 + $0x5f8] sm:$0xff]  ;;  %v605_v5 = vld [vmem:[#allocation8 + $0x6c8] sm:$0xff] }
 0x103   :  { %4652 = vmatprep.subr.bf16.mxu1 %v4651_v29  ;;  %v544_v29 = vld [vmem:[#allocation8 + $0x4e0] sm:$0xff]  ;;  %v609_v6 = vld [vmem:[#allocation8 + $0x6e8] sm:$0xff] }
 0x104   :  { %4526 = vmatpush1.bf16.msra.mxu0 %v4525_v30 }
 0x105   :  { %4528 = vmatprep.subr.bf16.mxu0 %v4527_v37 }
 0x106   :  { %4654 = vmatpush1.bf16.msra.mxu1 %v4653_v33  ;;  %v4667_v33 = vpack.c.bf16 %v547_v24, %v543_v23  ;;  %v576_v23 = vld [vmem:[#allocation8 + $0x5e0] sm:$0xff] }
 0x107   :  { %4656 = vmatprep.subr.bf16.mxu1 %v4655_v39  ;;  %v551_v39 = vld [vmem:[#allocation8 + $0x518] sm:$0xff] }
 0x19a   :  { %v304_v47 = vpop.f32.mrb[0].mxu0 }
 0x19b   :  { %v305_v50 = vadd.f32 %v304_v47, %v221_v45  ;;  %v306_v51 = vpop.f32.mrb[1].mxu0  ;;  %v4669_v47 = vpack.c.bf16 %v546_v35, %v542_v34  ;;  %v580_v34 = vld [vmem:[#allocation8 + $0x600] sm:$0xff] }
 0x19c   :  { %v307_v55 = vadd.f32 %v306_v51, %v225_v46  ;;  %v375_v25 = vpop.f32.mrb[0].mxu1  ;;  %v4541_v46 = vpack.c.bf16 %v544_v29, %v540_v28  ;;  %v4671_v51 = vpack.c.bf16 %v555_v40, %v551_v39  ;;  %v581_v28 = vld [vmem:[#allocation8 + $0x608] sm:$0xff]  ;;  %v584_v35 = vld [vmem:[#allocation8 + $0x620] sm:$0xff]  ;;  %v586_v39 = vld [vmem:[#allocation8 + $0x630] sm:$0xff] }
 0x19d   :  { %v380_v59 = vmax.f32 %v305_v50, 0.0  ;;  %v376_v30 = vadd.f32 %v375_v25, %v229_v15  ;;  %v377_v31 = vpop.f32.mrb[1].mxu1  ;;  %v4543_v50 = vpack.c.bf16 %v553_v38, %v549_v36  ;;  %v570_v15 = vld [vmem:[#allocation8 + $0x5b0] sm:$0xff]  ;;  %v4683_v25 = vpack.c.bf16 %v579_v19, %v575_v18  ;;  %v585_v29 = vld [vmem:[#allocation8 + $0x628] sm:$0xff] }
 0x19e   :  { %v381_v60 = vmax.f32 %v307_v55, 0.0  ;;  %v378_v37 = vadd.f32 %v377_v31, %v233_v21  ;;  %v561_v55 = vld [vmem:[#allocation8 + $0x568] sm:$0xff]  ;;  %v4681_v21 = vpack.c.bf16 %v570_v15, %v566_v14  ;;  %v587_v31 = vld [vmem:[#allocation8 + $0x638] sm:$0xff]  ;;  %v4559_v36 = vpack.c.bf16 %v585_v29, %v581_v28  ;;  %v582_v38 = vld [vmem:[#allocation8 + $0x610] sm:$0xff] }
 0x19f   :  { %384 = vst [vmem:[#allocation17] sm:$0xff] %v380_v59  ;;  %v6596_v43 = vmax.f32 %v376_v30, 0.0  ;;  %v583_v30 = vld [vmem:[#allocation8 + $0x618] sm:$0xff]  ;;  %v589_v40 = vld [vmem:[#allocation8 + $0x648] sm:$0xff]  ;;  %v4561_v48 = vpack.c.bf16 %v584_v35, %v580_v34  ;;  %v4689_v49 = vpack.c.bf16 %v586_v39, %v582_v38  ;;  %v4571_v14 = vpack.c.bf16 %v609_v6, %v605_v5  ;;  %v614_v28 = vld [vmem:[#allocation8 + $0x710] sm:$0xff] }
 0x1a0   :  { %385 = vst [vmem:[#allocation17 + $0x8] sm:$0xff] %v381_v60  ;;  %730 = vmatprep.mubr.f32.mxu0 %v381_v60  ;;  %872 = vmatprep.mubr.f32.mxu1 %v381_v60  ;;  %v383_v45 = vmax.f32 %v378_v37, 0.0  ;;  %v556_v60 = vld [vmem:[#allocation8 + $0x540] sm:$0xff]  ;;  %v4687_v37 = vpack.c.bf16 %v587_v31, %v583_v30  ;;  %v613_v18 = vld [vmem:[#allocation8 + $0x708] sm:$0xff]  ;;  %v618_v29 = vld [vmem:[#allocation8 + $0x730] sm:$0xff] }
 0x1a1   :  { %731 = vmatmul.mubr.f32.vlgmr.msra.gmra.mrb[2].mxu0 %v380_v59  ;;  %873 = vmatmul.mubr.f32.vlgmr.msra.gmra.mrb[2].mxu1 %v380_v59  ;;  %386 = vst [vmem:[#allocation17 + $0x10] sm:$0xff] %v6596_v43  ;;  %v4673_v59 = vpack.c.bf16 %v554_v53, %v550_v52  ;;  %v617_v19 = vld [vmem:[#allocation8 + $0x728] sm:$0xff]  ;;  %v4705_v35 = vpack.c.bf16 %v618_v29, %v614_v28  ;;  %v638_v5 = vld [vmem:[#allocation8 + $0x7d0] sm:$0xff] }
 0x1a2   :  { %4530 = vmatpush1.bf16.msra.mxu0 %v4529_v61  ;;  %4658 = vmatpush1.bf16.msra.mxu1 %v4657_v62  ;;  %387 = vst [vmem:[#allocation17 + $0x18] sm:$0xff] %v383_v45  ;;  %v560_v61 = vld [vmem:[#allocation8 + $0x560] sm:$0xff]  ;;  %v4547_v62 = vpack.c.bf16 %v561_v55, %v557_v54  ;;  %v590_v54 = vld [vmem:[#allocation8 + $0x650] sm:$0xff]  ;;  %v621_v30 = vld [vmem:[#allocation8 + $0x748] sm:$0xff] }
 0x1a3   :  { %4532 = vmatprep.subr.bf16.mxu0 %v4531_v2  ;;  %4660 = vmatprep.subr.bf16.mxu1 %v4659_v3  ;;  %v562_v2 = vld [vmem:[#allocation8 + $0x570] sm:$0xff]  ;;  %v565_v3 = vld [vmem:[#allocation8 + $0x588] sm:$0xff]  ;;  %v4549_v8 = vpack.c.bf16 %v560_v61, %v556_v60 }
 0x1a4   :  { %801 = vmatprep.mubr.f32.mxu0 %v383_v45  ;;  %943 = vmatprep.mubr.f32.mxu1 %v383_v45  ;;  %v4677_v9 = vpack.c.bf16 %v562_v2, %v558_v0  ;;  %v593_v45 = vld [vmem:[#allocation8 + $0x668] sm:$0xff]  ;;  %v594_v55 = vld [vmem:[#allocation8 + $0x670] sm:$0xff]  ;;  %v4567_v0 = vpack.c.bf16 %v601_v57, %v597_v56 }
 0x1a5   :  { %v4563_v52 = vpack.c.bf16 %v593_v45, %v589_v40  ;;  %v4693_v61 = vpack.c.bf16 %v594_v55, %v590_v54  ;;  %v625_v31 = vld [vmem:[#allocation8 + $0x768] sm:$0xff]  ;;  %v622_v40 = vld [vmem:[#allocation8 + $0x750] sm:$0xff] }
 0x1a6   :  { %4534 = vmatpush1.bf16.msra.mxu0 %v4533_v11  ;;  %4662 = vmatpush1.bf16.msra.mxu1 %v4661_v12  ;;  %v568_v11 = vld [vmem:[#allocation8 + $0x5a0] sm:$0xff]  ;;  %v4551_v12 = vpack.c.bf16 %v569_v4, %v565_v3  ;;  %v598_v3 = vld [vmem:[#allocation8 + $0x690] sm:$0xff]  ;;  %v4579_v38 = vpack.c.bf16 %v625_v31, %v621_v30 }
 0x1a7   :  { %4536 = vmatprep.subr.bf16.mxu0 %v4535_v16  ;;  %4664 = vmatprep.subr.bf16.mxu1 %v4663_v17  ;;  %v573_v16 = vld [vmem:[#allocation8 + $0x5c8] sm:$0xff]  ;;  %v4553_v20 = vpack.c.bf16 %v568_v11, %v564_v10  ;;  %v602_v4 = vld [vmem:[#allocation8 + $0x6b0] sm:$0xff] }
 0x1a8   :  { %v577_v17 = vld [vmem:[#allocation8 + $0x5e8] sm:$0xff]  ;;  %v4697_v11 = vpack.c.bf16 %v602_v4, %v598_v3  ;;  %v626_v45 = vld [vmem:[#allocation8 + $0x770] sm:$0xff] }
 0x1a9   :  { %v4555_v24 = vpack.c.bf16 %v577_v17, %v573_v16  ;;  %v606_v16 = vld [vmem:[#allocation8 + $0x6d0] sm:$0xff] }
 0x1aa   :  { %4538 = vmatpush1.bf16.msra.mxu0 %v4537_v26  ;;  %4666 = vmatpush1.bf16.msra.mxu1 %v4665_v27  ;;  %v574_v26 = vld [vmem:[#allocation8 + $0x5d0] sm:$0xff] }
 0x1ab   :  { %4540 = vmatprep.subr.bf16.mxu0 %v4539_v32  ;;  %4668 = vmatprep.subr.bf16.mxu1 %v4667_v33  ;;  %v578_v27 = vld [vmem:[#allocation8 + $0x5f0] sm:$0xff]  ;;  %v4557_v32 = vpack.c.bf16 %v576_v23, %v572_v22 }
 0x1ac   :  { %v4685_v33 = vpack.c.bf16 %v578_v27, %v574_v26  ;;  %v610_v17 = vld [vmem:[#allocation8 + $0x6f0] sm:$0xff]  ;;  %v4575_v26 = vpack.c.bf16 %v617_v19, %v613_v18 }
 0x1ad   :  { %v4701_v23 = vpack.c.bf16 %v610_v17, %v606_v16  ;;  %v630_v56 = vld [vmem:[#allocation8 + $0x790] sm:$0xff] }
 0x1ae   :  { %4542 = vmatpush1.bf16.msra.mxu0 %v4541_v46  ;;  %4670 = vmatpush1.bf16.msra.mxu1 %v4669_v47  ;;  %v591_v46 = vld [vmem:[#allocation8 + $0x658] sm:$0xff]  ;;  %v634_v57 = vld [vmem:[#allocation8 + $0x7b0] sm:$0xff] }
 0x1af   :  { %4544 = vmatprep.subr.bf16.mxu0 %v4543_v50  ;;  %4672 = vmatprep.subr.bf16.mxu1 %v4671_v51  ;;  %v595_v47 = vld [vmem:[#allocation8 + $0x678] sm:$0xff]  ;;  %v588_v50 = vld [vmem:[#allocation8 + $0x640] sm:$0xff]  ;;  %v642_v6 = vld [vmem:[#allocation8 + $0x7f0] sm:$0xff] }
 0x1b0   :  { %v592_v51 = vld [vmem:[#allocation8 + $0x660] sm:$0xff]  ;;  %v4691_v53 = vpack.c.bf16 %v595_v47, %v591_v46  ;;  %v629_v46 = vld [vmem:[#allocation8 + $0x788] sm:$0xff]  ;;  %v960_v18 = vld [vmem:[#allocation11 + $0x10] sm:$0xff] }
 0x1b1   :  { %v4565_v60 = vpack.c.bf16 %v592_v51, %v588_v50  ;;  %v633_v47 = vld [vmem:[#allocation8 + $0x7a8] sm:$0xff]  ;;  %v4709_v51 = vpack.c.bf16 %v626_v45, %v622_v40  ;;  %v976_v19 = vld [vmem:[#allocation11 + $0x90] sm:$0xff] }
 0x1b2   :  { %4546 = vmatpush1.bf16.msra.mxu0 %v4545_v58  ;;  %4674 = vmatpush1.bf16.msra.mxu1 %v4673_v59  ;;  %v599_v58 = vld [vmem:[#allocation8 + $0x698] sm:$0xff]  ;;  %v4583_v54 = vpack.c.bf16 %v633_v47, %v629_v46 }
 0x1b3   :  { %4548 = vmatprep.subr.bf16.mxu0 %v4547_v62  ;;  %4676 = vmatprep.subr.bf16.mxu1 %v4675_v63  ;;  %v603_v59 = vld [vmem:[#allocation8 + $0x6b8] sm:$0xff]  ;;  %v596_v62 = vld [vmem:[#allocation8 + $0x680] sm:$0xff] }
 0x1b4   :  { %v600_v63 = vld [vmem:[#allocation8 + $0x6a0] sm:$0xff]  ;;  %v4695_v2 = vpack.c.bf16 %v603_v59, %v599_v58  ;;  %v637_v58 = vld [vmem:[#allocation8 + $0x7c8] sm:$0xff]  ;;  %v992_v30 = vld [vmem:[#allocation11 + $0x110] sm:$0xff] }
 0x1b5   :  { %v4569_v10 = vpack.c.bf16 %v600_v63, %v596_v62  ;;  %v641_v59 = vld [vmem:[#allocation8 + $0x7e8] sm:$0xff]  ;;  %v4713_v63 = vpack.c.bf16 %v634_v57, %v630_v56  ;;  %v1008_v31 = vld [vmem:[#allocation11 + $0x190] sm:$0xff] }
 0x1b6   :  { %4550 = vmatpush1.bf16.msra.mxu0 %v4549_v8  ;;  %4678 = vmatpush1.bf16.msra.mxu1 %v4677_v9  ;;  %v607_v8 = vld [vmem:[#allocation8 + $0x6d8] sm:$0xff]  ;;  %v4587_v3 = vpack.c.bf16 %v641_v59, %v637_v58  ;;  %v1087_v59 = vld [vmem:[#allocation11 + $0x408] sm:$0xff] }
 0x1b7   :  { %4552 = vmatprep.subr.bf16.mxu0 %v4551_v12  ;;  %4680 = vmatprep.subr.bf16.mxu1 %v4679_v13  ;;  %v611_v9 = vld [vmem:[#allocation8 + $0x6f8] sm:$0xff]  ;;  %v604_v12 = vld [vmem:[#allocation8 + $0x6c0] sm:$0xff] }
 0x1b8   :  { %v608_v13 = vld [vmem:[#allocation8 + $0x6e0] sm:$0xff]  ;;  %v4699_v15 = vpack.c.bf16 %v611_v9, %v607_v8  ;;  %v959_v8 = vld [vmem:[#allocation11 + $0x8] sm:$0xff]  ;;  %v1024_v46 = vld [vmem:[#allocation11 + $0x210] sm:$0xff] }
 0x1b9   :  { %v4573_v22 = vpack.c.bf16 %v608_v13, %v604_v12  ;;  %v975_v9 = vld [vmem:[#allocation11 + $0x88] sm:$0xff]  ;;  %v4717_v13 = vpack.c.bf16 %v642_v6, %v638_v5  ;;  %v1040_v47 = vld [vmem:[#allocation11 + $0x290] sm:$0xff] }
 0x1ba   :  { %4554 = vmatpush1.bf16.msra.mxu0 %v4553_v20  ;;  %4682 = vmatpush1.bf16.msra.mxu1 %v4681_v21  ;;  %v615_v20 = vld [vmem:[#allocation8 + $0x718] sm:$0xff]  ;;  %v4719_v16 = vpack.c.bf16 %v975_v9, %v959_v8  ;;  %v1119_v9 = vld [vmem:[#allocation11 + $0x508] sm:$0xff] }
 0x1bb   :  { %4556 = vmatprep.subr.bf16.mxu0 %v4555_v24  ;;  %4684 = vmatprep.subr.bf16.mxu1 %v4683_v25  ;;  %v619_v21 = vld [vmem:[#allocation8 + $0x738] sm:$0xff]  ;;  %v612_v24 = vld [vmem:[#allocation8 + $0x700] sm:$0xff] }
 0x1bc   :  { %v616_v25 = vld [vmem:[#allocation8 + $0x720] sm:$0xff]  ;;  %v4703_v27 = vpack.c.bf16 %v619_v21, %v615_v20  ;;  %v991_v20 = vld [vmem:[#allocation11 + $0x108] sm:$0xff]  ;;  %v1056_v57 = vld [vmem:[#allocation11 + $0x310] sm:$0xff] }
 0x1bd   :  { %v4577_v34 = vpack.c.bf16 %v616_v25, %v612_v24  ;;  %v1007_v21 = vld [vmem:[#allocation11 + $0x188] sm:$0xff]  ;;  %v4849_v25 = vpack.c.bf16 %v976_v19, %v960_v18  ;;  %v1072_v58 = vld [vmem:[#allocation11 + $0x390] sm:$0xff] }
 0x1be   :  { %4558 = vmatpush1.bf16.msra.mxu0 %v4557_v32  ;;  %4686 = vmatpush1.bf16.msra.mxu1 %v4685_v33  ;;  %v623_v32 = vld [vmem:[#allocation8 + $0x758] sm:$0xff]  ;;  %v4723_v28 = vpack.c.bf16 %v1007_v21, %v991_v20  ;;  %v1151_v21 = vld [vmem:[#allocation11 + $0x608] sm:$0xff] }
 0x1bf   :  { %4560 = vmatprep.subr.bf16.mxu0 %v4559_v36  ;;  %4688 = vmatprep.subr.bf16.mxu1 %v4687_v37  ;;  %v627_v33 = vld [vmem:[#allocation8 + $0x778] sm:$0xff]  ;;  %v620_v36 = vld [vmem:[#allocation8 + $0x740] sm:$0xff] }
 0x1c0   :  { %v624_v37 = vld [vmem:[#allocation8 + $0x760] sm:$0xff]  ;;  %v4707_v39 = vpack.c.bf16 %v627_v33, %v623_v32  ;;  %v1023_v32 = vld [vmem:[#allocation11 + $0x208] sm:$0xff]  ;;  %v1088_v6 = vld [vmem:[#allocation11 + $0x410] sm:$0xff] }
 0x1c1   :  { %v4581_v50 = vpack.c.bf16 %v624_v37, %v620_v36  ;;  %v1039_v33 = vld [vmem:[#allocation11 + $0x288] sm:$0xff]  ;;  %v4853_v37 = vpack.c.bf16 %v1008_v31, %v992_v30  ;;  %v1104_v8 = vld [vmem:[#allocation11 + $0x490] sm:$0xff] }
 0x1c2   :  { %4562 = vmatpush1.bf16.msra.mxu0 %v4561_v48  ;;  %4690 = vmatpush1.bf16.msra.mxu1 %v4689_v49  ;;  %v631_v48 = vld [vmem:[#allocation8 + $0x798] sm:$0xff]  ;;  %v4727_v40 = vpack.c.bf16 %v1039_v33, %v1023_v32  ;;  %v1183_v33 = vld [vmem:[#allocation11 + $0x708] sm:$0xff] }
 0x1c3   :  { %4564 = vmatprep.subr.bf16.mxu0 %v4563_v52  ;;  %4692 = vmatprep.subr.bf16.mxu1 %v4691_v53  ;;  %v635_v49 = vld [vmem:[#allocation8 + $0x7b8] sm:$0xff]  ;;  %v628_v52 = vld [vmem:[#allocation8 + $0x780] sm:$0xff] }
 0x1c4   :  { %v632_v53 = vld [vmem:[#allocation8 + $0x7a0] sm:$0xff]  ;;  %v4711_v55 = vpack.c.bf16 %v635_v49, %v631_v48  ;;  %v1055_v48 = vld [vmem:[#allocation11 + $0x308] sm:$0xff]  ;;  %v1120_v19 = vld [vmem:[#allocation11 + $0x510] sm:$0xff] }
 0x1c5   :  { %v4585_v62 = vpack.c.bf16 %v632_v53, %v628_v52  ;;  %v1071_v49 = vld [vmem:[#allocation11 + $0x388] sm:$0xff]  ;;  %v1054_v53 = vld [vmem:[#allocation11 + $0x300] sm:$0xff]  ;;  %v1136_v20 = vld [vmem:[#allocation11 + $0x590] sm:$0xff] }
 0x1c6   :  { %4566 = vmatpush1.bf16.msra.mxu0 %v4565_v60  ;;  %4694 = vmatpush1.bf16.msra.mxu1 %v4693_v61  ;;  %v639_v60 = vld [vmem:[#allocation8 + $0x7d8] sm:$0xff] }
 0x1c7   :  { %4568 = vmatprep.subr.bf16.mxu0 %v4567_v0  ;;  %4696 = vmatprep.subr.bf16.mxu1 %v4695_v2  ;;  %v643_v61 = vld [vmem:[#allocation8 + $0x7f8] sm:$0xff]  ;;  %v636_v0 = vld [vmem:[#allocation8 + $0x7c0] sm:$0xff] }
 0x1c8   :  { %v640_v2 = vld [vmem:[#allocation8 + $0x7e0] sm:$0xff]  ;;  %v4715_v4 = vpack.c.bf16 %v643_v61, %v639_v60  ;;  %v1103_v60 = vld [vmem:[#allocation11 + $0x488] sm:$0xff]  ;;  %v1152_v31 = vld [vmem:[#allocation11 + $0x610] sm:$0xff] }
 0x1c9   :  { %v4589_v12 = vpack.c.bf16 %v640_v2, %v636_v0  ;;  %v1089_v61 = vld [vmem:[#allocation11 + $0x418] sm:$0xff]  ;;  %v4861_v0 = vpack.c.bf16 %v1072_v58, %v1056_v57  ;;  %v1086_v2 = vld [vmem:[#allocation11 + $0x400] sm:$0xff]  ;;  %v1168_v32 = vld [vmem:[#allocation11 + $0x690] sm:$0xff] }
 0x1ca   :  { %4570 = vmatpush1.bf16.msra.mxu0 %v4569_v10  ;;  %4698 = vmatpush1.bf16.msra.mxu1 %v4697_v11  ;;  %v961_v10 = vld [vmem:[#allocation11 + $0x18] sm:$0xff]  ;;  %v1216_v58 = vld [vmem:[#allocation11 + $0x810] sm:$0xff] }
 0x1cb   :  { %4572 = vmatprep.subr.bf16.mxu0 %v4571_v14  ;;  %4700 = vmatprep.subr.bf16.mxu1 %v4699_v15  ;;  %v977_v11 = vld [vmem:[#allocation11 + $0x98] sm:$0xff]  ;;  %v958_v14 = vld [vmem:[#allocation11] sm:$0xff] }
 0x1cc   :  { %v974_v15 = vld [vmem:[#allocation11 + $0x80] sm:$0xff]  ;;  %v4847_v17 = vpack.c.bf16 %v977_v11, %v961_v10  ;;  %v1135_v10 = vld [vmem:[#allocation11 + $0x588] sm:$0xff]  ;;  %v1121_v11 = vld [vmem:[#allocation11 + $0x518] sm:$0xff] }
 0x1cd   :  { %v4721_v24 = vpack.c.bf16 %v974_v15, %v958_v14  ;;  %v4865_v14 = vpack.c.bf16 %v1104_v8, %v1088_v6  ;;  %v1118_v15 = vld [vmem:[#allocation11 + $0x500] sm:$0xff]  ;;  %v1248_v8 = vld [vmem:[#allocation11 + $0x910] sm:$0xff] }
 0x1ce   :  { %4574 = vmatpush1.bf16.msra.mxu0 %v4573_v22  ;;  %4702 = vmatpush1.bf16.msra.mxu1 %v4701_v23  ;;  %v993_v22 = vld [vmem:[#allocation11 + $0x118] sm:$0xff] }
 0x1cf   :  { %4576 = vmatprep.subr.bf16.mxu0 %v4575_v26  ;;  %4704 = vmatprep.subr.bf16.mxu1 %v4703_v27  ;;  %v1009_v23 = vld [vmem:[#allocation11 + $0x198] sm:$0xff]  ;;  %v990_v26 = vld [vmem:[#allocation11 + $0x100] sm:$0xff] }
 0x1d0   :  { %v1006_v27 = vld [vmem:[#allocation11 + $0x180] sm:$0xff]  ;;  %v4851_v29 = vpack.c.bf16 %v1009_v23, %v993_v22  ;;  %v1167_v22 = vld [vmem:[#allocation11 + $0x688] sm:$0xff]  ;;  %v1153_v23 = vld [vmem:[#allocation11 + $0x618] sm:$0xff] }
 0x1d1   :  { %v4725_v36 = vpack.c.bf16 %v1006_v27, %v990_v26  ;;  %v4869_v26 = vpack.c.bf16 %v1136_v20, %v1120_v19  ;;  %v1150_v27 = vld [vmem:[#allocation11 + $0x600] sm:$0xff]  ;;  %v1280_v20 = vld [vmem:[#allocation11 + $0xa10] sm:$0xff] }
 0x1d2   :  { %4578 = vmatpush1.bf16.msra.mxu0 %v4577_v34  ;;  %4706 = vmatpush1.bf16.msra.mxu1 %v4705_v35  ;;  %v1025_v34 = vld [vmem:[#allocation11 + $0x218] sm:$0xff] }
 0x1d3   :  { %4580 = vmatprep.subr.bf16.mxu0 %v4579_v38  ;;  %4708 = vmatprep.subr.bf16.mxu1 %v4707_v39  ;;  %v1041_v35 = vld [vmem:[#allocation11 + $0x298] sm:$0xff]  ;;  %v1022_v38 = vld [vmem:[#allocation11 + $0x200] sm:$0xff] }
 0x1d4   :  { %v1038_v39 = vld [vmem:[#allocation11 + $0x280] sm:$0xff]  ;;  %v4855_v45 = vpack.c.bf16 %v1041_v35, %v1025_v34  ;;  %v1199_v34 = vld [vmem:[#allocation11 + $0x788] sm:$0xff]  ;;  %v1185_v35 = vld [vmem:[#allocation11 + $0x718] sm:$0xff] }
 0x1d5   :  { %v4729_v52 = vpack.c.bf16 %v1038_v39, %v1022_v38  ;;  %v4873_v38 = vpack.c.bf16 %v1168_v32, %v1152_v31  ;;  %v1182_v39 = vld [vmem:[#allocation11 + $0x700] sm:$0xff]  ;;  %v1312_v32 = vld [vmem:[#allocation11 + $0xb10] sm:$0xff] }
 0x1d6   :  { %4582 = vmatpush1.bf16.msra.mxu0 %v4581_v50  ;;  %4710 = vmatpush1.bf16.msra.mxu1 %v4709_v51  ;;  %v1057_v50 = vld [vmem:[#allocation11 + $0x318] sm:$0xff] }
 0x1d7   :  { %4584 = vmatprep.subr.bf16.mxu0 %v4583_v54  ;;  %4712 = vmatprep.subr.bf16.mxu1 %v4711_v55  ;;  %v1073_v51 = vld [vmem:[#allocation11 + $0x398] sm:$0xff]  ;;  %v1070_v54 = vld [vmem:[#allocation11 + $0x380] sm:$0xff]  ;;  %v4731_v55 = vpack.c.bf16 %v1071_v49, %v1055_v48  ;;  %v1200_v48 = vld [vmem:[#allocation11 + $0x790] sm:$0xff] }
 0x1d8   :  { %v4859_v56 = vpack.c.bf16 %v1073_v51, %v1057_v50  ;;  %v1215_v49 = vld [vmem:[#allocation11 + $0x808] sm:$0xff]  ;;  %v1217_v51 = vld [vmem:[#allocation11 + $0x818] sm:$0xff] }
 0x1d9   :  { %v1231_v50 = vld [vmem:[#allocation11 + $0x888] sm:$0xff] }
 0x1da   :  { %4586 = vmatpush1.bf16.msra.mxu0 %v4585_v62  ;;  %4714 = vmatpush1.bf16.msra.mxu1 %v4713_v63  ;;  %v1105_v62 = vld [vmem:[#allocation11 + $0x498] sm:$0xff]  ;;  %v4733_v63 = vpack.c.bf16 %v1070_v54, %v1054_v53  ;;  %v1214_v54 = vld [vmem:[#allocation11 + $0x800] sm:$0xff] }
 0x1db   :  { %4588 = vmatprep.subr.bf16.mxu0 %v4587_v3  ;;  %4716 = vmatprep.subr.bf16.mxu1 %v4715_v4  ;;  %v1102_v3 = vld [vmem:[#allocation11 + $0x480] sm:$0xff]  ;;  %v4735_v4 = vpack.c.bf16 %v1103_v60, %v1087_v59  ;;  %v4863_v5 = vpack.c.bf16 %v1105_v62, %v1089_v61  ;;  %v1232_v59 = vld [vmem:[#allocation11 + $0x890] sm:$0xff]  ;;  %v1247_v60 = vld [vmem:[#allocation11 + $0x908] sm:$0xff] }
 0x1dc   :  { %v1263_v61 = vld [vmem:[#allocation11 + $0x988] sm:$0xff]  ;;  %v1249_v62 = vld [vmem:[#allocation11 + $0x918] sm:$0xff] }
 0x1de   :  { %4590 = vmatpush1.bf16.msra.mxu0 %v4589_v12  ;;  %4718 = vmatpush1.bf16.msra.mxu1 %v4717_v13  ;;  %v1137_v12 = vld [vmem:[#allocation11 + $0x598] sm:$0xff]  ;;  %v4737_v13 = vpack.c.bf16 %v1102_v3, %v1086_v2  ;;  %v4881_v2 = vpack.c.bf16 %v1232_v59, %v1216_v58  ;;  %v1246_v3 = vld [vmem:[#allocation11 + $0x900] sm:$0xff]  ;;  %v1376_v59 = vld [vmem:[#allocation11 + $0xd10] sm:$0xff] }
 0x1df   :  { %4720 = vmatprep.subr.bf16.mxu0 %v4719_v16  ;;  %4848 = vmatprep.subr.bf16.mxu1 %v4847_v17  ;;  %v1134_v16 = vld [vmem:[#allocation11 + $0x580] sm:$0xff]  ;;  %v4739_v17 = vpack.c.bf16 %v1135_v10, %v1119_v9  ;;  %v4867_v18 = vpack.c.bf16 %v1137_v12, %v1121_v11  ;;  %v1264_v9 = vld [vmem:[#allocation11 + $0x990] sm:$0xff]  ;;  %v1279_v10 = vld [vmem:[#allocation11 + $0xa08] sm:$0xff] }
 0x1e0   :  { %v1295_v11 = vld [vmem:[#allocation11 + $0xa88] sm:$0xff]  ;;  %v1281_v12 = vld [vmem:[#allocation11 + $0xa18] sm:$0xff] }
 0x1e1   :  { %802 = vmatmul.mubr.f32.vlgmr.msra.gmra.mrb[2].mxu0 %v6596_v43  ;;  %944 = vmatmul.mubr.f32.vlgmr.msra.gmra.mrb[2].mxu1 %v6596_v43  ;;  %v4857_v43 = vpack.c.bf16 %v1040_v47, %v1024_v46  ;;  %v1184_v47 = vld [vmem:[#allocation11 + $0x710] sm:$0xff] }
 0x1e2   :  { %4722 = vmatpush1.bf16.msra.mxu0 %v4721_v24  ;;  %4850 = vmatpush1.bf16.msra.mxu1 %v4849_v25  ;;  %v1169_v24 = vld [vmem:[#allocation11 + $0x698] sm:$0xff]  ;;  %v4741_v25 = vpack.c.bf16 %v1134_v16, %v1118_v15  ;;  %v4877_v53 = vpack.c.bf16 %v1200_v48, %v1184_v47  ;;  %v4885_v15 = vpack.c.bf16 %v1264_v9, %v1248_v8  ;;  %v1278_v16 = vld [vmem:[#allocation11 + $0xa00] sm:$0xff]  ;;  %v1344_v48 = vld [vmem:[#allocation11 + $0xc10] sm:$0xff] }
 0x1e3   :  { %4724 = vmatprep.subr.bf16.mxu0 %v4723_v28  ;;  %4852 = vmatprep.subr.bf16.mxu1 %v4851_v29  ;;  %v1166_v28 = vld [vmem:[#allocation11 + $0x680] sm:$0xff]  ;;  %v4743_v29 = vpack.c.bf16 %v1167_v22, %v1151_v21  ;;  %v4871_v30 = vpack.c.bf16 %v1169_v24, %v1153_v23  ;;  %v1296_v21 = vld [vmem:[#allocation11 + $0xa90] sm:$0xff]  ;;  %v1311_v22 = vld [vmem:[#allocation11 + $0xb08] sm:$0xff] }
 0x1e4   :  { %v1327_v23 = vld [vmem:[#allocation11 + $0xb88] sm:$0xff]  ;;  %v1313_v24 = vld [vmem:[#allocation11 + $0xb18] sm:$0xff]  ;;  %v1422_v8 = vld [vmem:[#allocation11 + $0xe80] sm:$0xff] }
 0x1e5   :  { %v1408_v9 = vld [vmem:[#allocation11 + $0xe10] sm:$0xff] }
 0x1e6   :  { %4726 = vmatpush1.bf16.msra.mxu0 %v4725_v36  ;;  %4854 = vmatpush1.bf16.msra.mxu1 %v4853_v37  ;;  %v1201_v36 = vld [vmem:[#allocation11 + $0x798] sm:$0xff]  ;;  %v4745_v37 = vpack.c.bf16 %v1166_v28, %v1150_v27  ;;  %v4889_v27 = vpack.c.bf16 %v1296_v21, %v1280_v20  ;;  %v1310_v28 = vld [vmem:[#allocation11 + $0xb00] sm:$0xff] }
 0x1e7   :  { %4728 = vmatprep.subr.bf16.mxu0 %v4727_v40  ;;  %4856 = vmatprep.subr.bf16.mxu1 %v4855_v45  ;;  %v1198_v40 = vld [vmem:[#allocation11 + $0x780] sm:$0xff]  ;;  %v4747_v45 = vpack.c.bf16 %v1199_v34, %v1183_v33  ;;  %v4875_v46 = vpack.c.bf16 %v1201_v36, %v1185_v35  ;;  %v1328_v33 = vld [vmem:[#allocation11 + $0xb90] sm:$0xff]  ;;  %v1343_v34 = vld [vmem:[#allocation11 + $0xc08] sm:$0xff] }
 0x1e8   :  { %v1359_v35 = vld [vmem:[#allocation11 + $0xc88] sm:$0xff]  ;;  %v1345_v36 = vld [vmem:[#allocation11 + $0xc18] sm:$0xff] }
 0x1ea   :  { %4730 = vmatpush1.bf16.msra.mxu0 %v4729_v52  ;;  %4858 = vmatpush1.bf16.msra.mxu1 %v4857_v43  ;;  %v1233_v52 = vld [vmem:[#allocation11 + $0x898] sm:$0xff]  ;;  %v4749_v43 = vpack.c.bf16 %v1198_v40, %v1182_v39  ;;  %v4893_v39 = vpack.c.bf16 %v1328_v33, %v1312_v32  ;;  %v1342_v40 = vld [vmem:[#allocation11 + $0xc00] sm:$0xff] }
 0x1eb   :  { %4732 = vmatprep.subr.bf16.mxu0 %v4731_v55  ;;  %4860 = vmatprep.subr.bf16.mxu1 %v4859_v56  ;;  %v1230_v55 = vld [vmem:[#allocation11 + $0x880] sm:$0xff]  ;;  %v4751_v56 = vpack.c.bf16 %v1231_v50, %v1215_v49  ;;  %v4879_v57 = vpack.c.bf16 %v1233_v52, %v1217_v51  ;;  %v1360_v49 = vld [vmem:[#allocation11 + $0xc90] sm:$0xff]  ;;  %v1375_v50 = vld [vmem:[#allocation11 + $0xd08] sm:$0xff] }
 0x1ec   :  { %v1391_v51 = vld [vmem:[#allocation11 + $0xd88] sm:$0xff]  ;;  %v1377_v52 = vld [vmem:[#allocation11 + $0xd18] sm:$0xff] }
 0x1ee   :  { %4734 = vmatpush1.bf16.msra.mxu0 %v4733_v63  ;;  %4862 = vmatpush1.bf16.msra.mxu1 %v4861_v0  ;;  %v1265_v63 = vld [vmem:[#allocation11 + $0x998] sm:$0xff]  ;;  %v4753_v0 = vpack.c.bf16 %v1230_v55, %v1214_v54  ;;  %v4897_v54 = vpack.c.bf16 %v1360_v49, %v1344_v48  ;;  %v1374_v55 = vld [vmem:[#allocation11 + $0xd00] sm:$0xff]  ;;  %v1472_v48 = vld [vmem:[#allocation11 + $0x1010] sm:$0xff] }
 0x1ef   :  { %4736 = vmatprep.subr.bf16.mxu0 %v4735_v4  ;;  %4864 = vmatprep.subr.bf16.mxu1 %v4863_v5  ;;  %v1262_v4 = vld [vmem:[#allocation11 + $0x980] sm:$0xff]  ;;  %v4755_v5 = vpack.c.bf16 %v1263_v61, %v1247_v60  ;;  %v4883_v6 = vpack.c.bf16 %v1265_v63, %v1249_v62  ;;  %v1392_v60 = vld [vmem:[#allocation11 + $0xd90] sm:$0xff]  ;;  %v1407_v61 = vld [vmem:[#allocation11 + $0xe08] sm:$0xff] }
 0x1f0   :  { %v1423_v62 = vld [vmem:[#allocation11 + $0xe88] sm:$0xff]  ;;  %v1409_v63 = vld [vmem:[#allocation11 + $0xe18] sm:$0xff]  ;;  %v1488_v49 = vld [vmem:[#allocation11 + $0x1090] sm:$0xff] }
 0x1f2   :  { %4738 = vmatpush1.bf16.msra.mxu0 %v4737_v13  ;;  %4866 = vmatpush1.bf16.msra.mxu1 %v4865_v14  ;;  %v1297_v13 = vld [vmem:[#allocation11 + $0xa98] sm:$0xff]  ;;  %v4757_v14 = vpack.c.bf16 %v1262_v4, %v1246_v3  ;;  %v4901_v3 = vpack.c.bf16 %v1392_v60, %v1376_v59  ;;  %v1406_v4 = vld [vmem:[#allocation11 + $0xe00] sm:$0xff]  ;;  %v4913_v60 = vpack.c.bf16 %v1488_v49, %v1472_v48 }
 0x1f3   :  { %4740 = vmatprep.subr.bf16.mxu0 %v4739_v17  ;;  %4868 = vmatprep.subr.bf16.mxu1 %v4867_v18  ;;  %v1294_v17 = vld [vmem:[#allocation11 + $0xa80] sm:$0xff]  ;;  %v4759_v18 = vpack.c.bf16 %v1295_v11, %v1279_v10  ;;  %v4887_v19 = vpack.c.bf16 %v1297_v13, %v1281_v12  ;;  %v1424_v10 = vld [vmem:[#allocation11 + $0xe90] sm:$0xff]  ;;  %v4777_v11 = vpack.c.bf16 %v1422_v8, %v1406_v4  ;;  %v1439_v13 = vld [vmem:[#allocation11 + $0xf08] sm:$0xff] }
 0x1f4   :  { %v4905_v12 = vpack.c.bf16 %v1424_v10, %v1408_v9  ;;  %v1553_v8 = vld [vmem:[#allocation11 + $0x1298] sm:$0xff] }
 0x1f5   :  { %v1649_v48 = vld [vmem:[#allocation11 + $0x1598] sm:$0xff] }
 0x1f6   :  { %4742 = vmatpush1.bf16.msra.mxu0 %v4741_v25  ;;  %4870 = vmatpush1.bf16.msra.mxu1 %v4869_v26  ;;  %v1329_v25 = vld [vmem:[#allocation11 + $0xb98] sm:$0xff]  ;;  %v4761_v26 = vpack.c.bf16 %v1294_v17, %v1278_v16 }
 0x1f7   :  { %4744 = vmatprep.subr.bf16.mxu0 %v4743_v29  ;;  %4872 = vmatprep.subr.bf16.mxu1 %v4871_v30  ;;  %v1326_v29 = vld [vmem:[#allocation11 + $0xb80] sm:$0xff]  ;;  %v4763_v30 = vpack.c.bf16 %v1327_v23, %v1311_v22  ;;  %v4891_v31 = vpack.c.bf16 %v1329_v25, %v1313_v24  ;;  %v1457_v17 = vld [vmem:[#allocation11 + $0xf98] sm:$0xff]  ;;  %v1440_v22 = vld [vmem:[#allocation11 + $0xf10] sm:$0xff] }
 0x1f8   :  { %v1456_v23 = vld [vmem:[#allocation11 + $0xf90] sm:$0xff]  ;;  %v1471_v25 = vld [vmem:[#allocation11 + $0x1008] sm:$0xff] }
 0x1f9   :  { %v4909_v24 = vpack.c.bf16 %v1456_v23, %v1440_v22  ;;  %v1566_v23 = vld [vmem:[#allocation11 + $0x1300] sm:$0xff] }
 0x1fa   :  { %4746 = vmatpush1.bf16.msra.mxu0 %v4745_v37  ;;  %4874 = vmatpush1.bf16.msra.mxu1 %v4873_v38  ;;  %v1361_v37 = vld [vmem:[#allocation11 + $0xc98] sm:$0xff]  ;;  %v4765_v38 = vpack.c.bf16 %v1326_v29, %v1310_v28 }
 0x1fb   :  { %4748 = vmatprep.subr.bf16.mxu0 %v4747_v45  ;;  %4876 = vmatprep.subr.bf16.mxu1 %v4875_v46  ;;  %v1358_v45 = vld [vmem:[#allocation11 + $0xc80] sm:$0xff]  ;;  %v4767_v46 = vpack.c.bf16 %v1359_v35, %v1343_v34  ;;  %v4895_v47 = vpack.c.bf16 %v1361_v37, %v1345_v36  ;;  %v1489_v29 = vld [vmem:[#allocation11 + $0x1098] sm:$0xff] }
 0x1fe   :  { %4750 = vmatpush1.bf16.msra.mxu0 %v4749_v43  ;;  %4878 = vmatpush1.bf16.msra.mxu1 %v4877_v53  ;;  %v1393_v43 = vld [vmem:[#allocation11 + $0xd98] sm:$0xff]  ;;  %v4769_v53 = vpack.c.bf16 %v1358_v45, %v1342_v40 }
 0x1ff   :  { %4752 = vmatprep.subr.bf16.mxu0 %v4751_v56  ;;  %4880 = vmatprep.subr.bf16.mxu1 %v4879_v57  ;;  %v1390_v56 = vld [vmem:[#allocation11 + $0xd80] sm:$0xff]  ;;  %v4771_v57 = vpack.c.bf16 %v1391_v51, %v1375_v50  ;;  %v4899_v58 = vpack.c.bf16 %v1393_v43, %v1377_v52  ;;  %v1503_v52 = vld [vmem:[#allocation11 + $0x1108] sm:$0xff] }
 0x202   :  { %4754 = vmatpush1.bf16.msra.mxu0 %v4753_v0  ;;  %4882 = vmatpush1.bf16.msra.mxu1 %v4881_v2  ;;  %v1425_v0 = vld [vmem:[#allocation11 + $0xe98] sm:$0xff]  ;;  %v4773_v2 = vpack.c.bf16 %v1390_v56, %v1374_v55 }
 0x203   :  { %4756 = vmatprep.subr.bf16.mxu0 %v4755_v5  ;;  %4884 = vmatprep.subr.bf16.mxu1 %v4883_v6  ;;  %v4775_v5 = vpack.c.bf16 %v1423_v62, %v1407_v61  ;;  %v4903_v6 = vpack.c.bf16 %v1425_v0, %v1409_v63  ;;  %v1505_v55 = vld [vmem:[#allocation11 + $0x1118] sm:$0xff]  ;;  %v1502_v61 = vld [vmem:[#allocation11 + $0x1100] sm:$0xff]  ;;  %v1504_v63 = vld [vmem:[#allocation11 + $0x1110] sm:$0xff] }
 0x204   :  { %v1521_v56 = vld [vmem:[#allocation11 + $0x1198] sm:$0xff]  ;;  %v1518_v62 = vld [vmem:[#allocation11 + $0x1180] sm:$0xff]  ;;  %v1520_v0 = vld [vmem:[#allocation11 + $0x1190] sm:$0xff] }
 0x205   :  { %v4915_v4 = vpack.c.bf16 %v1521_v56, %v1505_v55  ;;  %v4789_v9 = vpack.c.bf16 %v1518_v62, %v1502_v61  ;;  %v4917_v10 = vpack.c.bf16 %v1520_v0, %v1504_v63  ;;  %v1632_v55 = vld [vmem:[#allocation11 + $0x1510] sm:$0xff]  ;;  %v1681_v61 = vld [vmem:[#allocation11 + $0x1698] sm:$0xff]  ;;  %v1662_v0 = vld [vmem:[#allocation11 + $0x1600] sm:$0xff] }
 0x206   :  { %4758 = vmatpush1.bf16.msra.mxu0 %v4757_v14  ;;  %4886 = vmatpush1.bf16.msra.mxu1 %v4885_v15  ;;  %v1455_v14 = vld [vmem:[#allocation11 + $0xf88] sm:$0xff]  ;;  %v1441_v15 = vld [vmem:[#allocation11 + $0xf18] sm:$0xff]  ;;  %v1648_v56 = vld [vmem:[#allocation11 + $0x1590] sm:$0xff] }
 0x207   :  { %4760 = vmatprep.subr.bf16.mxu0 %v4759_v18  ;;  %4888 = vmatprep.subr.bf16.mxu1 %v4887_v19  ;;  %v4779_v16 = vpack.c.bf16 %v1455_v14, %v1439_v13  ;;  %v1438_v18 = vld [vmem:[#allocation11 + $0xf00] sm:$0xff]  ;;  %v4907_v20 = vpack.c.bf16 %v1457_v17, %v1441_v15  ;;  %v1536_v15 = vld [vmem:[#allocation11 + $0x1210] sm:$0xff]  ;;  %v1567_v17 = vld [vmem:[#allocation11 + $0x1308] sm:$0xff]  ;;  %v4933_v63 = vpack.c.bf16 %v1648_v56, %v1632_v55 }
 0x208   :  { %v1454_v19 = vld [vmem:[#allocation11 + $0xf80] sm:$0xff] }
 0x209   :  { %v4781_v21 = vpack.c.bf16 %v1454_v19, %v1438_v18  ;;  %v1583_v18 = vld [vmem:[#allocation11 + $0x1388] sm:$0xff]  ;;  %v1569_v19 = vld [vmem:[#allocation11 + $0x1318] sm:$0xff]  ;;  %v1806_v55 = vld [vmem:[#allocation11 + $0x1a80] sm:$0xff] }
 0x20a   :  { %4762 = vmatpush1.bf16.msra.mxu0 %v4761_v26  ;;  %4890 = vmatpush1.bf16.msra.mxu1 %v4889_v27  ;;  %v1487_v26 = vld [vmem:[#allocation11 + $0x1088] sm:$0xff]  ;;  %v1473_v27 = vld [vmem:[#allocation11 + $0x1018] sm:$0xff] }
 0x20b   :  { %4764 = vmatprep.subr.bf16.mxu0 %v4763_v30  ;;  %4892 = vmatprep.subr.bf16.mxu1 %v4891_v31  ;;  %v4783_v28 = vpack.c.bf16 %v1487_v26, %v1471_v25  ;;  %v4911_v30 = vpack.c.bf16 %v1489_v29, %v1473_v27  ;;  %v644_v31 = vld [vmem:[#allocation10] sm:$0xf]  ;;  %v4795_v25 = vpack.c.bf16 %v1583_v18, %v1567_v17  ;;  %v1568_v27 = vld [vmem:[#allocation11 + $0x1310] sm:$0xff]  ;;  %v1599_v29 = vld [vmem:[#allocation11 + $0x1408] sm:$0xff] }
 0x20c   :  { %v649_v32 = vrot.slane %v644_v31, %v6575_v42  ;;  %v657_v33 = vrot.slane %v644_v31, %v6587_v1  ;;  %v653_v34 = vrot.slane %v644_v31, %v6580_v44  ;;  %v661_v35 = vrot.slane %v644_v31, %v6590_v7  ;;  %v1601_v31 = vld [vmem:[#allocation11 + $0x1418] sm:$0xff]  ;;  %v1696_v18 = vld [vmem:[#allocation11 + $0x1710] sm:$0xff] }
 0x20e   :  { %4766 = vmatpush1.bf16.msra.mxu0 %v4765_v38  ;;  %4894 = vmatpush1.bf16.msra.mxu1 %v4893_v39  ;;  %v1470_v38 = vld [vmem:[#allocation11 + $0x1000] sm:$0xff] }
 0x20f   :  { %4768 = vmatprep.subr.bf16.mxu0 %v4767_v46  ;;  %4896 = vmatprep.subr.bf16.mxu1 %v4895_v47  ;;  %v1486_v47 = vld [vmem:[#allocation11 + $0x1080] sm:$0xff] }
 0x210   :  { %v4785_v59 = vpack.c.bf16 %v1486_v47, %v1470_v38  ;;  %v1633_v47 = vld [vmem:[#allocation11 + $0x1518] sm:$0xff] }
 0x212   :  { %4770 = vmatpush1.bf16.msra.mxu0 %v4769_v53  ;;  %4898 = vmatpush1.bf16.msra.mxu1 %v4897_v54  ;;  %v1519_v54 = vld [vmem:[#allocation11 + $0x1188] sm:$0xff] }
 0x213   :  { %4772 = vmatprep.subr.bf16.mxu0 %v4771_v57  ;;  %4900 = vmatprep.subr.bf16.mxu1 %v4899_v58 }
 0x216   :  { %4774 = vmatpush1.bf16.msra.mxu0 %v4773_v2  ;;  %4902 = vmatpush1.bf16.msra.mxu1 %v4901_v3  ;;  %v1535_v2 = vld [vmem:[#allocation11 + $0x1208] sm:$0xff]  ;;  %v4787_v3 = vpack.c.bf16 %v1519_v54, %v1503_v52  ;;  %v1646_v52 = vld [vmem:[#allocation11 + $0x1580] sm:$0xff]  ;;  %v4931_v54 = vpack.c.bf16 %v1649_v48, %v1633_v47  ;;  %v1776_v47 = vld [vmem:[#allocation11 + $0x1990] sm:$0xff] }
 0x217   :  { %4776 = vmatprep.subr.bf16.mxu0 %v4775_v5  ;;  %4904 = vmatprep.subr.bf16.mxu1 %v4903_v6  ;;  %v1551_v5 = vld [vmem:[#allocation11 + $0x1288] sm:$0xff]  ;;  %v1537_v6 = vld [vmem:[#allocation11 + $0x1218] sm:$0xff] }
 0x218   :  { %v4791_v13 = vpack.c.bf16 %v1551_v5, %v1535_v2  ;;  %v4919_v14 = vpack.c.bf16 %v1553_v8, %v1537_v6  ;;  %v1678_v2 = vld [vmem:[#allocation11 + $0x1680] sm:$0xff]  ;;  %v1664_v5 = vld [vmem:[#allocation11 + $0x1610] sm:$0xff]  ;;  %v1695_v8 = vld [vmem:[#allocation11 + $0x1708] sm:$0xff] }
 0x219   :  { %v1680_v6 = vld [vmem:[#allocation11 + $0x1690] sm:$0xff]  ;;  %v1791_v48 = vld [vmem:[#allocation11 + $0x1a08] sm:$0xff] }
 0x21a   :  { %4778 = vmatpush1.bf16.msra.mxu0 %v4777_v11  ;;  %4906 = vmatpush1.bf16.msra.mxu1 %v4905_v12  ;;  %v1534_v11 = vld [vmem:[#allocation11 + $0x1200] sm:$0xff] }
 0x21b   :  { %4780 = vmatprep.subr.bf16.mxu0 %v4779_v16  ;;  %4908 = vmatprep.subr.bf16.mxu1 %v4907_v20  ;;  %v1550_v12 = vld [vmem:[#allocation11 + $0x1280] sm:$0xff]  ;;  %v1552_v16 = vld [vmem:[#allocation11 + $0x1290] sm:$0xff]  ;;  %v1585_v20 = vld [vmem:[#allocation11 + $0x1398] sm:$0xff] }
 0x21c   :  { %v4921_v22 = vpack.c.bf16 %v1552_v16, %v1536_v15  ;;  %v4923_v26 = vpack.c.bf16 %v1585_v20, %v1569_v19  ;;  %v1710_v15 = vld [vmem:[#allocation11 + $0x1780] sm:$0xff]  ;;  %v1712_v19 = vld [vmem:[#allocation11 + $0x1790] sm:$0xff]  ;;  %v1727_v20 = vld [vmem:[#allocation11 + $0x1808] sm:$0xff] }
 0x21e   :  { %4782 = vmatpush1.bf16.msra.mxu0 %v4781_v21  ;;  %4910 = vmatpush1.bf16.msra.mxu1 %v4909_v24  ;;  %v4793_v21 = vpack.c.bf16 %v1550_v12, %v1534_v11  ;;  %v1582_v24 = vld [vmem:[#allocation11 + $0x1380] sm:$0xff]  ;;  %v1713_v11 = vld [vmem:[#allocation11 + $0x1798] sm:$0xff]  ;;  %v4809_v12 = vpack.c.bf16 %v1678_v2, %v1662_v0 }
 0x21f   :  { %4784 = vmatprep.subr.bf16.mxu0 %v4783_v28  ;;  %4912 = vmatprep.subr.bf16.mxu1 %v4911_v30  ;;  %v1584_v28 = vld [vmem:[#allocation11 + $0x1390] sm:$0xff]  ;;  %v1615_v30 = vld [vmem:[#allocation11 + $0x1488] sm:$0xff]  ;;  %v1841_v0 = vld [vmem:[#allocation11 + $0x1b98] sm:$0xff] }
 0x2b4   :  { %v803_v36 = vpop.f32.mrb[2].mxu0  ;;  %v945_v37 = vpop.f32.mrb[2].mxu1 }
 0x2b5   :  { %v5999_v39 = vadd.f32 %v803_v36, %v649_v32  ;;  %v6001_v40 = vadd.f32 %v945_v37, %v657_v33  ;;  %v805_v45 = vpop.f32.mrb[3].mxu0  ;;  %v947_v46 = vpop.f32.mrb[3].mxu1  ;;  %v1617_v32 = vld [vmem:[#allocation11 + $0x1498] sm:$0xff]  ;;  %v4797_v33 = vpack.c.bf16 %v1582_v24, %v1566_v23  ;;  %v1614_v36 = vld [vmem:[#allocation11 + $0x1480] sm:$0xff]  ;;  %v4799_v37 = vpack.c.bf16 %v1615_v30, %v1599_v29  ;;  %v1728_v30 = vld [vmem:[#allocation11 + $0x1810] sm:$0xff] }
 0x2b6   :  { %v6000_v50 = vadd.f32 %v805_v45, %v653_v34  ;;  %v6002_v51 = vadd.f32 %v947_v46, %v661_v35  ;;  %v4925_v34 = vpack.c.bf16 %v1584_v28, %v1568_v27  ;;  %v1598_v35 = vld [vmem:[#allocation11 + $0x1400] sm:$0xff]  ;;  %v4927_v38 = vpack.c.bf16 %v1617_v32, %v1601_v31  ;;  %v1631_v45 = vld [vmem:[#allocation11 + $0x1508] sm:$0xff]  ;;  %v1745_v23 = vld [vmem:[#allocation11 + $0x1898] sm:$0xff] }
 0x2b7   :  { %v950_v43 = vmax.f32 %v5999_v39, 0.0  ;;  %v6605_v53 = vmax.f32 %v6001_v40, 0.0  ;;  %v1600_v39 = vld [vmem:[#allocation11 + $0x1410] sm:$0xff]  ;;  %v1647_v46 = vld [vmem:[#allocation11 + $0x1588] sm:$0xff]  ;;  %v4801_v49 = vpack.c.bf16 %v1614_v36, %v1598_v35  ;;  %v1742_v27 = vld [vmem:[#allocation11 + $0x1880] sm:$0xff] }
 0x2b8   :  { %v6607_v57 = vmax.f32 %v6000_v50, 0.0  ;;  %v953_v58 = vmax.f32 %v6002_v51, 0.0  ;;  %v1616_v40 = vld [vmem:[#allocation11 + $0x1490] sm:$0xff]  ;;  %v1630_v51 = vld [vmem:[#allocation11 + $0x1500] sm:$0xff]  ;;  %v1759_v32 = vld [vmem:[#allocation11 + $0x1908] sm:$0xff] }
 0x2b9   :  { %954 = vst [vmem:[#allocation18] sm:$0xff] %v950_v43  ;;  %956 = vst [vmem:[#allocation18 + $0x10] sm:$0xff] %v6605_v53  ;;  %v4929_v50 = vpack.c.bf16 %v1616_v40, %v1600_v39  ;;  %v4805_v62 = vpack.c.bf16 %v1646_v52, %v1630_v51  ;;  %v1744_v31 = vld [vmem:[#allocation11 + $0x1890] sm:$0xff]  ;;  %v1777_v35 = vld [vmem:[#allocation11 + $0x1998] sm:$0xff] }
 0x2ba   :  { %955 = vst [vmem:[#allocation18 + $0x8] sm:$0xff] %v6607_v57  ;;  %957 = vst [vmem:[#allocation18 + $0x18] sm:$0xff] %v953_v58  ;;  %2130 = vmatprep.mubr.f32.mxu0 %v6607_v57  ;;  %2272 = vmatprep.mubr.f32.mxu1 %v6607_v57  ;;  %v1774_v39 = vld [vmem:[#allocation11 + $0x1980] sm:$0xff]  ;;  %v1809_v51 = vld [vmem:[#allocation11 + $0x1a98] sm:$0xff] }
 0x2bb   :  { %2131 = vmatmul.mubr.f32.vlgmr.msra.gmra.mrb[4].mxu0 %v950_v43  ;;  %2273 = vmatmul.mubr.f32.vlgmr.msra.gmra.mrb[4].mxu1 %v950_v43  ;;  %v4803_v43 = vpack.c.bf16 %v1647_v46, %v1631_v45  ;;  %v1760_v46 = vld [vmem:[#allocation11 + $0x1910] sm:$0xff] }
 0x2bc   :  { %4786 = vmatpush1.bf16.msra.mxu0 %v4785_v59  ;;  %4914 = vmatpush1.bf16.msra.mxu1 %v4913_v60  ;;  %v1679_v59 = vld [vmem:[#allocation11 + $0x1688] sm:$0xff]  ;;  %v1665_v60 = vld [vmem:[#allocation11 + $0x1618] sm:$0xff] }
 0x2bd   :  { %2201 = vmatprep.mubr.f32.mxu0 %v953_v58  ;;  %2343 = vmatprep.mubr.f32.mxu1 %v953_v58  ;;  %v1663_v58 = vld [vmem:[#allocation11 + $0x1608] sm:$0xff] }
 0x2be   :  { %4788 = vmatprep.subr.bf16.mxu0 %v4787_v3  ;;  %4916 = vmatprep.subr.bf16.mxu1 %v4915_v4  ;;  %v4807_v3 = vpack.c.bf16 %v1679_v59, %v1663_v58  ;;  %v4935_v4 = vpack.c.bf16 %v1681_v61, %v1665_v60  ;;  %v1792_v59 = vld [vmem:[#allocation11 + $0x1a10] sm:$0xff]  ;;  %v1823_v61 = vld [vmem:[#allocation11 + $0x1b08] sm:$0xff] }
 0x2bf   :  { %v1808_v60 = vld [vmem:[#allocation11 + $0x1a90] sm:$0xff] }
 0x2c0   :  { %4790 = vmatpush1.bf16.msra.mxu0 %v4789_v9  ;;  %4918 = vmatpush1.bf16.msra.mxu1 %v4917_v10  ;;  %v1711_v9 = vld [vmem:[#allocation11 + $0x1788] sm:$0xff]  ;;  %v1697_v10 = vld [vmem:[#allocation11 + $0x1718] sm:$0xff] }
 0x2c1   :  { %4792 = vmatprep.subr.bf16.mxu0 %v4791_v13  ;;  %4920 = vmatprep.subr.bf16.mxu1 %v4919_v14  ;;  %v4937_v13 = vpack.c.bf16 %v1680_v6, %v1664_v5  ;;  %v1694_v14 = vld [vmem:[#allocation11 + $0x1700] sm:$0xff]  ;;  %v4811_v16 = vpack.c.bf16 %v1711_v9, %v1695_v8  ;;  %v4939_v17 = vpack.c.bf16 %v1713_v11, %v1697_v10  ;;  %v1824_v9 = vld [vmem:[#allocation11 + $0x1b10] sm:$0xff]  ;;  %v1855_v11 = vld [vmem:[#allocation11 + $0x1c08] sm:$0xff] }
 0x2c2   :  { %v4813_v24 = vpack.c.bf16 %v1710_v15, %v1694_v14  ;;  %v1838_v5 = vld [vmem:[#allocation11 + $0x1b80] sm:$0xff]  ;;  %v1840_v10 = vld [vmem:[#allocation11 + $0x1b90] sm:$0xff]  ;;  %v1873_v14 = vld [vmem:[#allocation11 + $0x1c98] sm:$0xff] }
 0x2c4   :  { %4794 = vmatpush1.bf16.msra.mxu0 %v4793_v21  ;;  %4922 = vmatpush1.bf16.msra.mxu1 %v4921_v22  ;;  %v1743_v21 = vld [vmem:[#allocation11 + $0x1888] sm:$0xff]  ;;  %v1729_v22 = vld [vmem:[#allocation11 + $0x1818] sm:$0xff] }
 0x2c5   :  { %4796 = vmatprep.subr.bf16.mxu0 %v4795_v25  ;;  %4924 = vmatprep.subr.bf16.mxu1 %v4923_v26  ;;  %v4941_v25 = vpack.c.bf16 %v1712_v19, %v1696_v18  ;;  %v1726_v26 = vld [vmem:[#allocation11 + $0x1800] sm:$0xff]  ;;  %v4815_v28 = vpack.c.bf16 %v1743_v21, %v1727_v20  ;;  %v4943_v29 = vpack.c.bf16 %v1745_v23, %v1729_v22  ;;  %v1856_v21 = vld [vmem:[#allocation11 + $0x1c10] sm:$0xff]  ;;  %v1887_v23 = vld [vmem:[#allocation11 + $0x1d08] sm:$0xff] }
 0x2c6   :  { %v4817_v36 = vpack.c.bf16 %v1742_v27, %v1726_v26  ;;  %v1870_v18 = vld [vmem:[#allocation11 + $0x1c80] sm:$0xff]  ;;  %v1872_v22 = vld [vmem:[#allocation11 + $0x1c90] sm:$0xff]  ;;  %v1905_v26 = vld [vmem:[#allocation11 + $0x1d98] sm:$0xff] }
 0x2c8   :  { %4798 = vmatpush1.bf16.msra.mxu0 %v4797_v33  ;;  %4926 = vmatpush1.bf16.msra.mxu1 %v4925_v34  ;;  %v1775_v33 = vld [vmem:[#allocation11 + $0x1988] sm:$0xff]  ;;  %v1761_v34 = vld [vmem:[#allocation11 + $0x1918] sm:$0xff] }
 0x2c9   :  { %4800 = vmatprep.subr.bf16.mxu0 %v4799_v37  ;;  %4928 = vmatprep.subr.bf16.mxu1 %v4927_v38  ;;  %v4945_v37 = vpack.c.bf16 %v1744_v31, %v1728_v30  ;;  %v1758_v38 = vld [vmem:[#allocation11 + $0x1900] sm:$0xff]  ;;  %v4819_v40 = vpack.c.bf16 %v1775_v33, %v1759_v32  ;;  %v4947_v45 = vpack.c.bf16 %v1777_v35, %v1761_v34  ;;  %v1888_v33 = vld [vmem:[#allocation11 + $0x1d10] sm:$0xff]  ;;  %v1919_v35 = vld [vmem:[#allocation11 + $0x1e08] sm:$0xff] }
 0x2ca   :  { %v4821_v52 = vpack.c.bf16 %v1774_v39, %v1758_v38  ;;  %v1902_v30 = vld [vmem:[#allocation11 + $0x1d80] sm:$0xff]  ;;  %v1904_v34 = vld [vmem:[#allocation11 + $0x1d90] sm:$0xff]  ;;  %v1937_v38 = vld [vmem:[#allocation11 + $0x1e98] sm:$0xff] }
 0x2cc   :  { %4802 = vmatpush1.bf16.msra.mxu0 %v4801_v49  ;;  %4930 = vmatpush1.bf16.msra.mxu1 %v4929_v50  ;;  %v1807_v49 = vld [vmem:[#allocation11 + $0x1a88] sm:$0xff]  ;;  %v1793_v50 = vld [vmem:[#allocation11 + $0x1a18] sm:$0xff] }
 0x2cd   :  { %4804 = vmatprep.subr.bf16.mxu0 %v4803_v43  ;;  %4932 = vmatprep.subr.bf16.mxu1 %v4931_v54  ;;  %v4949_v43 = vpack.c.bf16 %v1776_v47, %v1760_v46  ;;  %v1790_v54 = vld [vmem:[#allocation11 + $0x1a00] sm:$0xff]  ;;  %v4823_v56 = vpack.c.bf16 %v1807_v49, %v1791_v48  ;;  %v4951_v58 = vpack.c.bf16 %v1809_v51, %v1793_v50  ;;  %v1920_v49 = vld [vmem:[#allocation11 + $0x1e10] sm:$0xff]  ;;  %v1951_v51 = vld [vmem:[#allocation11 + $0x1f08] sm:$0xff] }
 0x2ce   :  { %v4825_v2 = vpack.c.bf16 %v1806_v55, %v1790_v54  ;;  %v1934_v46 = vld [vmem:[#allocation11 + $0x1e80] sm:$0xff]  ;;  %v1936_v50 = vld [vmem:[#allocation11 + $0x1e90] sm:$0xff]  ;;  %v1969_v54 = vld [vmem:[#allocation11 + $0x1f98] sm:$0xff] }
 0x2d0   :  { %4806 = vmatpush1.bf16.msra.mxu0 %v4805_v62  ;;  %4934 = vmatpush1.bf16.msra.mxu1 %v4933_v63  ;;  %v1839_v62 = vld [vmem:[#allocation11 + $0x1b88] sm:$0xff]  ;;  %v1825_v63 = vld [vmem:[#allocation11 + $0x1b18] sm:$0xff] }
 0x2d1   :  { %4808 = vmatprep.subr.bf16.mxu0 %v4807_v3  ;;  %4936 = vmatprep.subr.bf16.mxu1 %v4935_v4  ;;  %v4953_v3 = vpack.c.bf16 %v1808_v60, %v1792_v59  ;;  %v1822_v4 = vld [vmem:[#allocation11 + $0x1b00] sm:$0xff]  ;;  %v4827_v6 = vpack.c.bf16 %v1839_v62, %v1823_v61  ;;  %v4955_v8 = vpack.c.bf16 %v1841_v0, %v1825_v63  ;;  %v1952_v62 = vld [vmem:[#allocation11 + $0x1f10] sm:$0xff]  ;;  %v963_v0 = vld [vmem:[#allocation11 + $0x28] sm:$0xff] }
 0x2d2   :  { %v4829_v15 = vpack.c.bf16 %v1838_v5, %v1822_v4  ;;  %v1966_v59 = vld [vmem:[#allocation11 + $0x1f80] sm:$0xff]  ;;  %v1968_v63 = vld [vmem:[#allocation11 + $0x1f90] sm:$0xff]  ;;  %v981_v4 = vld [vmem:[#allocation11 + $0xb8] sm:$0xff] }
 0x2d4   :  { %4810 = vmatpush1.bf16.msra.mxu0 %v4809_v12  ;;  %4938 = vmatpush1.bf16.msra.mxu1 %v4937_v13  ;;  %v1871_v12 = vld [vmem:[#allocation11 + $0x1c88] sm:$0xff]  ;;  %v1857_v13 = vld [vmem:[#allocation11 + $0x1c18] sm:$0xff] }
 0x2d5   :  { %4812 = vmatprep.subr.bf16.mxu0 %v4811_v16  ;;  %4940 = vmatprep.subr.bf16.mxu1 %v4939_v17  ;;  %v4957_v16 = vpack.c.bf16 %v1840_v10, %v1824_v9  ;;  %v1854_v17 = vld [vmem:[#allocation11 + $0x1c00] sm:$0xff]  ;;  %v4831_v19 = vpack.c.bf16 %v1871_v12, %v1855_v11  ;;  %v4959_v20 = vpack.c.bf16 %v1873_v14, %v1857_v13  ;;  %v964_v12 = vld [vmem:[#allocation11 + $0x30] sm:$0xff]  ;;  %v995_v14 = vld [vmem:[#allocation11 + $0x128] sm:$0xff] }
 0x2d6   :  { %v4833_v27 = vpack.c.bf16 %v1870_v18, %v1854_v17  ;;  %v962_v10 = vld [vmem:[#allocation11 + $0x20] sm:$0xff]  ;;  %v980_v13 = vld [vmem:[#allocation11 + $0xb0] sm:$0xff]  ;;  %v1013_v17 = vld [vmem:[#allocation11 + $0x1b8] sm:$0xff] }
 0x2d7   :  { %v978_v11 = vld [vmem:[#allocation11 + $0xa0] sm:$0xff] }
 0x2d8   :  { %4814 = vmatpush1.bf16.msra.mxu0 %v4813_v24  ;;  %4942 = vmatpush1.bf16.msra.mxu1 %v4941_v25  ;;  %v1903_v24 = vld [vmem:[#allocation11 + $0x1d88] sm:$0xff]  ;;  %v1889_v25 = vld [vmem:[#allocation11 + $0x1d18] sm:$0xff]  ;;  %v4977_v18 = vpack.c.bf16 %v978_v11, %v962_v10  ;;  %v1122_v10 = vld [vmem:[#allocation11 + $0x520] sm:$0xff] }
 0x2d9   :  { %4816 = vmatprep.subr.bf16.mxu0 %v4815_v28  ;;  %4944 = vmatprep.subr.bf16.mxu1 %v4943_v29  ;;  %v4961_v28 = vpack.c.bf16 %v1872_v22, %v1856_v21  ;;  %v1886_v29 = vld [vmem:[#allocation11 + $0x1d00] sm:$0xff]  ;;  %v4835_v31 = vpack.c.bf16 %v1903_v24, %v1887_v23  ;;  %v4963_v32 = vpack.c.bf16 %v1905_v26, %v1889_v25  ;;  %v996_v22 = vld [vmem:[#allocation11 + $0x130] sm:$0xff]  ;;  %v1027_v26 = vld [vmem:[#allocation11 + $0x228] sm:$0xff] }
 0x2da   :  { %v4837_v39 = vpack.c.bf16 %v1902_v30, %v1886_v29  ;;  %v1010_v21 = vld [vmem:[#allocation11 + $0x1a0] sm:$0xff]  ;;  %v1012_v25 = vld [vmem:[#allocation11 + $0x1b0] sm:$0xff]  ;;  %v1045_v29 = vld [vmem:[#allocation11 + $0x2b8] sm:$0xff] }
 0x2db   :  { %v1138_v11 = vld [vmem:[#allocation11 + $0x5a0] sm:$0xff] }
 0x2dc   :  { %4818 = vmatpush1.bf16.msra.mxu0 %v4817_v36  ;;  %4946 = vmatpush1.bf16.msra.mxu1 %v4945_v37  ;;  %v1935_v36 = vld [vmem:[#allocation11 + $0x1e88] sm:$0xff]  ;;  %v1921_v37 = vld [vmem:[#allocation11 + $0x1e18] sm:$0xff] }
 0x2dd   :  { %4820 = vmatprep.subr.bf16.mxu0 %v4819_v40  ;;  %4948 = vmatprep.subr.bf16.mxu1 %v4947_v45  ;;  %v4965_v40 = vpack.c.bf16 %v1904_v34, %v1888_v33  ;;  %v1918_v45 = vld [vmem:[#allocation11 + $0x1e00] sm:$0xff]  ;;  %v4839_v47 = vpack.c.bf16 %v1935_v36, %v1919_v35  ;;  %v4967_v48 = vpack.c.bf16 %v1937_v38, %v1921_v37  ;;  %v1028_v35 = vld [vmem:[#allocation11 + $0x230] sm:$0xff]  ;;  %v1059_v38 = vld [vmem:[#allocation11 + $0x328] sm:$0xff] }
 0x2de   :  { %v4841_v55 = vpack.c.bf16 %v1934_v46, %v1918_v45  ;;  %v1026_v33 = vld [vmem:[#allocation11 + $0x220] sm:$0xff]  ;;  %v1044_v37 = vld [vmem:[#allocation11 + $0x2b0] sm:$0xff] }
 0x2df   :  { %v1042_v34 = vld [vmem:[#allocation11 + $0x2a0] sm:$0xff]  ;;  %v5113_v46 = vpack.c.bf16 %v1044_v37, %v1028_v35 }
 0x2e0   :  { %4822 = vmatpush1.bf16.msra.mxu0 %v4821_v52  ;;  %4950 = vmatpush1.bf16.msra.mxu1 %v4949_v43  ;;  %v1967_v52 = vld [vmem:[#allocation11 + $0x1f88] sm:$0xff]  ;;  %v1953_v43 = vld [vmem:[#allocation11 + $0x1f18] sm:$0xff]  ;;  %v4985_v45 = vpack.c.bf16 %v1042_v34, %v1026_v33  ;;  %v1186_v34 = vld [vmem:[#allocation11 + $0x720] sm:$0xff] }
 0x2e1   :  { %4824 = vmatprep.subr.bf16.mxu0 %v4823_v56  ;;  %4952 = vmatprep.subr.bf16.mxu1 %v4951_v58  ;;  %v4969_v56 = vpack.c.bf16 %v1936_v50, %v1920_v49  ;;  %v1950_v58 = vld [vmem:[#allocation11 + $0x1f00] sm:$0xff]  ;;  %v4843_v60 = vpack.c.bf16 %v1967_v52, %v1951_v51  ;;  %v4971_v61 = vpack.c.bf16 %v1969_v54, %v1953_v43  ;;  %v1060_v49 = vld [vmem:[#allocation11 + $0x330] sm:$0xff]  ;;  %v1091_v52 = vld [vmem:[#allocation11 + $0x428] sm:$0xff] }
 0x2e2   :  { %v4845_v5 = vpack.c.bf16 %v1966_v59, %v1950_v58  ;;  %v1076_v51 = vld [vmem:[#allocation11 + $0x3b0] sm:$0xff]  ;;  %v1107_v43 = vld [vmem:[#allocation11 + $0x4a8] sm:$0xff]  ;;  %v1093_v54 = vld [vmem:[#allocation11 + $0x438] sm:$0xff] }
 0x2e3   :  { %v5117_v58 = vpack.c.bf16 %v1076_v51, %v1060_v49  ;;  %v4991_v59 = vpack.c.bf16 %v1107_v43, %v1091_v52  ;;  %v1202_v35 = vld [vmem:[#allocation11 + $0x7a0] sm:$0xff]  ;;  %v1236_v52 = vld [vmem:[#allocation11 + $0x8b0] sm:$0xff]  ;;  %v1251_v43 = vld [vmem:[#allocation11 + $0x928] sm:$0xff] }
 0x2e4   :  { %4826 = vmatpush1.bf16.msra.mxu0 %v4825_v2  ;;  %4954 = vmatpush1.bf16.msra.mxu1 %v4953_v3  ;;  %v979_v2 = vld [vmem:[#allocation11 + $0xa8] sm:$0xff]  ;;  %v965_v3 = vld [vmem:[#allocation11 + $0x38] sm:$0xff]  ;;  %v1234_v49 = vld [vmem:[#allocation11 + $0x8a0] sm:$0xff] }
 0x2e5   :  { %4828 = vmatprep.subr.bf16.mxu0 %v4827_v6  ;;  %4956 = vmatprep.subr.bf16.mxu1 %v4955_v8  ;;  %v4973_v6 = vpack.c.bf16 %v1968_v63, %v1952_v62  ;;  %v4975_v8 = vpack.c.bf16 %v979_v2, %v963_v0  ;;  %v5103_v9 = vpack.c.bf16 %v981_v4, %v965_v3  ;;  %v1092_v62 = vld [vmem:[#allocation11 + $0x430] sm:$0xff]  ;;  %v1123_v2 = vld [vmem:[#allocation11 + $0x528] sm:$0xff]  ;;  %v1125_v4 = vld [vmem:[#allocation11 + $0x538] sm:$0xff] }
 0x2e6   :  { %v1108_v0 = vld [vmem:[#allocation11 + $0x4b0] sm:$0xff]  ;;  %v1139_v3 = vld [vmem:[#allocation11 + $0x5a8] sm:$0xff] }
 0x2e8   :  { %4830 = vmatpush1.bf16.msra.mxu0 %v4829_v15  ;;  %4958 = vmatpush1.bf16.msra.mxu1 %v4957_v16  ;;  %v1011_v15 = vld [vmem:[#allocation11 + $0x1a8] sm:$0xff]  ;;  %v997_v16 = vld [vmem:[#allocation11 + $0x138] sm:$0xff] }
 0x2e9   :  { %4832 = vmatprep.subr.bf16.mxu0 %v4831_v19  ;;  %4960 = vmatprep.subr.bf16.mxu1 %v4959_v20  ;;  %v5105_v19 = vpack.c.bf16 %v980_v13, %v964_v12  ;;  %v994_v20 = vld [vmem:[#allocation11 + $0x120] sm:$0xff]  ;;  %v4979_v23 = vpack.c.bf16 %v1011_v15, %v995_v14  ;;  %v5107_v24 = vpack.c.bf16 %v1013_v17, %v997_v16  ;;  %v1124_v12 = vld [vmem:[#allocation11 + $0x530] sm:$0xff]  ;;  %v1155_v15 = vld [vmem:[#allocation11 + $0x628] sm:$0xff] }
 0x2ea   :  { %v4981_v30 = vpack.c.bf16 %v1010_v21, %v994_v20  ;;  %v1140_v14 = vld [vmem:[#allocation11 + $0x5b0] sm:$0xff]  ;;  %v1171_v16 = vld [vmem:[#allocation11 + $0x6a8] sm:$0xff]  ;;  %v1157_v17 = vld [vmem:[#allocation11 + $0x638] sm:$0xff] }
 0x2eb   :  { %v5125_v20 = vpack.c.bf16 %v1140_v14, %v1124_v12  ;;  %v4999_v21 = vpack.c.bf16 %v1171_v16, %v1155_v15  ;;  %v1298_v12 = vld [vmem:[#allocation11 + $0xaa0] sm:$0xff]  ;;  %v1300_v15 = vld [vmem:[#allocation11 + $0xab0] sm:$0xff]  ;;  %v1315_v16 = vld [vmem:[#allocation11 + $0xb28] sm:$0xff] }
 0x2ec   :  { %4834 = vmatpush1.bf16.msra.mxu0 %v4833_v27  ;;  %4962 = vmatpush1.bf16.msra.mxu1 %v4961_v28  ;;  %v1043_v27 = vld [vmem:[#allocation11 + $0x2a8] sm:$0xff]  ;;  %v1029_v28 = vld [vmem:[#allocation11 + $0x238] sm:$0xff] }
 0x2ed   :  { %4836 = vmatprep.subr.bf16.mxu0 %v4835_v31  ;;  %4964 = vmatprep.subr.bf16.mxu1 %v4963_v32  ;;  %v5109_v31 = vpack.c.bf16 %v1012_v25, %v996_v22  ;;  %v4983_v32 = vpack.c.bf16 %v1043_v27, %v1027_v26  ;;  %v5111_v36 = vpack.c.bf16 %v1045_v29, %v1029_v28  ;;  %v1154_v22 = vld [vmem:[#allocation11 + $0x620] sm:$0xff]  ;;  %v1172_v26 = vld [vmem:[#allocation11 + $0x6b0] sm:$0xff]  ;;  %v1187_v27 = vld [vmem:[#allocation11 + $0x728] sm:$0xff] }
 0x2ee   :  { %v1203_v28 = vld [vmem:[#allocation11 + $0x7a8] sm:$0xff]  ;;  %v1189_v29 = vld [vmem:[#allocation11 + $0x738] sm:$0xff] }
 0x2ef   :  { %v5003_v33 = vpack.c.bf16 %v1203_v28, %v1187_v27  ;;  %v1332_v27 = vld [vmem:[#allocation11 + $0xbb0] sm:$0xff]  ;;  %v1347_v28 = vld [vmem:[#allocation11 + $0xc28] sm:$0xff] }
 0x2f0   :  { %4838 = vmatpush1.bf16.msra.mxu0 %v4837_v39  ;;  %4966 = vmatpush1.bf16.msra.mxu1 %v4965_v40  ;;  %v1061_v39 = vld [vmem:[#allocation11 + $0x338] sm:$0xff] }
 0x2f1   :  { %4840 = vmatprep.subr.bf16.mxu0 %v4839_v47  ;;  %4968 = vmatprep.subr.bf16.mxu1 %v4967_v48  ;;  %v1077_v40 = vld [vmem:[#allocation11 + $0x3b8] sm:$0xff]  ;;  %v1074_v48 = vld [vmem:[#allocation11 + $0x3a0] sm:$0xff] }
 0x2f2   :  { %v5115_v50 = vpack.c.bf16 %v1077_v40, %v1061_v39  ;;  %v1235_v39 = vld [vmem:[#allocation11 + $0x8a8] sm:$0xff]  ;;  %v1221_v40 = vld [vmem:[#allocation11 + $0x838] sm:$0xff] }
 0x2f4   :  { %4842 = vmatpush1.bf16.msra.mxu0 %v4841_v55  ;;  %4970 = vmatpush1.bf16.msra.mxu1 %v4969_v56  ;;  %v1109_v55 = vld [vmem:[#allocation11 + $0x4b8] sm:$0xff] }
 0x2f5   :  { %4844 = vmatprep.subr.bf16.mxu0 %v4843_v60  ;;  %4972 = vmatprep.subr.bf16.mxu1 %v4971_v61  ;;  %v1090_v60 = vld [vmem:[#allocation11 + $0x420] sm:$0xff]  ;;  %v5119_v63 = vpack.c.bf16 %v1109_v55, %v1093_v54  ;;  %v1267_v54 = vld [vmem:[#allocation11 + $0x9a8] sm:$0xff]  ;;  %v1253_v55 = vld [vmem:[#allocation11 + $0x938] sm:$0xff] }
 0x2f6   :  { %v1106_v61 = vld [vmem:[#allocation11 + $0x4a0] sm:$0xff] }
 0x2f8   :  { %4846 = vmatpush1.bf16.msra.mxu0 %v4845_v5  ;;  %4974 = vmatpush1.bf16.msra.mxu1 %v4973_v6  ;;  %v1141_v5 = vld [vmem:[#allocation11 + $0x5b8] sm:$0xff]  ;;  %v4993_v6 = vpack.c.bf16 %v1106_v61, %v1090_v60  ;;  %v5011_v60 = vpack.c.bf16 %v1267_v54, %v1251_v43  ;;  %v1250_v61 = vld [vmem:[#allocation11 + $0x920] sm:$0xff]  ;;  %v1396_v43 = vld [vmem:[#allocation11 + $0xdb0] sm:$0xff] }
 0x2f9   :  { %4976 = vmatprep.subr.bf16.mxu0 %v4975_v8  ;;  %5104 = vmatprep.subr.bf16.mxu1 %v5103_v9  ;;  %v5121_v8 = vpack.c.bf16 %v1108_v0, %v1092_v62  ;;  %v4995_v9 = vpack.c.bf16 %v1139_v3, %v1123_v2  ;;  %v5123_v13 = vpack.c.bf16 %v1141_v5, %v1125_v4  ;;  %v1266_v62 = vld [vmem:[#allocation11 + $0x9a0] sm:$0xff]  ;;  %v1268_v2 = vld [vmem:[#allocation11 + $0x9b0] sm:$0xff]  ;;  %v1283_v3 = vld [vmem:[#allocation11 + $0xa28] sm:$0xff] }
 0x2fa   :  { %v1299_v4 = vld [vmem:[#allocation11 + $0xaa8] sm:$0xff]  ;;  %v1285_v5 = vld [vmem:[#allocation11 + $0xa38] sm:$0xff] }
 0x2fb   :  { %2202 = vmatmul.mubr.f32.vlgmr.msra.gmra.mrb[4].mxu0 %v6605_v53  ;;  %2344 = vmatmul.mubr.f32.vlgmr.msra.gmra.mrb[4].mxu1 %v6605_v53  ;;  %v1075_v53 = vld [vmem:[#allocation11 + $0x3a8] sm:$0xff] }
 0x2fc   :  { %4978 = vmatpush1.bf16.msra.mxu0 %v4977_v18  ;;  %2414 = vmatprep.mubr.f32.mxu0 %v6607_v57  ;;  %v4987_v47 = vpack.c.bf16 %v1075_v53, %v1059_v38  ;;  %v1173_v18 = vld [vmem:[#allocation11 + $0x6b8] sm:$0xff]  ;;  %v1204_v38 = vld [vmem:[#allocation11 + $0x7b0] sm:$0xff]  ;;  %v1219_v53 = vld [vmem:[#allocation11 + $0x828] sm:$0xff] }
 0x2fd   :  { %5106 = vmatpush1.bf16.msra.mxu1 %v5105_v19  ;;  %2556 = vmatprep.mubr.f32.mxu1 %v6607_v57  ;;  %v1058_v57 = vld [vmem:[#allocation11 + $0x320] sm:$0xff]  ;;  %v4997_v19 = vpack.c.bf16 %v1138_v11, %v1122_v10  ;;  %v5127_v25 = vpack.c.bf16 %v1173_v18, %v1157_v17  ;;  %v5015_v10 = vpack.c.bf16 %v1299_v4, %v1283_v3  ;;  %v1331_v17 = vld [vmem:[#allocation11 + $0xba8] sm:$0xff]  ;;  %v1317_v18 = vld [vmem:[#allocation11 + $0xb38] sm:$0xff] }
 0x2fe   :  { %4980 = vmatprep.subr.bf16.mxu0 %v4979_v23  ;;  %5108 = vmatprep.subr.bf16.mxu1 %v5107_v24  ;;  %v4989_v56 = vpack.c.bf16 %v1074_v48, %v1058_v57  ;;  %v1170_v23 = vld [vmem:[#allocation11 + $0x6a0] sm:$0xff]  ;;  %v1156_v24 = vld [vmem:[#allocation11 + $0x630] sm:$0xff]  ;;  %v5007_v57 = vpack.c.bf16 %v1235_v39, %v1219_v53  ;;  %v1379_v39 = vld [vmem:[#allocation11 + $0xd28] sm:$0xff] }
 0x2ff   :  { %v1218_v48 = vld [vmem:[#allocation11 + $0x820] sm:$0xff]  ;;  %v1364_v53 = vld [vmem:[#allocation11 + $0xcb0] sm:$0xff]  ;;  %v1411_v54 = vld [vmem:[#allocation11 + $0xe28] sm:$0xff] }
 0x300   :  { %4982 = vmatpush1.bf16.msra.mxu0 %v4981_v30  ;;  %v1205_v30 = vld [vmem:[#allocation11 + $0x7b8] sm:$0xff]  ;;  %v1282_v11 = vld [vmem:[#allocation11 + $0xa20] sm:$0xff]  ;;  %v1428_v3 = vld [vmem:[#allocation11 + $0xeb0] sm:$0xff] }
 0x301   :  { %5110 = vmatpush1.bf16.msra.mxu1 %v5109_v31  ;;  %4984 = vmatprep.subr.bf16.mxu0 %v4983_v32  ;;  %v5001_v31 = vpack.c.bf16 %v1170_v23, %v1154_v22  ;;  %v5129_v32 = vpack.c.bf16 %v1172_v26, %v1156_v24  ;;  %v5131_v37 = vpack.c.bf16 %v1205_v30, %v1189_v29  ;;  %v1314_v23 = vld [vmem:[#allocation11 + $0xb20] sm:$0xff]  ;;  %v1363_v29 = vld [vmem:[#allocation11 + $0xca8] sm:$0xff]  ;;  %v1349_v30 = vld [vmem:[#allocation11 + $0xc38] sm:$0xff] }
 0x302   :  { %5112 = vmatprep.subr.bf16.mxu1 %v5111_v36  ;;  %v1188_v36 = vld [vmem:[#allocation11 + $0x730] sm:$0xff]  ;;  %v5019_v22 = vpack.c.bf16 %v1331_v17, %v1315_v16  ;;  %v1330_v24 = vld [vmem:[#allocation11 + $0xba0] sm:$0xff]  ;;  %v1443_v4 = vld [vmem:[#allocation11 + $0xf28] sm:$0xff] }
 0x303   :  { %v1460_v16 = vld [vmem:[#allocation11 + $0xfb0] sm:$0xff]  ;;  %v1475_v17 = vld [vmem:[#allocation11 + $0x1028] sm:$0xff] }
 0x304   :  { %4986 = vmatpush1.bf16.msra.mxu0 %v4985_v45  ;;  %v1237_v45 = vld [vmem:[#allocation11 + $0x8b8] sm:$0xff] }
 0x305   :  { %5114 = vmatpush1.bf16.msra.mxu1 %v5113_v46  ;;  %4988 = vmatprep.subr.bf16.mxu0 %v4987_v47  ;;  %v5005_v46 = vpack.c.bf16 %v1202_v35, %v1186_v34  ;;  %v5133_v47 = vpack.c.bf16 %v1204_v38, %v1188_v36  ;;  %v5135_v51 = vpack.c.bf16 %v1237_v45, %v1221_v40  ;;  %v1346_v35 = vld [vmem:[#allocation11 + $0xc20] sm:$0xff]  ;;  %v1395_v40 = vld [vmem:[#allocation11 + $0xda8] sm:$0xff]  ;;  %v1381_v45 = vld [vmem:[#allocation11 + $0xd38] sm:$0xff] }
 0x306   :  { %5116 = vmatprep.subr.bf16.mxu1 %v5115_v50  ;;  %v1220_v50 = vld [vmem:[#allocation11 + $0x830] sm:$0xff]  ;;  %v5023_v34 = vpack.c.bf16 %v1363_v29, %v1347_v28  ;;  %v1362_v36 = vld [vmem:[#allocation11 + $0xca0] sm:$0xff]  ;;  %v1507_v29 = vld [vmem:[#allocation11 + $0x1128] sm:$0xff] }
 0x307   :  { %v1492_v28 = vld [vmem:[#allocation11 + $0x10b0] sm:$0xff] }
 0x308   :  { %4990 = vmatpush1.bf16.msra.mxu0 %v4989_v56  ;;  %v1269_v56 = vld [vmem:[#allocation11 + $0x9b8] sm:$0xff] }
 0x309   :  { %5118 = vmatpush1.bf16.msra.mxu1 %v5117_v58  ;;  %4992 = vmatprep.subr.bf16.mxu0 %v4991_v59  ;;  %v5009_v58 = vpack.c.bf16 %v1234_v49, %v1218_v48  ;;  %v5137_v59 = vpack.c.bf16 %v1236_v52, %v1220_v50  ;;  %v5139_v0 = vpack.c.bf16 %v1269_v56, %v1253_v55  ;;  %v1378_v49 = vld [vmem:[#allocation11 + $0xd20] sm:$0xff]  ;;  %v1427_v55 = vld [vmem:[#allocation11 + $0xea8] sm:$0xff]  ;;  %v1413_v56 = vld [vmem:[#allocation11 + $0xe38] sm:$0xff] }
 0x30a   :  { %5120 = vmatprep.subr.bf16.mxu1 %v5119_v63  ;;  %v1252_v63 = vld [vmem:[#allocation11 + $0x930] sm:$0xff]  ;;  %v5027_v48 = vpack.c.bf16 %v1395_v40, %v1379_v39  ;;  %v1394_v50 = vld [vmem:[#allocation11 + $0xda0] sm:$0xff]  ;;  %v1539_v39 = vld [vmem:[#allocation11 + $0x1228] sm:$0xff] }
 0x30b   :  { %v1555_v40 = vld [vmem:[#allocation11 + $0x12a8] sm:$0xff] }
 0x30c   :  { %4994 = vmatpush1.bf16.msra.mxu0 %v4993_v6  ;;  %v1301_v6 = vld [vmem:[#allocation11 + $0xab8] sm:$0xff] }
 0x30d   :  { %5122 = vmatpush1.bf16.msra.mxu1 %v5121_v8  ;;  %4996 = vmatprep.subr.bf16.mxu0 %v4995_v9  ;;  %v5013_v8 = vpack.c.bf16 %v1266_v62, %v1250_v61  ;;  %v5141_v9 = vpack.c.bf16 %v1268_v2, %v1252_v63  ;;  %v5143_v14 = vpack.c.bf16 %v1301_v6, %v1285_v5  ;;  %v1410_v62 = vld [vmem:[#allocation11 + $0xe20] sm:$0xff]  ;;  %v1459_v5 = vld [vmem:[#allocation11 + $0xfa8] sm:$0xff]  ;;  %v1445_v6 = vld [vmem:[#allocation11 + $0xf38] sm:$0xff] }
 0x30e   :  { %5124 = vmatprep.subr.bf16.mxu1 %v5123_v13  ;;  %v1284_v13 = vld [vmem:[#allocation11 + $0xa30] sm:$0xff]  ;;  %v5031_v61 = vpack.c.bf16 %v1427_v55, %v1411_v54  ;;  %v1426_v63 = vld [vmem:[#allocation11 + $0xea0] sm:$0xff] }
 0x30f   :  { %v1540_v54 = vld [vmem:[#allocation11 + $0x1230] sm:$0xff] }
 0x310   :  { %4998 = vmatpush1.bf16.msra.mxu0 %v4997_v19  ;;  %v1333_v19 = vld [vmem:[#allocation11 + $0xbb8] sm:$0xff] }
 0x311   :  { %5126 = vmatpush1.bf16.msra.mxu1 %v5125_v20  ;;  %5000 = vmatprep.subr.bf16.mxu0 %v4999_v21  ;;  %v5017_v20 = vpack.c.bf16 %v1298_v12, %v1282_v11  ;;  %v5145_v21 = vpack.c.bf16 %v1300_v15, %v1284_v13  ;;  %v5147_v26 = vpack.c.bf16 %v1333_v19, %v1317_v18  ;;  %v1442_v12 = vld [vmem:[#allocation11 + $0xf20] sm:$0xff]  ;;  %v1491_v18 = vld [vmem:[#allocation11 + $0x10a8] sm:$0xff]  ;;  %v1477_v19 = vld [vmem:[#allocation11 + $0x1038] sm:$0xff] }
 0x312   :  { %5128 = vmatprep.subr.bf16.mxu1 %v5127_v25  ;;  %v1316_v25 = vld [vmem:[#allocation11 + $0xb30] sm:$0xff]  ;;  %v5035_v11 = vpack.c.bf16 %v1459_v5, %v1443_v4  ;;  %v1458_v13 = vld [vmem:[#allocation11 + $0xfa0] sm:$0xff] }
 0x313   :  { %v1572_v4 = vld [vmem:[#allocation11 + $0x1330] sm:$0xff] }
 0x314   :  { %5002 = vmatpush1.bf16.msra.mxu0 %v5001_v31  ;;  %v1365_v31 = vld [vmem:[#allocation11 + $0xcb8] sm:$0xff] }
 0x315   :  { %5130 = vmatpush1.bf16.msra.mxu1 %v5129_v32  ;;  %5004 = vmatprep.subr.bf16.mxu0 %v5003_v33  ;;  %v5021_v32 = vpack.c.bf16 %v1330_v24, %v1314_v23  ;;  %v5149_v33 = vpack.c.bf16 %v1332_v27, %v1316_v25  ;;  %v5151_v38 = vpack.c.bf16 %v1365_v31, %v1349_v30  ;;  %v1474_v24 = vld [vmem:[#allocation11 + $0x1020] sm:$0xff]  ;;  %v1476_v27 = vld [vmem:[#allocation11 + $0x1030] sm:$0xff]  ;;  %v1523_v30 = vld [vmem:[#allocation11 + $0x11a8] sm:$0xff] }
 0x316   :  { %5132 = vmatprep.subr.bf16.mxu1 %v5131_v37  ;;  %v1348_v37 = vld [vmem:[#allocation11 + $0xc30] sm:$0xff]  ;;  %v5039_v23 = vpack.c.bf16 %v1491_v18, %v1475_v17  ;;  %v1490_v25 = vld [vmem:[#allocation11 + $0x10a0] sm:$0xff] }
 0x317   :  { %v5041_v31 = vpack.c.bf16 %v1490_v25, %v1474_v24  ;;  %v1604_v17 = vld [vmem:[#allocation11 + $0x1430] sm:$0xff] }
 0x318   :  { %5006 = vmatpush1.bf16.msra.mxu0 %v5005_v46  ;;  %v1397_v46 = vld [vmem:[#allocation11 + $0xdb8] sm:$0xff] }
 0x319   :  { %5134 = vmatpush1.bf16.msra.mxu1 %v5133_v47  ;;  %5008 = vmatprep.subr.bf16.mxu0 %v5007_v57  ;;  %v5025_v47 = vpack.c.bf16 %v1362_v36, %v1346_v35  ;;  %v5153_v57 = vpack.c.bf16 %v1364_v53, %v1348_v37  ;;  %v5155_v52 = vpack.c.bf16 %v1397_v46, %v1381_v45  ;;  %v1506_v35 = vld [vmem:[#allocation11 + $0x1120] sm:$0xff]  ;;  %v1508_v37 = vld [vmem:[#allocation11 + $0x1130] sm:$0xff] }
 0x31a   :  { %5136 = vmatprep.subr.bf16.mxu1 %v5135_v51  ;;  %v1380_v51 = vld [vmem:[#allocation11 + $0xd30] sm:$0xff]  ;;  %v1522_v36 = vld [vmem:[#allocation11 + $0x11a0] sm:$0xff] }
 0x31b   :  { %v1524_v53 = vld [vmem:[#allocation11 + $0x11b0] sm:$0xff] }
 0x31c   :  { %5010 = vmatpush1.bf16.msra.mxu0 %v5009_v58  ;;  %v1429_v58 = vld [vmem:[#allocation11 + $0xeb8] sm:$0xff] }
 0x31d   :  { %5138 = vmatpush1.bf16.msra.mxu1 %v5137_v59  ;;  %5012 = vmatprep.subr.bf16.mxu0 %v5011_v60  ;;  %v5029_v59 = vpack.c.bf16 %v1394_v50, %v1378_v49  ;;  %v5157_v60 = vpack.c.bf16 %v1396_v43, %v1380_v51  ;;  %v5159_v2 = vpack.c.bf16 %v1429_v58, %v1413_v56  ;;  %v6058_v45 = vld [vmem:[#allocation18] sm:$0xff]  ;;  %v6059_v49 = vld [vmem:[#allocation18 + $0x18] sm:$0xff]  ;;  %v1554_v43 = vld [vmem:[#allocation11 + $0x12a0] sm:$0xff] }
 0x31e   :  { %5140 = vmatprep.subr.bf16.mxu1 %v5139_v0  ;;  %v1412_v0 = vld [vmem:[#allocation11 + $0xe30] sm:$0xff]  ;;  %v5173_v50 = vpack.c.bf16 %v1524_v53, %v1508_v37  ;;  %v5047_v51 = vpack.c.bf16 %v1555_v40, %v1539_v39  ;;  %v1571_v58 = vld [vmem:[#allocation11 + $0x1328] sm:$0xff]  ;;  %v1666_v53 = vld [vmem:[#allocation11 + $0x1620] sm:$0xff] }
 0x31f   :  { %v1556_v56 = vld [vmem:[#allocation11 + $0x12b0] sm:$0xff]  ;;  %v1682_v39 = vld [vmem:[#allocation11 + $0x16a0] sm:$0xff] }
 0x320   :  { %5014 = vmatpush1.bf16.msra.mxu0 %v5013_v8  ;;  %v1461_v8 = vld [vmem:[#allocation11 + $0xfb8] sm:$0xff]  ;;  %v1668_v40 = vld [vmem:[#allocation11 + $0x1630] sm:$0xff] }
 0x321   :  { %5142 = vmatpush1.bf16.msra.mxu1 %v5141_v9  ;;  %5016 = vmatprep.subr.bf16.mxu0 %v5015_v10  ;;  %v5033_v9 = vpack.c.bf16 %v1426_v63, %v1410_v62  ;;  %v5161_v10 = vpack.c.bf16 %v1428_v3, %v1412_v0  ;;  %v5163_v15 = vpack.c.bf16 %v1461_v8, %v1445_v6  ;;  %v1586_v3 = vld [vmem:[#allocation11 + $0x13a0] sm:$0xff]  ;;  %v1588_v6 = vld [vmem:[#allocation11 + $0x13b0] sm:$0xff]  ;;  %v1603_v8 = vld [vmem:[#allocation11 + $0x1428] sm:$0xff] }
 0x322   :  { %5144 = vmatprep.subr.bf16.mxu1 %v5143_v14  ;;  %v1444_v14 = vld [vmem:[#allocation11 + $0xf30] sm:$0xff]  ;;  %v5177_v63 = vpack.c.bf16 %v1556_v56, %v1540_v54  ;;  %v1714_v54 = vld [vmem:[#allocation11 + $0x17a0] sm:$0xff] }
 0x324   :  { %5018 = vmatpush1.bf16.msra.mxu0 %v5017_v20  ;;  %v1493_v20 = vld [vmem:[#allocation11 + $0x10b8] sm:$0xff] }
 0x325   :  { %5146 = vmatpush1.bf16.msra.mxu1 %v5145_v21  ;;  %5020 = vmatprep.subr.bf16.mxu0 %v5019_v22  ;;  %v5037_v21 = vpack.c.bf16 %v1458_v13, %v1442_v12  ;;  %v5165_v22 = vpack.c.bf16 %v1460_v16, %v1444_v14  ;;  %v5181_v13 = vpack.c.bf16 %v1588_v6, %v1572_v4  ;;  %v1618_v16 = vld [vmem:[#allocation11 + $0x14a0] sm:$0xff] }
 0x326   :  { %5148 = vmatprep.subr.bf16.mxu1 %v5147_v26  ;;  %v5167_v26 = vpack.c.bf16 %v1493_v20, %v1477_v19  ;;  %v1620_v19 = vld [vmem:[#allocation11 + $0x14b0] sm:$0xff]  ;;  %v1635_v20 = vld [vmem:[#allocation11 + $0x1528] sm:$0xff]  ;;  %v1746_v4 = vld [vmem:[#allocation11 + $0x18a0] sm:$0xff] }
 0x327   :  { %v5185_v25 = vpack.c.bf16 %v1620_v19, %v1604_v17  ;;  %v1778_v17 = vld [vmem:[#allocation11 + $0x19a0] sm:$0xff] }
 0x328   :  { %5022 = vmatpush1.bf16.msra.mxu0 %v5021_v32  ;;  %v1509_v32 = vld [vmem:[#allocation11 + $0x1138] sm:$0xff] }
 0x329   :  { %5150 = vmatpush1.bf16.msra.mxu1 %v5149_v33  ;;  %5024 = vmatprep.subr.bf16.mxu0 %v5023_v34  ;;  %v1525_v33 = vld [vmem:[#allocation11 + $0x11b8] sm:$0xff]  ;;  %v5169_v34 = vpack.c.bf16 %v1492_v28, %v1476_v27  ;;  %v1634_v27 = vld [vmem:[#allocation11 + $0x1520] sm:$0xff] }
 0x32a   :  { %5152 = vmatprep.subr.bf16.mxu1 %v5151_v38  ;;  %v5043_v38 = vpack.c.bf16 %v1523_v30, %v1507_v29  ;;  %v5171_v46 = vpack.c.bf16 %v1525_v33, %v1509_v32  ;;  %v1650_v28 = vld [vmem:[#allocation11 + $0x15a0] sm:$0xff]  ;;  %v1636_v29 = vld [vmem:[#allocation11 + $0x1530] sm:$0xff]  ;;  %v1667_v32 = vld [vmem:[#allocation11 + $0x1628] sm:$0xff] }
 0x32b   :  { %v1683_v33 = vld [vmem:[#allocation11 + $0x16a8] sm:$0xff] }
 0x32c   :  { %5026 = vmatpush1.bf16.msra.mxu0 %v5025_v47  ;;  %v1541_v47 = vld [vmem:[#allocation11 + $0x1238] sm:$0xff] }
 0x32d   :  { %5154 = vmatpush1.bf16.msra.mxu1 %v5153_v57  ;;  %5028 = vmatprep.subr.bf16.mxu0 %v5027_v48  ;;  %v1557_v57 = vld [vmem:[#allocation11 + $0x12b8] sm:$0xff]  ;;  %v5045_v48 = vpack.c.bf16 %v1522_v36, %v1506_v35  ;;  %v5061_v36 = vpack.c.bf16 %v1650_v28, %v1634_v27  ;;  %v1794_v28 = vld [vmem:[#allocation11 + $0x1a20] sm:$0xff] }
 0x32e   :  { %5156 = vmatprep.subr.bf16.mxu1 %v5155_v52  ;;  %v1538_v52 = vld [vmem:[#allocation11 + $0x1220] sm:$0xff]  ;;  %v5175_v55 = vpack.c.bf16 %v1557_v57, %v1541_v47  ;;  %v1685_v35 = vld [vmem:[#allocation11 + $0x16b8] sm:$0xff]  ;;  %v1699_v47 = vld [vmem:[#allocation11 + $0x1728] sm:$0xff] }
 0x32f   :  { %v5049_v62 = vpack.c.bf16 %v1554_v43, %v1538_v52  ;;  %v1715_v57 = vld [vmem:[#allocation11 + $0x17a8] sm:$0xff]  ;;  %v1698_v43 = vld [vmem:[#allocation11 + $0x1720] sm:$0xff] }
 0x330   :  { %5030 = vmatpush1.bf16.msra.mxu0 %v5029_v59  ;;  %v1587_v59 = vld [vmem:[#allocation11 + $0x13a8] sm:$0xff]  ;;  %v5067_v52 = vpack.c.bf16 %v1715_v57, %v1699_v47  ;;  %v1844_v47 = vld [vmem:[#allocation11 + $0x1bb0] sm:$0xff] }
 0x331   :  { %5158 = vmatpush1.bf16.msra.mxu1 %v5157_v60  ;;  %5032 = vmatprep.subr.bf16.mxu0 %v5031_v61  ;;  %v1573_v60 = vld [vmem:[#allocation11 + $0x1338] sm:$0xff]  ;;  %v5051_v0 = vpack.c.bf16 %v1587_v59, %v1571_v58  ;;  %v1716_v58 = vld [vmem:[#allocation11 + $0x17b0] sm:$0xff]  ;;  %v1731_v59 = vld [vmem:[#allocation11 + $0x1828] sm:$0xff] }
 0x332   :  { %5160 = vmatprep.subr.bf16.mxu1 %v5159_v2  ;;  %v1589_v61 = vld [vmem:[#allocation11 + $0x13b8] sm:$0xff]  ;;  %v1570_v2 = vld [vmem:[#allocation11 + $0x1320] sm:$0xff]  ;;  %v1859_v57 = vld [vmem:[#allocation11 + $0x1c28] sm:$0xff] }
 0x333   :  { %v5179_v5 = vpack.c.bf16 %v1589_v61, %v1573_v60  ;;  %v5053_v12 = vpack.c.bf16 %v1586_v3, %v1570_v2  ;;  %v1747_v60 = vld [vmem:[#allocation11 + $0x18a8] sm:$0xff]  ;;  %v1733_v61 = vld [vmem:[#allocation11 + $0x1838] sm:$0xff]  ;;  %v1730_v3 = vld [vmem:[#allocation11 + $0x1820] sm:$0xff] }
 0x334   :  { %5034 = vmatpush1.bf16.msra.mxu0 %v5033_v9  ;;  %v1619_v9 = vld [vmem:[#allocation11 + $0x14a8] sm:$0xff]  ;;  %v5071_v2 = vpack.c.bf16 %v1747_v60, %v1731_v59  ;;  %v1876_v59 = vld [vmem:[#allocation11 + $0x1cb0] sm:$0xff] }
 0x335   :  { %5162 = vmatpush1.bf16.msra.mxu1 %v5161_v10  ;;  %5036 = vmatprep.subr.bf16.mxu0 %v5035_v11  ;;  %v1605_v10 = vld [vmem:[#allocation11 + $0x1438] sm:$0xff]  ;;  %v5055_v14 = vpack.c.bf16 %v1619_v9, %v1603_v8  ;;  %v1748_v8 = vld [vmem:[#allocation11 + $0x18b0] sm:$0xff]  ;;  %v1763_v9 = vld [vmem:[#allocation11 + $0x1928] sm:$0xff] }
 0x336   :  { %5164 = vmatprep.subr.bf16.mxu1 %v5163_v15  ;;  %v1621_v11 = vld [vmem:[#allocation11 + $0x14b8] sm:$0xff]  ;;  %v1602_v15 = vld [vmem:[#allocation11 + $0x1420] sm:$0xff]  ;;  %v1891_v60 = vld [vmem:[#allocation11 + $0x1d28] sm:$0xff] }
 0x337   :  { %v5183_v18 = vpack.c.bf16 %v1621_v11, %v1605_v10  ;;  %v5057_v24 = vpack.c.bf16 %v1618_v16, %v1602_v15  ;;  %v1779_v10 = vld [vmem:[#allocation11 + $0x19a8] sm:$0xff]  ;;  %v1765_v11 = vld [vmem:[#allocation11 + $0x1938] sm:$0xff]  ;;  %v1762_v16 = vld [vmem:[#allocation11 + $0x1920] sm:$0xff] }
 0x338   :  { %5038 = vmatpush1.bf16.msra.mxu0 %v5037_v21  ;;  %v1651_v21 = vld [vmem:[#allocation11 + $0x15a8] sm:$0xff]  ;;  %v5075_v15 = vpack.c.bf16 %v1779_v10, %v1763_v9  ;;  %v1908_v9 = vld [vmem:[#allocation11 + $0x1db0] sm:$0xff] }
 0x339   :  { %5166 = vmatpush1.bf16.msra.mxu1 %v5165_v22  ;;  %5040 = vmatprep.subr.bf16.mxu0 %v5039_v23  ;;  %v1637_v22 = vld [vmem:[#allocation11 + $0x1538] sm:$0xff]  ;;  %v1923_v10 = vld [vmem:[#allocation11 + $0x1e28] sm:$0xff] }
 0x33a   :  { %5168 = vmatprep.subr.bf16.mxu1 %v5167_v26  ;;  %v1653_v23 = vld [vmem:[#allocation11 + $0x15b8] sm:$0xff]  ;;  %v5059_v26 = vpack.c.bf16 %v1651_v21, %v1635_v20  ;;  %v1780_v20 = vld [vmem:[#allocation11 + $0x19b0] sm:$0xff]  ;;  %v1795_v21 = vld [vmem:[#allocation11 + $0x1a28] sm:$0xff] }
 0x33b   :  { %2415 = vmatmul.mubr.f32.vlgmr.msra.gmra.mrb[6].mxu0 %v6058_v45  ;;  %v5187_v30 = vpack.c.bf16 %v1653_v23, %v1637_v22  ;;  %v1811_v22 = vld [vmem:[#allocation11 + $0x1aa8] sm:$0xff]  ;;  %v1797_v23 = vld [vmem:[#allocation11 + $0x1a38] sm:$0xff] }
 0x33c   :  { %2557 = vmatmul.mubr.f32.vlgmr.msra.gmra.mrb[6].mxu1 %v6058_v45  ;;  %5042 = vmatpush1.bf16.msra.mxu0 %v5041_v31  ;;  %v1652_v31 = vld [vmem:[#allocation11 + $0x15b0] sm:$0xff]  ;;  %v5079_v27 = vpack.c.bf16 %v1811_v22, %v1795_v21  ;;  %v1955_v22 = vld [vmem:[#allocation11 + $0x1f28] sm:$0xff] }
 0x33d   :  { %2485 = vmatprep.mubr.f32.mxu0 %v6059_v49  ;;  %5170 = vmatpush1.bf16.msra.mxu1 %v5169_v34  ;;  %v1669_v34 = vld [vmem:[#allocation11 + $0x1638] sm:$0xff]  ;;  %v5189_v37 = vpack.c.bf16 %v1652_v31, %v1636_v29  ;;  %v1810_v29 = vld [vmem:[#allocation11 + $0x1aa0] sm:$0xff]  ;;  %v1940_v21 = vld [vmem:[#allocation11 + $0x1eb0] sm:$0xff] }
 0x33e   :  { %2627 = vmatprep.mubr.f32.mxu1 %v6059_v49  ;;  %5044 = vmatprep.subr.bf16.mxu0 %v5043_v38  ;;  %v5063_v38 = vpack.c.bf16 %v1683_v33, %v1667_v32  ;;  %v5191_v45 = vpack.c.bf16 %v1685_v35, %v1669_v34  ;;  %v1717_v49 = vld [vmem:[#allocation11 + $0x17b8] sm:$0xff]  ;;  %v1812_v32 = vld [vmem:[#allocation11 + $0x1ab0] sm:$0xff]  ;;  %v1827_v33 = vld [vmem:[#allocation11 + $0x1b28] sm:$0xff] }
 0x33f   :  { %5172 = vmatprep.subr.bf16.mxu1 %v5171_v46  ;;  %v1684_v46 = vld [vmem:[#allocation11 + $0x16b0] sm:$0xff]  ;;  %v1843_v34 = vld [vmem:[#allocation11 + $0x1ba8] sm:$0xff]  ;;  %v1829_v35 = vld [vmem:[#allocation11 + $0x1b38] sm:$0xff] }
 0x340   :  { %5046 = vmatpush1.bf16.msra.mxu0 %v5045_v48  ;;  %v1701_v48 = vld [vmem:[#allocation11 + $0x1738] sm:$0xff] }
 0x341   :  { %5174 = vmatpush1.bf16.msra.mxu1 %v5173_v50  ;;  %5048 = vmatprep.subr.bf16.mxu0 %v5047_v51  ;;  %v5065_v50 = vpack.c.bf16 %v1682_v39, %v1666_v53  ;;  %v5193_v51 = vpack.c.bf16 %v1684_v46, %v1668_v40  ;;  %v5195_v56 = vpack.c.bf16 %v1717_v49, %v1701_v48  ;;  %v1826_v39 = vld [vmem:[#allocation11 + $0x1b20] sm:$0xff]  ;;  %v1875_v48 = vld [vmem:[#allocation11 + $0x1ca8] sm:$0xff]  ;;  %v1861_v49 = vld [vmem:[#allocation11 + $0x1c38] sm:$0xff] }
 0x342   :  { %5176 = vmatprep.subr.bf16.mxu1 %v5175_v55  ;;  %v1700_v55 = vld [vmem:[#allocation11 + $0x1730] sm:$0xff]  ;;  %v5083_v53 = vpack.c.bf16 %v1843_v34, %v1827_v33  ;;  %v1842_v40 = vld [vmem:[#allocation11 + $0x1ba0] sm:$0xff]  ;;  %v967_v34 = vld [vmem:[#allocation11 + $0x48] sm:$0xff] }
 0x343   :  { %v1972_v33 = vld [vmem:[#allocation11 + $0x1fb0] sm:$0xff] }
 0x344   :  { %5050 = vmatpush1.bf16.msra.mxu0 %v5049_v62  ;;  %v1749_v62 = vld [vmem:[#allocation11 + $0x18b8] sm:$0xff] }
 0x345   :  { %5178 = vmatpush1.bf16.msra.mxu1 %v5177_v63  ;;  %5052 = vmatprep.subr.bf16.mxu0 %v5051_v0  ;;  %v5069_v63 = vpack.c.bf16 %v1714_v54, %v1698_v43  ;;  %v5197_v0 = vpack.c.bf16 %v1716_v58, %v1700_v55  ;;  %v5199_v6 = vpack.c.bf16 %v1749_v62, %v1733_v61  ;;  %v1858_v54 = vld [vmem:[#allocation11 + $0x1c20] sm:$0xff]  ;;  %v1907_v61 = vld [vmem:[#allocation11 + $0x1da8] sm:$0xff]  ;;  %v1893_v62 = vld [vmem:[#allocation11 + $0x1d38] sm:$0xff] }
 0x346   :  { %5180 = vmatprep.subr.bf16.mxu1 %v5179_v5  ;;  %v1732_v5 = vld [vmem:[#allocation11 + $0x1830] sm:$0xff]  ;;  %v5087_v43 = vpack.c.bf16 %v1875_v48, %v1859_v57  ;;  %v1874_v55 = vld [vmem:[#allocation11 + $0x1ca0] sm:$0xff]  ;;  %v999_v48 = vld [vmem:[#allocation11 + $0x148] sm:$0xff] }
 0x347   :  { %v984_v57 = vld [vmem:[#allocation11 + $0xd0] sm:$0xff] }
 0x348   :  { %5054 = vmatpush1.bf16.msra.mxu0 %v5053_v12  ;;  %v1781_v12 = vld [vmem:[#allocation11 + $0x19b8] sm:$0xff] }
 0x349   :  { %5182 = vmatpush1.bf16.msra.mxu1 %v5181_v13  ;;  %5056 = vmatprep.subr.bf16.mxu0 %v5055_v14  ;;  %v5073_v13 = vpack.c.bf16 %v1746_v4, %v1730_v3  ;;  %v5201_v14 = vpack.c.bf16 %v1748_v8, %v1732_v5  ;;  %v5203_v19 = vpack.c.bf16 %v1781_v12, %v1765_v11  ;;  %v1890_v4 = vld [vmem:[#allocation11 + $0x1d20] sm:$0xff]  ;;  %v1939_v11 = vld [vmem:[#allocation11 + $0x1ea8] sm:$0xff]  ;;  %v1925_v12 = vld [vmem:[#allocation11 + $0x1e38] sm:$0xff] }
 0x34a   :  { %5184 = vmatprep.subr.bf16.mxu1 %v5183_v18  ;;  %v1764_v18 = vld [vmem:[#allocation11 + $0x1930] sm:$0xff]  ;;  %v5091_v3 = vpack.c.bf16 %v1907_v61, %v1891_v60  ;;  %v1906_v5 = vld [vmem:[#allocation11 + $0x1da0] sm:$0xff]  ;;  %v1031_v60 = vld [vmem:[#allocation11 + $0x248] sm:$0xff] }
 0x34b   :  { %v1047_v61 = vld [vmem:[#allocation11 + $0x2c8] sm:$0xff] }
 0x34c   :  { %5058 = vmatpush1.bf16.msra.mxu0 %v5057_v24  ;;  %v1813_v24 = vld [vmem:[#allocation11 + $0x1ab8] sm:$0xff] }
 0x34d   :  { %5186 = vmatpush1.bf16.msra.mxu1 %v5185_v25  ;;  %5060 = vmatprep.subr.bf16.mxu0 %v5059_v26  ;;  %v5077_v25 = vpack.c.bf16 %v1778_v17, %v1762_v16  ;;  %v5205_v26 = vpack.c.bf16 %v1780_v20, %v1764_v18  ;;  %v5207_v31 = vpack.c.bf16 %v1813_v24, %v1797_v23  ;;  %v1922_v17 = vld [vmem:[#allocation11 + $0x1e20] sm:$0xff]  ;;  %v1971_v23 = vld [vmem:[#allocation11 + $0x1fa8] sm:$0xff]  ;;  %v1957_v24 = vld [vmem:[#allocation11 + $0x1f38] sm:$0xff] }
 0x34e   :  { %5188 = vmatprep.subr.bf16.mxu1 %v5187_v30  ;;  %v1796_v30 = vld [vmem:[#allocation11 + $0x1a30] sm:$0xff]  ;;  %v5095_v16 = vpack.c.bf16 %v1939_v11, %v1923_v10  ;;  %v1938_v18 = vld [vmem:[#allocation11 + $0x1ea0] sm:$0xff] }
 0x34f   :  { %v1032_v10 = vld [vmem:[#allocation11 + $0x250] sm:$0xff] }
 0x350   :  { %5062 = vmatpush1.bf16.msra.mxu0 %v5061_v36  ;;  %v1845_v36 = vld [vmem:[#allocation11 + $0x1bb8] sm:$0xff] }
 0x351   :  { %5190 = vmatpush1.bf16.msra.mxu1 %v5189_v37  ;;  %5064 = vmatprep.subr.bf16.mxu0 %v5063_v38  ;;  %v5081_v37 = vpack.c.bf16 %v1810_v29, %v1794_v28  ;;  %v5209_v38 = vpack.c.bf16 %v1812_v32, %v1796_v30  ;;  %v5211_v46 = vpack.c.bf16 %v1845_v36, %v1829_v35  ;;  %v1954_v29 = vld [vmem:[#allocation11 + $0x1f20] sm:$0xff]  ;;  %v983_v35 = vld [vmem:[#allocation11 + $0xc8] sm:$0xff]  ;;  %v969_v36 = vld [vmem:[#allocation11 + $0x58] sm:$0xff] }
 0x352   :  { %5192 = vmatprep.subr.bf16.mxu1 %v5191_v45  ;;  %v1828_v45 = vld [vmem:[#allocation11 + $0x1b30] sm:$0xff]  ;;  %v5099_v28 = vpack.c.bf16 %v1971_v23, %v1955_v22  ;;  %v1970_v30 = vld [vmem:[#allocation11 + $0x1fa0] sm:$0xff] }
 0x353   :  { %v1064_v22 = vld [vmem:[#allocation11 + $0x350] sm:$0xff] }
 0x354   :  { %5066 = vmatpush1.bf16.msra.mxu0 %v5065_v50  ;;  %v1877_v50 = vld [vmem:[#allocation11 + $0x1cb8] sm:$0xff] }
 0x355   :  { %5194 = vmatpush1.bf16.msra.mxu1 %v5193_v51  ;;  %5068 = vmatprep.subr.bf16.mxu0 %v5067_v52  ;;  %v5085_v51 = vpack.c.bf16 %v1842_v40, %v1826_v39  ;;  %v5213_v52 = vpack.c.bf16 %v1844_v47, %v1828_v45  ;;  %v5215_v58 = vpack.c.bf16 %v1877_v50, %v1861_v49  ;;  %v966_v40 = vld [vmem:[#allocation11 + $0x40] sm:$0xff]  ;;  %v968_v47 = vld [vmem:[#allocation11 + $0x50] sm:$0xff]  ;;  %v1015_v49 = vld [vmem:[#allocation11 + $0x1c8] sm:$0xff] }
 0x356   :  { %5196 = vmatprep.subr.bf16.mxu1 %v5195_v56  ;;  %v1860_v56 = vld [vmem:[#allocation11 + $0x1c30] sm:$0xff]  ;;  %v5231_v39 = vpack.c.bf16 %v983_v35, %v967_v34  ;;  %v982_v45 = vld [vmem:[#allocation11 + $0xc0] sm:$0xff] }
 0x357   :  { %v5233_v50 = vpack.c.bf16 %v982_v45, %v966_v40  ;;  %v1096_v34 = vld [vmem:[#allocation11 + $0x450] sm:$0xff] }
 0x358   :  { %5070 = vmatpush1.bf16.msra.mxu0 %v5069_v63  ;;  %v1909_v63 = vld [vmem:[#allocation11 + $0x1db8] sm:$0xff] }
 0x359   :  { %5198 = vmatpush1.bf16.msra.mxu1 %v5197_v0  ;;  %5072 = vmatprep.subr.bf16.mxu0 %v5071_v2  ;;  %v5089_v0 = vpack.c.bf16 %v1874_v55, %v1858_v54  ;;  %v5217_v2 = vpack.c.bf16 %v1876_v59, %v1860_v56  ;;  %v5219_v8 = vpack.c.bf16 %v1909_v63, %v1893_v62  ;;  %v998_v54 = vld [vmem:[#allocation11 + $0x140] sm:$0xff]  ;;  %v1000_v56 = vld [vmem:[#allocation11 + $0x150] sm:$0xff] }
 0x35a   :  { %5200 = vmatprep.subr.bf16.mxu1 %v5199_v6  ;;  %v1892_v6 = vld [vmem:[#allocation11 + $0x1d30] sm:$0xff]  ;;  %v1014_v55 = vld [vmem:[#allocation11 + $0x1c0] sm:$0xff] }
 0x35b   :  { %v1016_v59 = vld [vmem:[#allocation11 + $0x1d0] sm:$0xff]  ;;  %v6060_v62 = vld [vmem:[#allocation18 + $0x10] sm:$0xff] }
 0x35c   :  { %5074 = vmatpush1.bf16.msra.mxu0 %v5073_v13  ;;  %v1941_v13 = vld [vmem:[#allocation11 + $0x1eb8] sm:$0xff] }
 0x35d   :  { %5202 = vmatpush1.bf16.msra.mxu1 %v5201_v14  ;;  %5076 = vmatprep.subr.bf16.mxu0 %v5075_v15  ;;  %v5093_v14 = vpack.c.bf16 %v1906_v5, %v1890_v4  ;;  %v5221_v15 = vpack.c.bf16 %v1908_v9, %v1892_v6  ;;  %v5223_v20 = vpack.c.bf16 %v1941_v13, %v1925_v12  ;;  %v6061_v4 = vld [vmem:[#allocation18 + $0x8] sm:$0xff]  ;;  %v1048_v12 = vld [vmem:[#allocation11 + $0x2d0] sm:$0xff]  ;;  %v1063_v13 = vld [vmem:[#allocation11 + $0x348] sm:$0xff] }
 0x35e   :  { %5204 = vmatprep.subr.bf16.mxu1 %v5203_v19  ;;  %v1924_v19 = vld [vmem:[#allocation11 + $0x1e30] sm:$0xff]  ;;  %v5365_v5 = vpack.c.bf16 %v1016_v59, %v1000_v56  ;;  %v5239_v6 = vpack.c.bf16 %v1047_v61, %v1031_v60  ;;  %v1046_v9 = vld [vmem:[#allocation11 + $0x2c0] sm:$0xff] }
 0x35f   :  { %v1158_v59 = vld [vmem:[#allocation11 + $0x640] sm:$0xff]  ;;  %v1160_v61 = vld [vmem:[#allocation11 + $0x650] sm:$0xff] }
 0x360   :  { %5078 = vmatpush1.bf16.msra.mxu0 %v5077_v25  ;;  %v1973_v25 = vld [vmem:[#allocation11 + $0x1fb8] sm:$0xff]  ;;  %v1174_v60 = vld [vmem:[#allocation11 + $0x6c0] sm:$0xff] }
 0x361   :  { %5206 = vmatpush1.bf16.msra.mxu1 %v5205_v26  ;;  %5080 = vmatprep.subr.bf16.mxu0 %v5079_v27  ;;  %v5097_v26 = vpack.c.bf16 %v1938_v18, %v1922_v17  ;;  %v5225_v27 = vpack.c.bf16 %v1940_v21, %v1924_v19  ;;  %v5227_v32 = vpack.c.bf16 %v1973_v25, %v1957_v24  ;;  %v1078_v21 = vld [vmem:[#allocation11 + $0x3c0] sm:$0xff]  ;;  %v1080_v24 = vld [vmem:[#allocation11 + $0x3d0] sm:$0xff]  ;;  %v1095_v25 = vld [vmem:[#allocation11 + $0x448] sm:$0xff] }
 0x362   :  { %5208 = vmatprep.subr.bf16.mxu1 %v5207_v31  ;;  %v1956_v31 = vld [vmem:[#allocation11 + $0x1f30] sm:$0xff]  ;;  %v5369_v18 = vpack.c.bf16 %v1048_v12, %v1032_v10  ;;  %v1206_v10 = vld [vmem:[#allocation11 + $0x7c0] sm:$0xff] }
 0x364   :  { %5082 = vmatpush1.bf16.msra.mxu0 %v5081_v37  ;;  %v985_v37 = vld [vmem:[#allocation11 + $0xd8] sm:$0xff] }
 0x365   :  { %5210 = vmatpush1.bf16.msra.mxu1 %v5209_v38  ;;  %5084 = vmatprep.subr.bf16.mxu0 %v5083_v53  ;;  %v5101_v38 = vpack.c.bf16 %v1970_v30, %v1954_v29  ;;  %v5229_v53 = vpack.c.bf16 %v1972_v33, %v1956_v31  ;;  %v5373_v30 = vpack.c.bf16 %v1080_v24, %v1064_v22  ;;  %v1110_v33 = vld [vmem:[#allocation11 + $0x4c0] sm:$0xff] }
 0x366   :  { %5212 = vmatprep.subr.bf16.mxu1 %v5211_v46  ;;  %v5359_v46 = vpack.c.bf16 %v985_v37, %v969_v36  ;;  %v1112_v36 = vld [vmem:[#allocation11 + $0x4d0] sm:$0xff]  ;;  %v1127_v37 = vld [vmem:[#allocation11 + $0x548] sm:$0xff]  ;;  %v1238_v22 = vld [vmem:[#allocation11 + $0x8c0] sm:$0xff] }
 0x367   :  { %v5377_v45 = vpack.c.bf16 %v1112_v36, %v1096_v34  ;;  %v1270_v34 = vld [vmem:[#allocation11 + $0x9c0] sm:$0xff] }
 0x368   :  { %5086 = vmatpush1.bf16.msra.mxu0 %v5085_v51  ;;  %v1001_v51 = vld [vmem:[#allocation11 + $0x158] sm:$0xff] }
 0x369   :  { %5214 = vmatpush1.bf16.msra.mxu1 %v5213_v52  ;;  %5088 = vmatprep.subr.bf16.mxu0 %v5087_v43  ;;  %v1017_v52 = vld [vmem:[#allocation11 + $0x1d8] sm:$0xff]  ;;  %v5361_v43 = vpack.c.bf16 %v984_v57, %v968_v47  ;;  %v1126_v47 = vld [vmem:[#allocation11 + $0x540] sm:$0xff] }
 0x36a   :  { %5216 = vmatprep.subr.bf16.mxu1 %v5215_v58  ;;  %v5235_v58 = vpack.c.bf16 %v1015_v49, %v999_v48  ;;  %v5363_v63 = vpack.c.bf16 %v1017_v52, %v1001_v51  ;;  %v1142_v57 = vld [vmem:[#allocation11 + $0x5c0] sm:$0xff]  ;;  %v1128_v48 = vld [vmem:[#allocation11 + $0x550] sm:$0xff]  ;;  %v1159_v51 = vld [vmem:[#allocation11 + $0x648] sm:$0xff] }
 0x36b   :  { %v1175_v52 = vld [vmem:[#allocation11 + $0x6c8] sm:$0xff] }
 0x36c   :  { %5090 = vmatpush1.bf16.msra.mxu0 %v5089_v0  ;;  %v1033_v0 = vld [vmem:[#allocation11 + $0x258] sm:$0xff] }
 0x36d   :  { %5218 = vmatpush1.bf16.msra.mxu1 %v5217_v2  ;;  %5092 = vmatprep.subr.bf16.mxu0 %v5091_v3  ;;  %v1049_v2 = vld [vmem:[#allocation11 + $0x2d8] sm:$0xff]  ;;  %v5237_v3 = vpack.c.bf16 %v1014_v55, %v998_v54  ;;  %v5253_v55 = vpack.c.bf16 %v1142_v57, %v1126_v47  ;;  %v1286_v57 = vld [vmem:[#allocation11 + $0xa40] sm:$0xff] }
 0x36e   :  { %5220 = vmatprep.subr.bf16.mxu1 %v5219_v8  ;;  %v1030_v8 = vld [vmem:[#allocation11 + $0x240] sm:$0xff]  ;;  %v5367_v11 = vpack.c.bf16 %v1049_v2, %v1033_v0  ;;  %v1177_v54 = vld [vmem:[#allocation11 + $0x6d8] sm:$0xff]  ;;  %v1191_v0 = vld [vmem:[#allocation11 + $0x748] sm:$0xff] }
 0x36f   :  { %v5241_v17 = vpack.c.bf16 %v1046_v9, %v1030_v8  ;;  %v1207_v2 = vld [vmem:[#allocation11 + $0x7c8] sm:$0xff]  ;;  %v1190_v9 = vld [vmem:[#allocation11 + $0x740] sm:$0xff] }
 0x370   :  { %5094 = vmatpush1.bf16.msra.mxu0 %v5093_v14  ;;  %v1079_v14 = vld [vmem:[#allocation11 + $0x3c8] sm:$0xff]  ;;  %v5259_v8 = vpack.c.bf16 %v1207_v2, %v1191_v0  ;;  %v1336_v0 = vld [vmem:[#allocation11 + $0xbd0] sm:$0xff] }
 0x371   :  { %5222 = vmatpush1.bf16.msra.mxu1 %v5221_v15  ;;  %5096 = vmatprep.subr.bf16.mxu0 %v5095_v16  ;;  %v1065_v15 = vld [vmem:[#allocation11 + $0x358] sm:$0xff]  ;;  %v5243_v19 = vpack.c.bf16 %v1079_v14, %v1063_v13  ;;  %v1208_v13 = vld [vmem:[#allocation11 + $0x7d0] sm:$0xff]  ;;  %v1223_v14 = vld [vmem:[#allocation11 + $0x848] sm:$0xff] }
 0x372   :  { %5224 = vmatprep.subr.bf16.mxu1 %v5223_v20  ;;  %v1081_v16 = vld [vmem:[#allocation11 + $0x3d8] sm:$0xff]  ;;  %v1062_v20 = vld [vmem:[#allocation11 + $0x340] sm:$0xff]  ;;  %v1351_v2 = vld [vmem:[#allocation11 + $0xc48] sm:$0xff] }
 0x373   :  { %v5371_v23 = vpack.c.bf16 %v1081_v16, %v1065_v15  ;;  %v5245_v29 = vpack.c.bf16 %v1078_v21, %v1062_v20  ;;  %v1239_v15 = vld [vmem:[#allocation11 + $0x8c8] sm:$0xff]  ;;  %v1225_v16 = vld [vmem:[#allocation11 + $0x858] sm:$0xff]  ;;  %v1222_v21 = vld [vmem:[#allocation11 + $0x840] sm:$0xff] }
 0x374   :  { %5098 = vmatpush1.bf16.msra.mxu0 %v5097_v26  ;;  %v1111_v26 = vld [vmem:[#allocation11 + $0x4c8] sm:$0xff]  ;;  %v5263_v20 = vpack.c.bf16 %v1239_v15, %v1223_v14  ;;  %v1368_v14 = vld [vmem:[#allocation11 + $0xcd0] sm:$0xff] }
 0x375   :  { %5226 = vmatpush1.bf16.msra.mxu1 %v5225_v27  ;;  %5100 = vmatprep.subr.bf16.mxu0 %v5099_v28  ;;  %v1097_v27 = vld [vmem:[#allocation11 + $0x458] sm:$0xff]  ;;  %v5247_v31 = vpack.c.bf16 %v1111_v26, %v1095_v25  ;;  %v1240_v25 = vld [vmem:[#allocation11 + $0x8d0] sm:$0xff]  ;;  %v1255_v26 = vld [vmem:[#allocation11 + $0x948] sm:$0xff] }
 0x376   :  { %5228 = vmatprep.subr.bf16.mxu1 %v5227_v32  ;;  %v1113_v28 = vld [vmem:[#allocation11 + $0x4d8] sm:$0xff]  ;;  %v1094_v32 = vld [vmem:[#allocation11 + $0x440] sm:$0xff]  ;;  %v1383_v15 = vld [vmem:[#allocation11 + $0xd48] sm:$0xff] }
 0x377   :  { %v5375_v35 = vpack.c.bf16 %v1113_v28, %v1097_v27  ;;  %v5249_v40 = vpack.c.bf16 %v1110_v33, %v1094_v32  ;;  %v1271_v27 = vld [vmem:[#allocation11 + $0x9c8] sm:$0xff]  ;;  %v1257_v28 = vld [vmem:[#allocation11 + $0x958] sm:$0xff]  ;;  %v1254_v33 = vld [vmem:[#allocation11 + $0x940] sm:$0xff] }
 0x378   :  { %5102 = vmatpush1.bf16.msra.mxu0 %v5101_v38  ;;  %v1143_v38 = vld [vmem:[#allocation11 + $0x5c8] sm:$0xff]  ;;  %v5267_v32 = vpack.c.bf16 %v1271_v27, %v1255_v26  ;;  %v1400_v26 = vld [vmem:[#allocation11 + $0xdd0] sm:$0xff] }
 0x379   :  { %5230 = vmatpush1.bf16.msra.mxu1 %v5229_v53  ;;  %5232 = vmatprep.subr.bf16.mxu0 %v5231_v39  ;;  %v1129_v53 = vld [vmem:[#allocation11 + $0x558] sm:$0xff]  ;;  %v1415_v27 = vld [vmem:[#allocation11 + $0xe48] sm:$0xff] }
 0x37a   :  { %5360 = vmatprep.subr.bf16.mxu1 %v5359_v46  ;;  %v1145_v39 = vld [vmem:[#allocation11 + $0x5d8] sm:$0xff]  ;;  %v5251_v46 = vpack.c.bf16 %v1143_v38, %v1127_v37  ;;  %v1272_v37 = vld [vmem:[#allocation11 + $0x9d0] sm:$0xff]  ;;  %v1287_v38 = vld [vmem:[#allocation11 + $0xa48] sm:$0xff] }
 0x37b   :  { %2486 = vmatmul.mubr.f32.vlgmr.msra.gmra.mrb[6].mxu0 %v6060_v62  ;;  %v5379_v49 = vpack.c.bf16 %v1145_v39, %v1129_v53  ;;  %v1303_v53 = vld [vmem:[#allocation11 + $0xac8] sm:$0xff]  ;;  %v1289_v39 = vld [vmem:[#allocation11 + $0xa58] sm:$0xff] }
 0x37c   :  { %2628 = vmatmul.mubr.f32.vlgmr.msra.gmra.mrb[6].mxu1 %v6060_v62  ;;  %5234 = vmatpush1.bf16.msra.mxu0 %v5233_v50  ;;  %v1144_v50 = vld [vmem:[#allocation11 + $0x5d0] sm:$0xff]  ;;  %v5271_v47 = vpack.c.bf16 %v1303_v53, %v1287_v38  ;;  %v1447_v53 = vld [vmem:[#allocation11 + $0xf48] sm:$0xff] }
 0x37d   :  { %2698 = vmatprep.mubr.f32.mxu0 %v6061_v4  ;;  %5362 = vmatpush1.bf16.msra.mxu1 %v5361_v43  ;;  %v1161_v43 = vld [vmem:[#allocation11 + $0x658] sm:$0xff]  ;;  %v5381_v56 = vpack.c.bf16 %v1144_v50, %v1128_v48  ;;  %v1302_v48 = vld [vmem:[#allocation11 + $0xac0] sm:$0xff]  ;;  %v1432_v38 = vld [vmem:[#allocation11 + $0xed0] sm:$0xff] }
 0x37e   :  { %2840 = vmatprep.mubr.f32.mxu1 %v6061_v4  ;;  %5236 = vmatprep.subr.bf16.mxu0 %v5235_v58  ;;  %v5255_v58 = vpack.c.bf16 %v1175_v52, %v1159_v51  ;;  %v5383_v62 = vpack.c.bf16 %v1177_v54, %v1161_v43  ;;  %v1209_v4 = vld [vmem:[#allocation11 + $0x7d8] sm:$0xff]  ;;  %v1304_v51 = vld [vmem:[#allocation11 + $0xad0] sm:$0xff]  ;;  %v1319_v52 = vld [vmem:[#allocation11 + $0xb48] sm:$0xff] }
 0x37f   :  { %5364 = vmatprep.subr.bf16.mxu1 %v5363_v63  ;;  %v1176_v63 = vld [vmem:[#allocation11 + $0x6d0] sm:$0xff]  ;;  %v1335_v43 = vld [vmem:[#allocation11 + $0xbc8] sm:$0xff]  ;;  %v1321_v54 = vld [vmem:[#allocation11 + $0xb58] sm:$0xff] }
 0x380   :  { %5238 = vmatpush1.bf16.msra.mxu0 %v5237_v3  ;;  %v1193_v3 = vld [vmem:[#allocation11 + $0x758] sm:$0xff] }
 0x381   :  { %5366 = vmatpush1.bf16.msra.mxu1 %v5365_v5  ;;  %5240 = vmatprep.subr.bf16.mxu0 %v5239_v6  ;;  %v5257_v5 = vpack.c.bf16 %v1174_v60, %v1158_v59  ;;  %v5385_v6 = vpack.c.bf16 %v1176_v63, %v1160_v61  ;;  %v5387_v12 = vpack.c.bf16 %v1209_v4, %v1193_v3  ;;  %v1318_v60 = vld [vmem:[#allocation11 + $0xb40] sm:$0xff]  ;;  %v1367_v3 = vld [vmem:[#allocation11 + $0xcc8] sm:$0xff]  ;;  %v1353_v4 = vld [vmem:[#allocation11 + $0xc58] sm:$0xff] }
 0x382   :  { %5368 = vmatprep.subr.bf16.mxu1 %v5367_v11  ;;  %v1192_v11 = vld [vmem:[#allocation11 + $0x750] sm:$0xff]  ;;  %v5275_v59 = vpack.c.bf16 %v1335_v43, %v1319_v52  ;;  %v1334_v61 = vld [vmem:[#allocation11 + $0xbc0] sm:$0xff]  ;;  %v1479_v43 = vld [vmem:[#allocation11 + $0x1048] sm:$0xff] }
 0x383   :  { %v1464_v52 = vld [vmem:[#allocation11 + $0xfd0] sm:$0xff] }
 0x384   :  { %5242 = vmatpush1.bf16.msra.mxu0 %v5241_v17  ;;  %v1241_v17 = vld [vmem:[#allocation11 + $0x8d8] sm:$0xff] }
 0x385   :  { %5370 = vmatpush1.bf16.msra.mxu1 %v5369_v18  ;;  %5244 = vmatprep.subr.bf16.mxu0 %v5243_v19  ;;  %v5261_v18 = vpack.c.bf16 %v1206_v10, %v1190_v9  ;;  %v5389_v19 = vpack.c.bf16 %v1208_v13, %v1192_v11  ;;  %v5391_v24 = vpack.c.bf16 %v1241_v17, %v1225_v16  ;;  %v1350_v10 = vld [vmem:[#allocation11 + $0xc40] sm:$0xff]  ;;  %v1399_v16 = vld [vmem:[#allocation11 + $0xdc8] sm:$0xff]  ;;  %v1385_v17 = vld [vmem:[#allocation11 + $0xd58] sm:$0xff] }
 0x386   :  { %5372 = vmatprep.subr.bf16.mxu1 %v5371_v23  ;;  %v1224_v23 = vld [vmem:[#allocation11 + $0x850] sm:$0xff]  ;;  %v5279_v9 = vpack.c.bf16 %v1367_v3, %v1351_v2  ;;  %v1366_v11 = vld [vmem:[#allocation11 + $0xcc0] sm:$0xff]  ;;  %v1511_v3 = vld [vmem:[#allocation11 + $0x1148] sm:$0xff] }
 0x387   :  { %v1496_v2 = vld [vmem:[#allocation11 + $0x10d0] sm:$0xff] }
 0x388   :  { %5246 = vmatpush1.bf16.msra.mxu0 %v5245_v29  ;;  %v1273_v29 = vld [vmem:[#allocation11 + $0x9d8] sm:$0xff] }
 0x389   :  { %5374 = vmatpush1.bf16.msra.mxu1 %v5373_v30  ;;  %5248 = vmatprep.subr.bf16.mxu0 %v5247_v31  ;;  %v5265_v30 = vpack.c.bf16 %v1238_v22, %v1222_v21  ;;  %v5393_v31 = vpack.c.bf16 %v1240_v25, %v1224_v23  ;;  %v5395_v36 = vpack.c.bf16 %v1273_v29, %v1257_v28  ;;  %v1382_v22 = vld [vmem:[#allocation11 + $0xd40] sm:$0xff]  ;;  %v1431_v28 = vld [vmem:[#allocation11 + $0xec8] sm:$0xff]  ;;  %v1417_v29 = vld [vmem:[#allocation11 + $0xe58] sm:$0xff] }
 0x38a   :  { %5376 = vmatprep.subr.bf16.mxu1 %v5375_v35  ;;  %v1256_v35 = vld [vmem:[#allocation11 + $0x950] sm:$0xff]  ;;  %v5283_v21 = vpack.c.bf16 %v1399_v16, %v1383_v15  ;;  %v1398_v23 = vld [vmem:[#allocation11 + $0xdc0] sm:$0xff]  ;;  %v1543_v15 = vld [vmem:[#allocation11 + $0x1248] sm:$0xff] }
 0x38b   :  { %v1559_v16 = vld [vmem:[#allocation11 + $0x12c8] sm:$0xff] }
 0x38c   :  { %5250 = vmatpush1.bf16.msra.mxu0 %v5249_v40  ;;  %v1305_v40 = vld [vmem:[#allocation11 + $0xad8] sm:$0xff] }
 0x38d   :  { %5378 = vmatpush1.bf16.msra.mxu1 %v5377_v45  ;;  %5252 = vmatprep.subr.bf16.mxu0 %v5251_v46  ;;  %v5269_v45 = vpack.c.bf16 %v1270_v34, %v1254_v33  ;;  %v5397_v46 = vpack.c.bf16 %v1272_v37, %v1256_v35  ;;  %v5399_v50 = vpack.c.bf16 %v1305_v40, %v1289_v39  ;;  %v1414_v34 = vld [vmem:[#allocation11 + $0xe40] sm:$0xff]  ;;  %v1463_v39 = vld [vmem:[#allocation11 + $0xfc8] sm:$0xff]  ;;  %v1449_v40 = vld [vmem:[#allocation11 + $0xf58] sm:$0xff] }
 0x38e   :  { %5380 = vmatprep.subr.bf16.mxu1 %v5379_v49  ;;  %v1288_v49 = vld [vmem:[#allocation11 + $0xa50] sm:$0xff]  ;;  %v5287_v33 = vpack.c.bf16 %v1431_v28, %v1415_v27  ;;  %v1430_v35 = vld [vmem:[#allocation11 + $0xec0] sm:$0xff] }
 0x38f   :  { %v1544_v27 = vld [vmem:[#allocation11 + $0x1250] sm:$0xff] }
 0x390   :  { %5254 = vmatpush1.bf16.msra.mxu0 %v5253_v55  ;;  %v1337_v55 = vld [vmem:[#allocation11 + $0xbd8] sm:$0xff] }
 0x391   :  { %5382 = vmatpush1.bf16.msra.mxu1 %v5381_v56  ;;  %5256 = vmatprep.subr.bf16.mxu0 %v5255_v58  ;;  %v5273_v56 = vpack.c.bf16 %v1302_v48, %v1286_v57  ;;  %v5401_v58 = vpack.c.bf16 %v1304_v51, %v1288_v49  ;;  %v5403_v63 = vpack.c.bf16 %v1337_v55, %v1321_v54  ;;  %v1446_v48 = vld [vmem:[#allocation11 + $0xf40] sm:$0xff]  ;;  %v1495_v54 = vld [vmem:[#allocation11 + $0x10c8] sm:$0xff]  ;;  %v1481_v55 = vld [vmem:[#allocation11 + $0x1058] sm:$0xff] }
 0x392   :  { %5384 = vmatprep.subr.bf16.mxu1 %v5383_v62  ;;  %v1320_v62 = vld [vmem:[#allocation11 + $0xb50] sm:$0xff]  ;;  %v5291_v57 = vpack.c.bf16 %v1463_v39, %v1447_v53  ;;  %v1462_v49 = vld [vmem:[#allocation11 + $0xfc0] sm:$0xff] }
 0x393   :  { %v1576_v53 = vld [vmem:[#allocation11 + $0x1350] sm:$0xff] }
 0x394   :  { %5258 = vmatpush1.bf16.msra.mxu0 %v5257_v5  ;;  %v1369_v5 = vld [vmem:[#allocation11 + $0xcd8] sm:$0xff] }
 0x395   :  { %5386 = vmatpush1.bf16.msra.mxu1 %v5385_v6  ;;  %5260 = vmatprep.subr.bf16.mxu0 %v5259_v8  ;;  %v5277_v6 = vpack.c.bf16 %v1334_v61, %v1318_v60  ;;  %v5405_v8 = vpack.c.bf16 %v1336_v0, %v1320_v62  ;;  %v5407_v13 = vpack.c.bf16 %v1369_v5, %v1353_v4  ;;  %v1478_v61 = vld [vmem:[#allocation11 + $0x1040] sm:$0xff]  ;;  %v1480_v0 = vld [vmem:[#allocation11 + $0x1050] sm:$0xff]  ;;  %v1527_v4 = vld [vmem:[#allocation11 + $0x11c8] sm:$0xff] }
 0x396   :  { %5388 = vmatprep.subr.bf16.mxu1 %v5387_v12  ;;  %v1352_v12 = vld [vmem:[#allocation11 + $0xc50] sm:$0xff]  ;;  %v5295_v60 = vpack.c.bf16 %v1495_v54, %v1479_v43  ;;  %v1494_v62 = vld [vmem:[#allocation11 + $0x10c0] sm:$0xff] }
 0x397   :  { %v5297_v5 = vpack.c.bf16 %v1494_v62, %v1478_v61  ;;  %v1608_v43 = vld [vmem:[#allocation11 + $0x1450] sm:$0xff]  ;;  %v1982_v62 = vld [vmem:[#allocation13] sm:$0xff] }
 0x398   :  { %5262 = vmatpush1.bf16.msra.mxu0 %v5261_v18  ;;  %v1401_v18 = vld [vmem:[#allocation11 + $0xdd8] sm:$0xff] }
 0x399   :  { %5390 = vmatpush1.bf16.msra.mxu1 %v5389_v19  ;;  %5264 = vmatprep.subr.bf16.mxu0 %v5263_v20  ;;  %v5281_v19 = vpack.c.bf16 %v1366_v11, %v1350_v10  ;;  %v5409_v20 = vpack.c.bf16 %v1368_v14, %v1352_v12  ;;  %v5411_v25 = vpack.c.bf16 %v1401_v18, %v1385_v17  ;;  %v1510_v10 = vld [vmem:[#allocation11 + $0x1140] sm:$0xff]  ;;  %v1512_v12 = vld [vmem:[#allocation11 + $0x1150] sm:$0xff] }
 0x39a   :  { %5392 = vmatprep.subr.bf16.mxu1 %v5391_v24  ;;  %v1384_v24 = vld [vmem:[#allocation11 + $0xd50] sm:$0xff]  ;;  %v1526_v11 = vld [vmem:[#allocation11 + $0x11c0] sm:$0xff] }
 0x39b   :  { %v1528_v14 = vld [vmem:[#allocation11 + $0x11d0] sm:$0xff] }
 0x39c   :  { %5266 = vmatpush1.bf16.msra.mxu0 %v5265_v30  ;;  %v1433_v30 = vld [vmem:[#allocation11 + $0xed8] sm:$0xff] }
 0x39d   :  { %5394 = vmatpush1.bf16.msra.mxu1 %v5393_v31  ;;  %5268 = vmatprep.subr.bf16.mxu0 %v5267_v32  ;;  %v5285_v31 = vpack.c.bf16 %v1398_v23, %v1382_v22  ;;  %v5413_v32 = vpack.c.bf16 %v1400_v26, %v1384_v24  ;;  %v5415_v37 = vpack.c.bf16 %v1433_v30, %v1417_v29  ;;  %v6062_v17 = vld [vmem:[#allocation18] sm:$0xff]  ;;  %v6063_v22 = vld [vmem:[#allocation18 + $0x18] sm:$0xff]  ;;  %v1558_v26 = vld [vmem:[#allocation11 + $0x12c0] sm:$0xff] }
 0x39e   :  { %5396 = vmatprep.subr.bf16.mxu1 %v5395_v36  ;;  %v1416_v36 = vld [vmem:[#allocation11 + $0xe50] sm:$0xff]  ;;  %v5429_v23 = vpack.c.bf16 %v1528_v14, %v1512_v12  ;;  %v5303_v24 = vpack.c.bf16 %v1559_v16, %v1543_v15  ;;  %v1575_v30 = vld [vmem:[#allocation11 + $0x1348] sm:$0xff]  ;;  %v1673_v12 = vld [vmem:[#allocation11 + $0x1658] sm:$0xff]  ;;  %v1993_v14 = vrot.slane %v1982_v62, %v6580_v44  ;;  %v2001_v15 = vrot.slane %v1982_v62, %v6590_v7 }
 0x39f   :  { %v1560_v29 = vld [vmem:[#allocation11 + $0x12d0] sm:$0xff] }
 0x3a0   :  { %5270 = vmatpush1.bf16.msra.mxu0 %v5269_v45  ;;  %v1465_v45 = vld [vmem:[#allocation11 + $0xfd8] sm:$0xff] }
 0x3a1   :  { %5398 = vmatpush1.bf16.msra.mxu1 %v5397_v46  ;;  %5272 = vmatprep.subr.bf16.mxu0 %v5271_v47  ;;  %v5289_v46 = vpack.c.bf16 %v1430_v35, %v1414_v34  ;;  %v5417_v47 = vpack.c.bf16 %v1432_v38, %v1416_v36  ;;  %v5419_v51 = vpack.c.bf16 %v1465_v45, %v1449_v40  ;;  %v1590_v38 = vld [vmem:[#allocation11 + $0x13c0] sm:$0xff]  ;;  %v1592_v40 = vld [vmem:[#allocation11 + $0x13d0] sm:$0xff]  ;;  %v1607_v45 = vld [vmem:[#allocation11 + $0x1448] sm:$0xff] }
 0x3a2   :  { %5400 = vmatprep.subr.bf16.mxu1 %v5399_v50  ;;  %v1448_v50 = vld [vmem:[#allocation11 + $0xf50] sm:$0xff]  ;;  %v5433_v35 = vpack.c.bf16 %v1560_v29, %v1544_v27  ;;  %v1719_v27 = vld [vmem:[#allocation11 + $0x17c8] sm:$0xff] }
 0x3a4   :  { %5274 = vmatpush1.bf16.msra.mxu0 %v5273_v56  ;;  %v1497_v56 = vld [vmem:[#allocation11 + $0x10d8] sm:$0xff] }
 0x3a5   :  { %5402 = vmatpush1.bf16.msra.mxu1 %v5401_v58  ;;  %5276 = vmatprep.subr.bf16.mxu0 %v5275_v59  ;;  %v5293_v58 = vpack.c.bf16 %v1462_v49, %v1446_v48  ;;  %v5421_v59 = vpack.c.bf16 %v1464_v52, %v1448_v50  ;;  %v5437_v49 = vpack.c.bf16 %v1592_v40, %v1576_v53  ;;  %v1622_v52 = vld [vmem:[#allocation11 + $0x14c0] sm:$0xff] }
 0x3a6   :  { %5404 = vmatprep.subr.bf16.mxu1 %v5403_v63  ;;  %v5423_v63 = vpack.c.bf16 %v1497_v56, %v1481_v55  ;;  %v1624_v55 = vld [vmem:[#allocation11 + $0x14d0] sm:$0xff]  ;;  %v1639_v56 = vld [vmem:[#allocation11 + $0x1548] sm:$0xff]  ;;  %v1702_v40 = vld [vmem:[#allocation11 + $0x1740] sm:$0xff] }
 0x3a8   :  { %5278 = vmatpush1.bf16.msra.mxu0 %v5277_v6  ;;  %v1513_v6 = vld [vmem:[#allocation11 + $0x1158] sm:$0xff] }
 0x3a9   :  { %5406 = vmatpush1.bf16.msra.mxu1 %v5405_v8  ;;  %5280 = vmatprep.subr.bf16.mxu0 %v5279_v9  ;;  %v1529_v8 = vld [vmem:[#allocation11 + $0x11d8] sm:$0xff]  ;;  %v5425_v9 = vpack.c.bf16 %v1496_v2, %v1480_v0  ;;  %v1638_v2 = vld [vmem:[#allocation11 + $0x1540] sm:$0xff] }
 0x3aa   :  { %5408 = vmatprep.subr.bf16.mxu1 %v5407_v13  ;;  %v5299_v13 = vpack.c.bf16 %v1527_v4, %v1511_v3  ;;  %v5427_v18 = vpack.c.bf16 %v1529_v8, %v1513_v6  ;;  %v1654_v3 = vld [vmem:[#allocation11 + $0x15c0] sm:$0xff]  ;;  %v1640_v4 = vld [vmem:[#allocation11 + $0x1550] sm:$0xff]  ;;  %v1671_v8 = vld [vmem:[#allocation11 + $0x1648] sm:$0xff] }
 0x3ab   :  { %v1656_v6 = vld [vmem:[#allocation11 + $0x15d0] sm:$0xff]  ;;  %v5317_v16 = vpack.c.bf16 %v1654_v3, %v1638_v2  ;;  %v1769_v2 = vld [vmem:[#allocation11 + $0x1958] sm:$0xff] }
 0x3ac   :  { %5282 = vmatpush1.bf16.msra.mxu0 %v5281_v19  ;;  %v1545_v19 = vld [vmem:[#allocation11 + $0x1258] sm:$0xff] }
 0x3ad   :  { %5410 = vmatpush1.bf16.msra.mxu1 %v5409_v20  ;;  %5284 = vmatprep.subr.bf16.mxu0 %v5283_v21  ;;  %v1561_v20 = vld [vmem:[#allocation11 + $0x12d8] sm:$0xff]  ;;  %v5301_v21 = vpack.c.bf16 %v1526_v11, %v1510_v10  ;;  %v1989_v10 = vrot.slane %v1982_v62, %v6575_v42  ;;  %v1997_v11 = vrot.slane %v1982_v62, %v6587_v1  ;;  %v1752_v62 = vld [vmem:[#allocation11 + $0x18d0] sm:$0xff] }
 0x3ae   :  { %5412 = vmatprep.subr.bf16.mxu1 %v5411_v25  ;;  %v1542_v25 = vld [vmem:[#allocation11 + $0x1240] sm:$0xff]  ;;  %v5431_v28 = vpack.c.bf16 %v1561_v20, %v1545_v19  ;;  %v1785_v3 = vld [vmem:[#allocation11 + $0x19d8] sm:$0xff] }
 0x3af   :  { %v5305_v34 = vpack.c.bf16 %v1558_v26, %v1542_v25  ;;  %v1670_v19 = vld [vmem:[#allocation11 + $0x1640] sm:$0xff]  ;;  %v1688_v25 = vld [vmem:[#allocation11 + $0x16d0] sm:$0xff]  ;;  %v1703_v26 = vld [vmem:[#allocation11 + $0x1748] sm:$0xff] }
 0x3b0   :  { %5286 = vmatpush1.bf16.msra.mxu0 %v5285_v31  ;;  %v1591_v31 = vld [vmem:[#allocation11 + $0x13c8] sm:$0xff]  ;;  %v1686_v20 = vld [vmem:[#allocation11 + $0x16c0] sm:$0xff] }
 0x3b1   :  { %5414 = vmatpush1.bf16.msra.mxu1 %v5413_v32  ;;  %5288 = vmatprep.subr.bf16.mxu0 %v5287_v33  ;;  %v1577_v32 = vld [vmem:[#allocation11 + $0x1358] sm:$0xff]  ;;  %v5307_v36 = vpack.c.bf16 %v1591_v31, %v1575_v30 }
 0x3b2   :  { %5416 = vmatprep.subr.bf16.mxu1 %v5415_v37  ;;  %v1593_v33 = vld [vmem:[#allocation11 + $0x13d8] sm:$0xff]  ;;  %v1574_v37 = vld [vmem:[#allocation11 + $0x1340] sm:$0xff] }
 0x3b3   :  { %v5435_v39 = vpack.c.bf16 %v1593_v33, %v1577_v32  ;;  %v5309_v48 = vpack.c.bf16 %v1590_v38, %v1574_v37  ;;  %v1705_v32 = vld [vmem:[#allocation11 + $0x1758] sm:$0xff] }
 0x3b4   :  { %5290 = vmatpush1.bf16.msra.mxu0 %v5289_v46  ;;  %v1623_v46 = vld [vmem:[#allocation11 + $0x14c8] sm:$0xff]  ;;  %v1721_v33 = vld [vmem:[#allocation11 + $0x17d8] sm:$0xff] }
 0x3b5   :  { %5418 = vmatpush1.bf16.msra.mxu1 %v5417_v47  ;;  %5292 = vmatprep.subr.bf16.mxu0 %v5291_v57  ;;  %v1609_v47 = vld [vmem:[#allocation11 + $0x1458] sm:$0xff]  ;;  %v5311_v50 = vpack.c.bf16 %v1623_v46, %v1607_v45  ;;  %v1718_v45 = vld [vmem:[#allocation11 + $0x17c0] sm:$0xff]  ;;  %v1704_v46 = vld [vmem:[#allocation11 + $0x1750] sm:$0xff] }
 0x3b6   :  { %5420 = vmatprep.subr.bf16.mxu1 %v5419_v51  ;;  %v1625_v57 = vld [vmem:[#allocation11 + $0x14d8] sm:$0xff]  ;;  %v1606_v51 = vld [vmem:[#allocation11 + $0x1440] sm:$0xff] }
 0x3b7   :  { %v5439_v54 = vpack.c.bf16 %v1625_v57, %v1609_v47  ;;  %v5313_v61 = vpack.c.bf16 %v1622_v52, %v1606_v51  ;;  %v1751_v51 = vld [vmem:[#allocation11 + $0x18c8] sm:$0xff]  ;;  %v1737_v52 = vld [vmem:[#allocation11 + $0x1858] sm:$0xff] }
 0x3b8   :  { %5294 = vmatpush1.bf16.msra.mxu0 %v5293_v58  ;;  %v1655_v58 = vld [vmem:[#allocation11 + $0x15c8] sm:$0xff] }
 0x3b9   :  { %5422 = vmatpush1.bf16.msra.mxu1 %v5421_v59  ;;  %5296 = vmatprep.subr.bf16.mxu0 %v5295_v60  ;;  %v1641_v59 = vld [vmem:[#allocation11 + $0x1558] sm:$0xff]  ;;  %v5315_v0 = vpack.c.bf16 %v1655_v58, %v1639_v56  ;;  %v1734_v58 = vld [vmem:[#allocation11 + $0x1840] sm:$0xff] }
 0x3ba   :  { %5424 = vmatprep.subr.bf16.mxu1 %v5423_v63  ;;  %v1657_v60 = vld [vmem:[#allocation11 + $0x15d8] sm:$0xff]  ;;  %v5441_v63 = vpack.c.bf16 %v1624_v55, %v1608_v43 }
 0x3bb   :  { %2699 = vmatmul.mubr.f32.vlgmr.msra.gmra.mrb[8].mxu0 %v6062_v17  ;;  %v1753_v43 = vld [vmem:[#allocation11 + $0x18d8] sm:$0xff] }
 0x3bc   :  { %2841 = vmatmul.mubr.f32.vlgmr.msra.gmra.mrb[8].mxu1 %v6062_v17  ;;  %5298 = vmatpush1.bf16.msra.mxu0 %v5297_v5  ;;  %v5443_v5 = vpack.c.bf16 %v1657_v60, %v1641_v59  ;;  %v5445_v17 = vpack.c.bf16 %v1656_v6, %v1640_v4  ;;  %v1750_v59 = vld [vmem:[#allocation11 + $0x18c0] sm:$0xff]  ;;  %v1736_v60 = vld [vmem:[#allocation11 + $0x1850] sm:$0xff] }
 0x3bd   :  { %2769 = vmatprep.mubr.f32.mxu0 %v6063_v22  ;;  %5426 = vmatpush1.bf16.msra.mxu1 %v5425_v9  ;;  %v1687_v9 = vld [vmem:[#allocation11 + $0x16c8] sm:$0xff]  ;;  %v5329_v4 = vpack.c.bf16 %v1750_v59, %v1734_v58  ;;  %v1894_v59 = vld [vmem:[#allocation11 + $0x1d40] sm:$0xff] }
 0x3be   :  { %2911 = vmatprep.mubr.f32.mxu1 %v6063_v22  ;;  %5300 = vmatprep.subr.bf16.mxu0 %v5299_v13  ;;  %v1689_v13 = vld [vmem:[#allocation11 + $0x16d8] sm:$0xff] }
 0x3bf   :  { %5428 = vmatprep.subr.bf16.mxu1 %v5427_v18  ;;  %v5319_v18 = vpack.c.bf16 %v1687_v9, %v1671_v8  ;;  %v1766_v8 = vld [vmem:[#allocation11 + $0x1940] sm:$0xff] }
 0x3c0   :  { %5302 = vmatpush1.bf16.msra.mxu0 %v5301_v21  ;;  %v1672_v21 = vld [vmem:[#allocation11 + $0x1650] sm:$0xff]  ;;  %v1782_v9 = vld [vmem:[#allocation11 + $0x19c0] sm:$0xff] }
 0x3c1   :  { %5430 = vmatpush1.bf16.msra.mxu1 %v5429_v23  ;;  %5304 = vmatprep.subr.bf16.mxu0 %v5303_v24  ;;  %v5447_v24 = vpack.c.bf16 %v1689_v13, %v1673_v12  ;;  %v5449_v53 = vpack.c.bf16 %v1688_v25, %v1672_v21  ;;  %v1784_v12 = vld [vmem:[#allocation11 + $0x19d0] sm:$0xff]  ;;  %v1799_v13 = vld [vmem:[#allocation11 + $0x1a48] sm:$0xff]  ;;  %v1814_v21 = vld [vmem:[#allocation11 + $0x1ac0] sm:$0xff] }
 0x3c2   :  { %5432 = vmatprep.subr.bf16.mxu1 %v5431_v28  ;;  %v1831_v25 = vld [vmem:[#allocation11 + $0x1b48] sm:$0xff] }
 0x3c4   :  { %5306 = vmatpush1.bf16.msra.mxu0 %v5305_v34 }
 0x3c5   :  { %5434 = vmatpush1.bf16.msra.mxu1 %v5433_v35  ;;  %5308 = vmatprep.subr.bf16.mxu0 %v5307_v36  ;;  %v5321_v36 = vpack.c.bf16 %v1686_v20, %v1670_v19  ;;  %v1798_v20 = vld [vmem:[#allocation11 + $0x1a40] sm:$0xff] }
 0x3c6   :  { %5436 = vmatprep.subr.bf16.mxu1 %v5435_v39  ;;  %v5323_v39 = vpack.c.bf16 %v1719_v27, %v1703_v26  ;;  %v1847_v26 = vld [vmem:[#allocation11 + $0x1bc8] sm:$0xff]  ;;  %v1833_v27 = vld [vmem:[#allocation11 + $0x1b58] sm:$0xff] }
 0x3c8   :  { %5310 = vmatpush1.bf16.msra.mxu0 %v5309_v48  ;;  %v5451_v48 = vpack.c.bf16 %v1721_v33, %v1705_v32  ;;  %v1830_v32 = vld [vmem:[#allocation11 + $0x1b40] sm:$0xff] }
 0x3c9   :  { %5438 = vmatpush1.bf16.msra.mxu1 %v5437_v49  ;;  %5312 = vmatprep.subr.bf16.mxu0 %v5311_v50  ;;  %v1720_v49 = vld [vmem:[#allocation11 + $0x17d0] sm:$0xff]  ;;  %v1735_v50 = vld [vmem:[#allocation11 + $0x1848] sm:$0xff]  ;;  %v1846_v33 = vld [vmem:[#allocation11 + $0x1bc0] sm:$0xff] }
 0x3ca   :  { %5440 = vmatprep.subr.bf16.mxu1 %v5439_v54  ;;  %v5325_v54 = vpack.c.bf16 %v1718_v45, %v1702_v40  ;;  %v5453_v55 = vpack.c.bf16 %v1720_v49, %v1704_v46  ;;  %v5327_v56 = vpack.c.bf16 %v1751_v51, %v1735_v50  ;;  %v5341_v40 = vpack.c.bf16 %v1846_v33, %v1830_v32  ;;  %v1880_v50 = vld [vmem:[#allocation11 + $0x1cd0] sm:$0xff]  ;;  %v1895_v51 = vld [vmem:[#allocation11 + $0x1d48] sm:$0xff]  ;;  %v970_v33 = vld [vmem:[#allocation11 + $0x60] sm:$0xff] }
 0x3cc   :  { %5314 = vmatpush1.bf16.msra.mxu0 %v5313_v61  ;;  %v5455_v61 = vpack.c.bf16 %v1753_v43, %v1737_v52  ;;  %v1911_v52 = vld [vmem:[#allocation11 + $0x1dc8] sm:$0xff]  ;;  %v1897_v43 = vld [vmem:[#allocation11 + $0x1d58] sm:$0xff] }
 0x3cd   :  { %5442 = vmatpush1.bf16.msra.mxu1 %v5441_v63  ;;  %5316 = vmatprep.subr.bf16.mxu0 %v5315_v0  ;;  %v1767_v63 = vld [vmem:[#allocation11 + $0x1948] sm:$0xff]  ;;  %v5347_v58 = vpack.c.bf16 %v1911_v52, %v1895_v51 }
 0x3ce   :  { %v2203_v22 = vpop.f32.mrb[4].mxu0  ;;  %v2345_v23 = vpop.f32.mrb[4].mxu1  ;;  %5444 = vmatprep.subr.bf16.mxu1 %v5443_v5  ;;  %v1783_v0 = vld [vmem:[#allocation11 + $0x19c8] sm:$0xff]  ;;  %v5457_v5 = vpack.c.bf16 %v1752_v62, %v1736_v60  ;;  %v1910_v60 = vld [vmem:[#allocation11 + $0x1dc0] sm:$0xff] }
 0x3cf   :  { %v6003_v28 = vadd.f32 %v2203_v22, %v1989_v10  ;;  %v6005_v29 = vadd.f32 %v2345_v23, %v1997_v11  ;;  %v2205_v30 = vpop.f32.mrb[5].mxu0  ;;  %v2347_v31 = vpop.f32.mrb[5].mxu1  ;;  %v5331_v6 = vpack.c.bf16 %v1783_v0, %v1767_v63  ;;  %v1768_v10 = vld [vmem:[#allocation11 + $0x1950] sm:$0xff]  ;;  %v5459_v11 = vpack.c.bf16 %v1785_v3, %v1769_v2  ;;  %v1927_v0 = vld [vmem:[#allocation11 + $0x1e48] sm:$0xff]  ;;  %v1929_v3 = vld [vmem:[#allocation11 + $0x1e58] sm:$0xff] }
 0x3d0   :  { %v6004_v34 = vadd.f32 %v2205_v30, %v1993_v14  ;;  %v6006_v35 = vadd.f32 %v2347_v31, %v2001_v15  ;;  %5318 = vmatpush1.bf16.msra.mxu0 %v5317_v16  ;;  %v1815_v14 = vld [vmem:[#allocation11 + $0x1ac8] sm:$0xff]  ;;  %v1801_v15 = vld [vmem:[#allocation11 + $0x1a58] sm:$0xff]  ;;  %v1800_v22 = vld [vmem:[#allocation11 + $0x1a50] sm:$0xff]  ;;  %v5339_v31 = vpack.c.bf16 %v1847_v26, %v1831_v25 }
 0x3d1   :  { %v3202_v37 = vmax.f32 %v6003_v28, 0.0  ;;  %v3204_v38 = vmax.f32 %v6005_v29, 0.0  ;;  %5446 = vmatpush1.bf16.msra.mxu1 %v5445_v17  ;;  %5320 = vmatprep.subr.bf16.mxu0 %v5319_v18  ;;  %v1817_v16 = vld [vmem:[#allocation11 + $0x1ad8] sm:$0xff]  ;;  %v5333_v17 = vpack.c.bf16 %v1782_v9, %v1766_v8  ;;  %v5461_v18 = vpack.c.bf16 %v1784_v12, %v1768_v10  ;;  %v1912_v63 = vld [vmem:[#allocation11 + $0x1dd0] sm:$0xff]  ;;  %v1943_v2 = vld [vmem:[#allocation11 + $0x1ec8] sm:$0xff] }
 0x3d2   :  { %v3203_v47 = vmax.f32 %v6004_v34, 0.0  ;;  %v3205_v57 = vmax.f32 %v6006_v35, 0.0  ;;  %5448 = vmatprep.subr.bf16.mxu1 %v5447_v24  ;;  %v5335_v19 = vpack.c.bf16 %v1815_v14, %v1799_v13  ;;  %v5463_v23 = vpack.c.bf16 %v1817_v16, %v1801_v15  ;;  %v1816_v24 = vld [vmem:[#allocation11 + $0x1ad0] sm:$0xff]  ;;  %v1849_v28 = vld [vmem:[#allocation11 + $0x1bd8] sm:$0xff]  ;;  %v1926_v9 = vld [vmem:[#allocation11 + $0x1e40] sm:$0xff] }
 0x3d3   :  { %3218 = vst [vmem:[#allocation20] sm:$0xff] %v3202_v37  ;;  %3220 = vst [vmem:[#allocation20 + $0x10] sm:$0xff] %v3204_v38  ;;  %v5337_v29 = vpack.c.bf16 %v1814_v21, %v1798_v20  ;;  %v5465_v30 = vpack.c.bf16 %v1816_v24, %v1800_v22  ;;  %v1832_v34 = vld [vmem:[#allocation11 + $0x1b50] sm:$0xff]  ;;  %v5467_v35 = vpack.c.bf16 %v1849_v28, %v1833_v27  ;;  %v1863_v37 = vld [vmem:[#allocation11 + $0x1c48] sm:$0xff] }
 0x3d4   :  { %3219 = vst [vmem:[#allocation20 + $0x8] sm:$0xff] %v3203_v47  ;;  %3221 = vst [vmem:[#allocation20 + $0x18] sm:$0xff] %v3205_v57  ;;  %5322 = vmatpush1.bf16.msra.mxu0 %v5321_v36  ;;  %v1848_v36 = vld [vmem:[#allocation11 + $0x1bd0] sm:$0xff]  ;;  %v1879_v38 = vld [vmem:[#allocation11 + $0x1cc8] sm:$0xff]  ;;  %v5351_v8 = vpack.c.bf16 %v1943_v2, %v1927_v0 }
 0x3d5   :  { %5450 = vmatpush1.bf16.msra.mxu1 %v5449_v53  ;;  %5324 = vmatprep.subr.bf16.mxu0 %v5323_v39  ;;  %v1865_v53 = vld [vmem:[#allocation11 + $0x1c58] sm:$0xff]  ;;  %v5469_v45 = vpack.c.bf16 %v1848_v36, %v1832_v34  ;;  %v5343_v46 = vpack.c.bf16 %v1879_v38, %v1863_v37  ;;  %v1862_v47 = vld [vmem:[#allocation11 + $0x1c40] sm:$0xff]  ;;  %v1944_v13 = vld [vmem:[#allocation11 + $0x1ed0] sm:$0xff] }
 0x3d6   :  { %5452 = vmatprep.subr.bf16.mxu1 %v5451_v48  ;;  %v1881_v39 = vld [vmem:[#allocation11 + $0x1cd8] sm:$0xff]  ;;  %v1878_v57 = vld [vmem:[#allocation11 + $0x1cc0] sm:$0xff]  ;;  %v1864_v48 = vld [vmem:[#allocation11 + $0x1c50] sm:$0xff] }
 0x3d7   :  { %v5471_v49 = vpack.c.bf16 %v1881_v39, %v1865_v53  ;;  %v1942_v10 = vld [vmem:[#allocation11 + $0x1ec0] sm:$0xff]  ;;  %v1959_v14 = vld [vmem:[#allocation11 + $0x1f48] sm:$0xff]  ;;  %v1961_v16 = vld [vmem:[#allocation11 + $0x1f58] sm:$0xff] }
 0x3d8   :  { %5326 = vmatpush1.bf16.msra.mxu0 %v5325_v54  ;;  %v1913_v54 = vld [vmem:[#allocation11 + $0x1dd8] sm:$0xff]  ;;  %v1975_v15 = vld [vmem:[#allocation11 + $0x1fc8] sm:$0xff]  ;;  %v1958_v21 = vld [vmem:[#allocation11 + $0x1f40] sm:$0xff] }
 0x3d9   :  { %5454 = vmatpush1.bf16.msra.mxu1 %v5453_v55  ;;  %5328 = vmatprep.subr.bf16.mxu0 %v5327_v56  ;;  %v5345_v55 = vpack.c.bf16 %v1878_v57, %v1862_v47  ;;  %v5473_v56 = vpack.c.bf16 %v1880_v50, %v1864_v48  ;;  %v5475_v62 = vpack.c.bf16 %v1913_v54, %v1897_v43  ;;  %v1974_v22 = vld [vmem:[#allocation11 + $0x1fc0] sm:$0xff]  ;;  %v1976_v25 = vld [vmem:[#allocation11 + $0x1fd0] sm:$0xff]  ;;  %v971_v26 = vld [vmem:[#allocation11 + $0x68] sm:$0xff] }
 0x3da   :  { %5456 = vmatprep.subr.bf16.mxu1 %v5455_v61  ;;  %v1896_v61 = vld [vmem:[#allocation11 + $0x1d50] sm:$0xff]  ;;  %v5355_v20 = vpack.c.bf16 %v1975_v15, %v1959_v14  ;;  %v987_v27 = vld [vmem:[#allocation11 + $0xe8] sm:$0xff]  ;;  %v973_v28 = vld [vmem:[#allocation11 + $0x78] sm:$0xff] }
 0x3db   :  { %v5487_v32 = vpack.c.bf16 %v987_v27, %v971_v26  ;;  %v986_v34 = vld [vmem:[#allocation11 + $0xe0] sm:$0xff]  ;;  %v972_v36 = vld [vmem:[#allocation11 + $0x70] sm:$0xff]  ;;  %v1003_v38 = vld [vmem:[#allocation11 + $0x168] sm:$0xff] }
 0x3dc   :  { %5330 = vmatpush1.bf16.msra.mxu0 %v5329_v4  ;;  %v1945_v4 = vld [vmem:[#allocation11 + $0x1ed8] sm:$0xff]  ;;  %v988_v37 = vld [vmem:[#allocation11 + $0xf0] sm:$0xff]  ;;  %v1019_v53 = vld [vmem:[#allocation11 + $0x1e8] sm:$0xff]  ;;  %v5489_v39 = vpack.c.bf16 %v986_v34, %v970_v33 }
 0x3dd   :  { %5458 = vmatpush1.bf16.msra.mxu1 %v5457_v5  ;;  %5332 = vmatprep.subr.bf16.mxu0 %v5331_v6  ;;  %v5349_v5 = vpack.c.bf16 %v1910_v60, %v1894_v59  ;;  %v5477_v6 = vpack.c.bf16 %v1912_v63, %v1896_v61  ;;  %v5479_v12 = vpack.c.bf16 %v1945_v4, %v1929_v3  ;;  %v1002_v47 = vld [vmem:[#allocation11 + $0x160] sm:$0xff]  ;;  %v1004_v48 = vld [vmem:[#allocation11 + $0x170] sm:$0xff]  ;;  %v1035_v51 = vld [vmem:[#allocation11 + $0x268] sm:$0xff] }
 0x3de   :  { %5460 = vmatprep.subr.bf16.mxu1 %v5459_v11  ;;  %v1928_v11 = vld [vmem:[#allocation11 + $0x1e50] sm:$0xff]  ;;  %v1018_v57 = vld [vmem:[#allocation11 + $0x1e0] sm:$0xff]  ;;  %v1051_v52 = vld [vmem:[#allocation11 + $0x2e8] sm:$0xff] }
 0x3df   :  { %v1020_v50 = vld [vmem:[#allocation11 + $0x1f0] sm:$0xff]  ;;  %v6064_v43 = vld [vmem:[#allocation18 + $0x10] sm:$0xff]  ;;  %v6065_v59 = vld [vmem:[#allocation18 + $0x8] sm:$0xff]  ;;  %v5495_v61 = vpack.c.bf16 %v1051_v52, %v1035_v51 }
 0x3e0   :  { %5334 = vmatpush1.bf16.msra.mxu0 %v5333_v17  ;;  %v1977_v17 = vld [vmem:[#allocation11 + $0x1fd8] sm:$0xff]  ;;  %v5621_v60 = vpack.c.bf16 %v1020_v50, %v1004_v48  ;;  %v1050_v63 = vld [vmem:[#allocation11 + $0x2e0] sm:$0xff]  ;;  %v1036_v0 = vld [vmem:[#allocation11 + $0x270] sm:$0xff] }
 0x3e1   :  { %5462 = vmatpush1.bf16.msra.mxu1 %v5461_v18  ;;  %5336 = vmatprep.subr.bf16.mxu0 %v5335_v19  ;;  %v5353_v18 = vpack.c.bf16 %v1942_v10, %v1926_v9  ;;  %v5481_v19 = vpack.c.bf16 %v1944_v13, %v1928_v11  ;;  %v5483_v24 = vpack.c.bf16 %v1977_v17, %v1961_v16  ;;  %v1052_v3 = vld [vmem:[#allocation11 + $0x2f0] sm:$0xff]  ;;  %v1067_v4 = vld [vmem:[#allocation11 + $0x368] sm:$0xff]  ;;  %v1082_v13 = vld [vmem:[#allocation11 + $0x3e0] sm:$0xff] }
 0x3e2   :  { %5464 = vmatprep.subr.bf16.mxu1 %v5463_v23  ;;  %v1960_v23 = vld [vmem:[#allocation11 + $0x1f50] sm:$0xff]  ;;  %v5625_v10 = vpack.c.bf16 %v1052_v3, %v1036_v0  ;;  %v1099_v17 = vld [vmem:[#allocation11 + $0x468] sm:$0xff]  ;;  %v1162_v50 = vld [vmem:[#allocation11 + $0x660] sm:$0xff] }
 0x3e3   :  { %v1068_v14 = vld [vmem:[#allocation11 + $0x370] sm:$0xff]  ;;  %v1178_v51 = vld [vmem:[#allocation11 + $0x6e0] sm:$0xff] }
 0x3e4   :  { %5338 = vmatpush1.bf16.msra.mxu0 %v5337_v29  ;;  %v989_v29 = vld [vmem:[#allocation11 + $0xf8] sm:$0xff]  ;;  %v1084_v16 = vld [vmem:[#allocation11 + $0x3f0] sm:$0xff]  ;;  %v1210_v0 = vld [vmem:[#allocation11 + $0x7e0] sm:$0xff] }
 0x3e5   :  { %5466 = vmatpush1.bf16.msra.mxu1 %v5465_v30  ;;  %5340 = vmatprep.subr.bf16.mxu0 %v5339_v31  ;;  %v5357_v30 = vpack.c.bf16 %v1974_v22, %v1958_v21  ;;  %v5485_v31 = vpack.c.bf16 %v1976_v25, %v1960_v23  ;;  %v5629_v22 = vpack.c.bf16 %v1084_v16, %v1068_v14  ;;  %v1114_v25 = vld [vmem:[#allocation11 + $0x4e0] sm:$0xff]  ;;  %v1100_v26 = vld [vmem:[#allocation11 + $0x470] sm:$0xff] }
 0x3e6   :  { %5468 = vmatprep.subr.bf16.mxu1 %v5467_v35  ;;  %v5615_v35 = vpack.c.bf16 %v989_v29, %v973_v28  ;;  %v1116_v28 = vld [vmem:[#allocation11 + $0x4f0] sm:$0xff]  ;;  %v1131_v29 = vld [vmem:[#allocation11 + $0x568] sm:$0xff]  ;;  %v1242_v14 = vld [vmem:[#allocation11 + $0x8e0] sm:$0xff] }
 0x3e7   :  { %v5633_v34 = vpack.c.bf16 %v1116_v28, %v1100_v26  ;;  %v1164_v52 = vld [vmem:[#allocation11 + $0x670] sm:$0xff]  ;;  %v1274_v26 = vld [vmem:[#allocation11 + $0x9e0] sm:$0xff] }
 0x3e8   :  { %5342 = vmatpush1.bf16.msra.mxu0 %v5341_v40  ;;  %v1005_v40 = vld [vmem:[#allocation11 + $0x178] sm:$0xff] }
 0x3e9   :  { %5470 = vmatpush1.bf16.msra.mxu1 %v5469_v45  ;;  %5344 = vmatprep.subr.bf16.mxu0 %v5343_v46  ;;  %v1021_v45 = vld [vmem:[#allocation11 + $0x1f8] sm:$0xff]  ;;  %v5617_v46 = vpack.c.bf16 %v988_v37, %v972_v36  ;;  %v1130_v36 = vld [vmem:[#allocation11 + $0x560] sm:$0xff] }
 0x3ea   :  { %5472 = vmatprep.subr.bf16.mxu1 %v5471_v49  ;;  %v5491_v49 = vpack.c.bf16 %v1019_v53, %v1003_v38  ;;  %v5619_v54 = vpack.c.bf16 %v1021_v45, %v1005_v40  ;;  %v1146_v37 = vld [vmem:[#allocation11 + $0x5e0] sm:$0xff]  ;;  %v1132_v38 = vld [vmem:[#allocation11 + $0x570] sm:$0xff]  ;;  %v1163_v40 = vld [vmem:[#allocation11 + $0x668] sm:$0xff] }
 0x3eb   :  { %v1179_v45 = vld [vmem:[#allocation11 + $0x6e8] sm:$0xff] }
 0x3ec   :  { %5346 = vmatpush1.bf16.msra.mxu0 %v5345_v55  ;;  %v1037_v55 = vld [vmem:[#allocation11 + $0x278] sm:$0xff] }
 0x3ed   :  { %5474 = vmatpush1.bf16.msra.mxu1 %v5473_v56  ;;  %5348 = vmatprep.subr.bf16.mxu0 %v5347_v58  ;;  %v1053_v56 = vld [vmem:[#allocation11 + $0x2f8] sm:$0xff]  ;;  %v5493_v58 = vpack.c.bf16 %v1018_v57, %v1002_v47  ;;  %v5509_v57 = vpack.c.bf16 %v1146_v37, %v1130_v36  ;;  %v1290_v37 = vld [vmem:[#allocation11 + $0xa60] sm:$0xff] }
 0x3ee   :  { %5476 = vmatprep.subr.bf16.mxu1 %v5475_v62  ;;  %v1034_v62 = vld [vmem:[#allocation11 + $0x260] sm:$0xff]  ;;  %v5623_v2 = vpack.c.bf16 %v1053_v56, %v1037_v55  ;;  %v1181_v47 = vld [vmem:[#allocation11 + $0x6f8] sm:$0xff]  ;;  %v1195_v55 = vld [vmem:[#allocation11 + $0x768] sm:$0xff] }
 0x3ef   :  { %v5497_v9 = vpack.c.bf16 %v1050_v63, %v1034_v62  ;;  %v1211_v56 = vld [vmem:[#allocation11 + $0x7e8] sm:$0xff]  ;;  %v1194_v63 = vld [vmem:[#allocation11 + $0x760] sm:$0xff] }
 0x3f0   :  { %5350 = vmatpush1.bf16.msra.mxu0 %v5349_v5  ;;  %v1083_v5 = vld [vmem:[#allocation11 + $0x3e8] sm:$0xff]  ;;  %v5515_v62 = vpack.c.bf16 %v1211_v56, %v1195_v55  ;;  %v1340_v55 = vld [vmem:[#allocation11 + $0xbf0] sm:$0xff] }
 0x3f1   :  { %5478 = vmatpush1.bf16.msra.mxu1 %v5477_v6  ;;  %5352 = vmatprep.subr.bf16.mxu0 %v5351_v8  ;;  %v1069_v6 = vld [vmem:[#allocation11 + $0x378] sm:$0xff]  ;;  %v5499_v11 = vpack.c.bf16 %v1083_v5, %v1067_v4  ;;  %v1212_v4 = vld [vmem:[#allocation11 + $0x7f0] sm:$0xff]  ;;  %v1227_v5 = vld [vmem:[#allocation11 + $0x868] sm:$0xff] }
 0x3f2   :  { %5480 = vmatprep.subr.bf16.mxu1 %v5479_v12  ;;  %v1085_v8 = vld [vmem:[#allocation11 + $0x3f8] sm:$0xff]  ;;  %v1066_v12 = vld [vmem:[#allocation11 + $0x360] sm:$0xff]  ;;  %v1355_v56 = vld [vmem:[#allocation11 + $0xc68] sm:$0xff] }
 0x3f3   :  { %v5627_v15 = vpack.c.bf16 %v1085_v8, %v1069_v6  ;;  %v5501_v21 = vpack.c.bf16 %v1082_v13, %v1066_v12  ;;  %v1243_v6 = vld [vmem:[#allocation11 + $0x8e8] sm:$0xff]  ;;  %v1229_v8 = vld [vmem:[#allocation11 + $0x878] sm:$0xff]  ;;  %v1226_v13 = vld [vmem:[#allocation11 + $0x860] sm:$0xff] }
 0x3f4   :  { %5354 = vmatpush1.bf16.msra.mxu0 %v5353_v18  ;;  %v1115_v18 = vld [vmem:[#allocation11 + $0x4e8] sm:$0xff]  ;;  %v5519_v12 = vpack.c.bf16 %v1243_v6, %v1227_v5  ;;  %v1372_v5 = vld [vmem:[#allocation11 + $0xcf0] sm:$0xff] }
 0x3f5   :  { %5482 = vmatpush1.bf16.msra.mxu1 %v5481_v19  ;;  %5356 = vmatprep.subr.bf16.mxu0 %v5355_v20  ;;  %v1101_v19 = vld [vmem:[#allocation11 + $0x478] sm:$0xff]  ;;  %v5503_v23 = vpack.c.bf16 %v1115_v18, %v1099_v17  ;;  %v1244_v17 = vld [vmem:[#allocation11 + $0x8f0] sm:$0xff]  ;;  %v1259_v18 = vld [vmem:[#allocation11 + $0x968] sm:$0xff] }
 0x3f6   :  { %5484 = vmatprep.subr.bf16.mxu1 %v5483_v24  ;;  %v1117_v20 = vld [vmem:[#allocation11 + $0x4f8] sm:$0xff]  ;;  %v1098_v24 = vld [vmem:[#allocation11 + $0x460] sm:$0xff]  ;;  %v1387_v6 = vld [vmem:[#allocation11 + $0xd68] sm:$0xff] }
 0x3f7   :  { %v5631_v27 = vpack.c.bf16 %v1117_v20, %v1101_v19  ;;  %v5505_v33 = vpack.c.bf16 %v1114_v25, %v1098_v24  ;;  %v1275_v19 = vld [vmem:[#allocation11 + $0x9e8] sm:$0xff]  ;;  %v1261_v20 = vld [vmem:[#allocation11 + $0x978] sm:$0xff]  ;;  %v1258_v25 = vld [vmem:[#allocation11 + $0x960] sm:$0xff] }
 0x3f8   :  { %5358 = vmatpush1.bf16.msra.mxu0 %v5357_v30  ;;  %v1147_v30 = vld [vmem:[#allocation11 + $0x5e8] sm:$0xff]  ;;  %v5523_v24 = vpack.c.bf16 %v1275_v19, %v1259_v18  ;;  %v1404_v18 = vld [vmem:[#allocation11 + $0xdf0] sm:$0xff] }
 0x3f9   :  { %5486 = vmatpush1.bf16.msra.mxu1 %v5485_v31  ;;  %5488 = vmatprep.subr.bf16.mxu0 %v5487_v32  ;;  %v1133_v31 = vld [vmem:[#allocation11 + $0x578] sm:$0xff]  ;;  %v1419_v19 = vld [vmem:[#allocation11 + $0xe68] sm:$0xff] }
 0x3fa   :  { %5616 = vmatprep.subr.bf16.mxu1 %v5615_v35  ;;  %v1149_v32 = vld [vmem:[#allocation11 + $0x5f8] sm:$0xff]  ;;  %v5507_v35 = vpack.c.bf16 %v1147_v30, %v1131_v29  ;;  %v1276_v29 = vld [vmem:[#allocation11 + $0x9f0] sm:$0xff]  ;;  %v1291_v30 = vld [vmem:[#allocation11 + $0xa68] sm:$0xff] }
 0x3fb   :  { %2770 = vmatmul.mubr.f32.vlgmr.msra.gmra.mrb[8].mxu0 %v6064_v43  ;;  %v5635_v53 = vpack.c.bf16 %v1149_v32, %v1133_v31  ;;  %v1307_v31 = vld [vmem:[#allocation11 + $0xae8] sm:$0xff]  ;;  %v1293_v32 = vld [vmem:[#allocation11 + $0xa78] sm:$0xff] }
 0x3fc   :  { %2912 = vmatmul.mubr.f32.vlgmr.msra.gmra.mrb[8].mxu1 %v6064_v43  ;;  %5490 = vmatpush1.bf16.msra.mxu0 %v5489_v39  ;;  %v1148_v39 = vld [vmem:[#allocation11 + $0x5f0] sm:$0xff]  ;;  %v5527_v36 = vpack.c.bf16 %v1307_v31, %v1291_v30  ;;  %v1451_v31 = vld [vmem:[#allocation11 + $0xf68] sm:$0xff] }
 0x3fd   :  { %2982 = vmatprep.mubr.f32.mxu0 %v6065_v59  ;;  %5618 = vmatpush1.bf16.msra.mxu1 %v5617_v46  ;;  %v1165_v46 = vld [vmem:[#allocation11 + $0x678] sm:$0xff]  ;;  %v5637_v48 = vpack.c.bf16 %v1148_v39, %v1132_v38  ;;  %v1306_v38 = vld [vmem:[#allocation11 + $0xae0] sm:$0xff]  ;;  %v1436_v30 = vld [vmem:[#allocation11 + $0xef0] sm:$0xff] }
 0x3fe   :  { %3124 = vmatprep.mubr.f32.mxu1 %v6065_v59  ;;  %5492 = vmatprep.subr.bf16.mxu0 %v5491_v49  ;;  %v5511_v49 = vpack.c.bf16 %v1179_v45, %v1163_v40  ;;  %v5639_v43 = vpack.c.bf16 %v1181_v47, %v1165_v46  ;;  %v1213_v59 = vld [vmem:[#allocation11 + $0x7f8] sm:$0xff]  ;;  %v1308_v40 = vld [vmem:[#allocation11 + $0xaf0] sm:$0xff]  ;;  %v1323_v45 = vld [vmem:[#allocation11 + $0xb68] sm:$0xff] }
 0x3ff   :  { %5620 = vmatprep.subr.bf16.mxu1 %v5619_v54  ;;  %v1180_v54 = vld [vmem:[#allocation11 + $0x6f0] sm:$0xff]  ;;  %v1339_v46 = vld [vmem:[#allocation11 + $0xbe8] sm:$0xff]  ;;  %v1325_v47 = vld [vmem:[#allocation11 + $0xb78] sm:$0xff] }
 0x400   :  { %5494 = vmatpush1.bf16.msra.mxu0 %v5493_v58  ;;  %v1197_v58 = vld [vmem:[#allocation11 + $0x778] sm:$0xff] }
 0x401   :  { %5622 = vmatpush1.bf16.msra.mxu1 %v5621_v60  ;;  %5496 = vmatprep.subr.bf16.mxu0 %v5495_v61  ;;  %v5513_v60 = vpack.c.bf16 %v1178_v51, %v1162_v50  ;;  %v5641_v61 = vpack.c.bf16 %v1180_v54, %v1164_v52  ;;  %v5643_v3 = vpack.c.bf16 %v1213_v59, %v1197_v58  ;;  %v1322_v51 = vld [vmem:[#allocation11 + $0xb60] sm:$0xff]  ;;  %v1371_v58 = vld [vmem:[#allocation11 + $0xce8] sm:$0xff]  ;;  %v1357_v59 = vld [vmem:[#allocation11 + $0xc78] sm:$0xff] }
 0x402   :  { %5624 = vmatprep.subr.bf16.mxu1 %v5623_v2  ;;  %v1196_v2 = vld [vmem:[#allocation11 + $0x770] sm:$0xff]  ;;  %v5531_v50 = vpack.c.bf16 %v1339_v46, %v1323_v45  ;;  %v1338_v52 = vld [vmem:[#allocation11 + $0xbe0] sm:$0xff]  ;;  %v1483_v46 = vld [vmem:[#allocation11 + $0x1068] sm:$0xff] }
 0x403   :  { %v1468_v45 = vld [vmem:[#allocation11 + $0xff0] sm:$0xff] }
 0x404   :  { %5498 = vmatpush1.bf16.msra.mxu0 %v5497_v9  ;;  %v1245_v9 = vld [vmem:[#allocation11 + $0x8f8] sm:$0xff] }
 0x405   :  { %5626 = vmatpush1.bf16.msra.mxu1 %v5625_v10  ;;  %5500 = vmatprep.subr.bf16.mxu0 %v5499_v11  ;;  %v5517_v10 = vpack.c.bf16 %v1210_v0, %v1194_v63  ;;  %v5645_v11 = vpack.c.bf16 %v1212_v4, %v1196_v2  ;;  %v5647_v16 = vpack.c.bf16 %v1245_v9, %v1229_v8  ;;  %v1354_v0 = vld [vmem:[#allocation11 + $0xc60] sm:$0xff]  ;;  %v1403_v8 = vld [vmem:[#allocation11 + $0xde8] sm:$0xff]  ;;  %v1389_v9 = vld [vmem:[#allocation11 + $0xd78] sm:$0xff] }
 0x406   :  { %5628 = vmatprep.subr.bf16.mxu1 %v5627_v15  ;;  %v1228_v15 = vld [vmem:[#allocation11 + $0x870] sm:$0xff]  ;;  %v5535_v63 = vpack.c.bf16 %v1371_v58, %v1355_v56  ;;  %v1370_v2 = vld [vmem:[#allocation11 + $0xce0] sm:$0xff]  ;;  %v1515_v58 = vld [vmem:[#allocation11 + $0x1168] sm:$0xff] }
 0x407   :  { %v1500_v56 = vld [vmem:[#allocation11 + $0x10f0] sm:$0xff] }
 0x408   :  { %5502 = vmatpush1.bf16.msra.mxu0 %v5501_v21  ;;  %v1277_v21 = vld [vmem:[#allocation11 + $0x9f8] sm:$0xff] }
 0x409   :  { %5630 = vmatpush1.bf16.msra.mxu1 %v5629_v22  ;;  %5504 = vmatprep.subr.bf16.mxu0 %v5503_v23  ;;  %v5521_v22 = vpack.c.bf16 %v1242_v14, %v1226_v13  ;;  %v5649_v23 = vpack.c.bf16 %v1244_v17, %v1228_v15  ;;  %v5651_v28 = vpack.c.bf16 %v1277_v21, %v1261_v20  ;;  %v1386_v14 = vld [vmem:[#allocation11 + $0xd60] sm:$0xff]  ;;  %v1435_v20 = vld [vmem:[#allocation11 + $0xee8] sm:$0xff]  ;;  %v1421_v21 = vld [vmem:[#allocation11 + $0xe78] sm:$0xff] }
 0x40a   :  { %5632 = vmatprep.subr.bf16.mxu1 %v5631_v27  ;;  %v1260_v27 = vld [vmem:[#allocation11 + $0x970] sm:$0xff]  ;;  %v5539_v13 = vpack.c.bf16 %v1403_v8, %v1387_v6  ;;  %v1402_v15 = vld [vmem:[#allocation11 + $0xde0] sm:$0xff]  ;;  %v1547_v6 = vld [vmem:[#allocation11 + $0x1268] sm:$0xff] }
 0x40b   :  { %v1563_v8 = vld [vmem:[#allocation11 + $0x12e8] sm:$0xff] }
 0x40c   :  { %5506 = vmatpush1.bf16.msra.mxu0 %v5505_v33  ;;  %v1309_v33 = vld [vmem:[#allocation11 + $0xaf8] sm:$0xff] }
 0x40d   :  { %5634 = vmatpush1.bf16.msra.mxu1 %v5633_v34  ;;  %5508 = vmatprep.subr.bf16.mxu0 %v5507_v35  ;;  %v5525_v34 = vpack.c.bf16 %v1274_v26, %v1258_v25  ;;  %v5653_v35 = vpack.c.bf16 %v1276_v29, %v1260_v27  ;;  %v5655_v39 = vpack.c.bf16 %v1309_v33, %v1293_v32  ;;  %v1418_v26 = vld [vmem:[#allocation11 + $0xe60] sm:$0xff]  ;;  %v1467_v32 = vld [vmem:[#allocation11 + $0xfe8] sm:$0xff]  ;;  %v1453_v33 = vld [vmem:[#allocation11 + $0xf78] sm:$0xff] }
 0x40e   :  { %5636 = vmatprep.subr.bf16.mxu1 %v5635_v53  ;;  %v1292_v53 = vld [vmem:[#allocation11 + $0xa70] sm:$0xff]  ;;  %v5543_v25 = vpack.c.bf16 %v1435_v20, %v1419_v19  ;;  %v1434_v27 = vld [vmem:[#allocation11 + $0xee0] sm:$0xff] }
 0x40f   :  { %v1548_v19 = vld [vmem:[#allocation11 + $0x1270] sm:$0xff] }
 0x410   :  { %5510 = vmatpush1.bf16.msra.mxu0 %v5509_v57  ;;  %v1341_v57 = vld [vmem:[#allocation11 + $0xbf8] sm:$0xff] }
 0x411   :  { %5638 = vmatpush1.bf16.msra.mxu1 %v5637_v48  ;;  %5512 = vmatprep.subr.bf16.mxu0 %v5511_v49  ;;  %v5529_v48 = vpack.c.bf16 %v1306_v38, %v1290_v37  ;;  %v5657_v49 = vpack.c.bf16 %v1308_v40, %v1292_v53  ;;  %v5659_v54 = vpack.c.bf16 %v1341_v57, %v1325_v47  ;;  %v1450_v38 = vld [vmem:[#allocation11 + $0xf60] sm:$0xff]  ;;  %v1499_v47 = vld [vmem:[#allocation11 + $0x10e8] sm:$0xff]  ;;  %v1485_v57 = vld [vmem:[#allocation11 + $0x1078] sm:$0xff] }
 0x412   :  { %5640 = vmatprep.subr.bf16.mxu1 %v5639_v43  ;;  %v1324_v43 = vld [vmem:[#allocation11 + $0xb70] sm:$0xff]  ;;  %v5547_v37 = vpack.c.bf16 %v1467_v32, %v1451_v31  ;;  %v1466_v53 = vld [vmem:[#allocation11 + $0xfe0] sm:$0xff] }
 0x413   :  { %v1580_v31 = vld [vmem:[#allocation11 + $0x1370] sm:$0xff] }
 0x414   :  { %5514 = vmatpush1.bf16.msra.mxu0 %v5513_v60  ;;  %v1373_v60 = vld [vmem:[#allocation11 + $0xcf8] sm:$0xff] }
 0x415   :  { %5642 = vmatpush1.bf16.msra.mxu1 %v5641_v61  ;;  %5516 = vmatprep.subr.bf16.mxu0 %v5515_v62  ;;  %v5533_v61 = vpack.c.bf16 %v1338_v52, %v1322_v51  ;;  %v5661_v62 = vpack.c.bf16 %v1340_v55, %v1324_v43  ;;  %v5663_v4 = vpack.c.bf16 %v1373_v60, %v1357_v59  ;;  %v1482_v52 = vld [vmem:[#allocation11 + $0x1060] sm:$0xff]  ;;  %v1484_v55 = vld [vmem:[#allocation11 + $0x1070] sm:$0xff]  ;;  %v1531_v59 = vld [vmem:[#allocation11 + $0x11e8] sm:$0xff] }
 0x416   :  { %5644 = vmatprep.subr.bf16.mxu1 %v5643_v3  ;;  %v1356_v3 = vld [vmem:[#allocation11 + $0xc70] sm:$0xff]  ;;  %v5551_v51 = vpack.c.bf16 %v1499_v47, %v1483_v46  ;;  %v1498_v43 = vld [vmem:[#allocation11 + $0x10e0] sm:$0xff] }
 0x417   :  { %v5553_v60 = vpack.c.bf16 %v1498_v43, %v1482_v52  ;;  %v1612_v46 = vld [vmem:[#allocation11 + $0x1470] sm:$0xff]  ;;  %v1661_v52 = vld [vmem:[#allocation11 + $0x15f8] sm:$0xff] }
 0x418   :  { %5518 = vmatpush1.bf16.msra.mxu0 %v5517_v10  ;;  %v1405_v10 = vld [vmem:[#allocation11 + $0xdf8] sm:$0xff] }
 0x419   :  { %5646 = vmatpush1.bf16.msra.mxu1 %v5645_v11  ;;  %5520 = vmatprep.subr.bf16.mxu0 %v5519_v12  ;;  %v5537_v11 = vpack.c.bf16 %v1370_v2, %v1354_v0  ;;  %v5665_v12 = vpack.c.bf16 %v1372_v5, %v1356_v3  ;;  %v5667_v17 = vpack.c.bf16 %v1405_v10, %v1389_v9  ;;  %v1514_v0 = vld [vmem:[#allocation11 + $0x1160] sm:$0xff]  ;;  %v1516_v3 = vld [vmem:[#allocation11 + $0x1170] sm:$0xff] }
 0x41a   :  { %5648 = vmatprep.subr.bf16.mxu1 %v5647_v16  ;;  %v1388_v16 = vld [vmem:[#allocation11 + $0xd70] sm:$0xff]  ;;  %v1530_v2 = vld [vmem:[#allocation11 + $0x11e0] sm:$0xff] }
 0x41b   :  { %v1532_v5 = vld [vmem:[#allocation11 + $0x11f0] sm:$0xff] }
 0x41c   :  { %5522 = vmatpush1.bf16.msra.mxu0 %v5521_v22  ;;  %v1437_v22 = vld [vmem:[#allocation11 + $0xef8] sm:$0xff] }
 0x41d   :  { %5650 = vmatpush1.bf16.msra.mxu1 %v5649_v23  ;;  %5524 = vmatprep.subr.bf16.mxu0 %v5523_v24  ;;  %v5541_v23 = vpack.c.bf16 %v1402_v15, %v1386_v14  ;;  %v5669_v24 = vpack.c.bf16 %v1404_v18, %v1388_v16  ;;  %v5671_v29 = vpack.c.bf16 %v1437_v22, %v1421_v21  ;;  %v6066_v9 = vld [vmem:[#allocation18] sm:$0xff]  ;;  %v6067_v14 = vld [vmem:[#allocation18 + $0x18] sm:$0xff]  ;;  %v1562_v18 = vld [vmem:[#allocation11 + $0x12e0] sm:$0xff] }
 0x41e   :  { %5652 = vmatprep.subr.bf16.mxu1 %v5651_v28  ;;  %v1420_v28 = vld [vmem:[#allocation11 + $0xe70] sm:$0xff]  ;;  %v5685_v15 = vpack.c.bf16 %v1532_v5, %v1516_v3  ;;  %v5559_v16 = vpack.c.bf16 %v1563_v8, %v1547_v6  ;;  %v1579_v22 = vld [vmem:[#allocation11 + $0x1368] sm:$0xff]  ;;  %v1677_v6 = vld [vmem:[#allocation11 + $0x1678] sm:$0xff] }
 0x41f   :  { %v1564_v21 = vld [vmem:[#allocation11 + $0x12f0] sm:$0xff]  ;;  %v1691_v3 = vld [vmem:[#allocation11 + $0x16e8] sm:$0xff]  ;;  %v1693_v8 = vld [vmem:[#allocation11 + $0x16f8] sm:$0xff] }
 0x420   :  { %5526 = vmatpush1.bf16.msra.mxu0 %v5525_v34  ;;  %v1469_v34 = vld [vmem:[#allocation11 + $0xff8] sm:$0xff] }
 0x421   :  { %5654 = vmatpush1.bf16.msra.mxu1 %v5653_v35  ;;  %5528 = vmatprep.subr.bf16.mxu0 %v5527_v36  ;;  %v5545_v35 = vpack.c.bf16 %v1434_v27, %v1418_v26  ;;  %v5673_v36 = vpack.c.bf16 %v1436_v30, %v1420_v28  ;;  %v5675_v40 = vpack.c.bf16 %v1469_v34, %v1453_v33  ;;  %v1594_v30 = vld [vmem:[#allocation11 + $0x13e0] sm:$0xff]  ;;  %v1596_v33 = vld [vmem:[#allocation11 + $0x13f0] sm:$0xff]  ;;  %v1611_v34 = vld [vmem:[#allocation11 + $0x1468] sm:$0xff] }
 0x422   :  { %5656 = vmatprep.subr.bf16.mxu1 %v5655_v39  ;;  %v1452_v39 = vld [vmem:[#allocation11 + $0xf70] sm:$0xff]  ;;  %v5689_v27 = vpack.c.bf16 %v1564_v21, %v1548_v19  ;;  %v5703_v19 = vpack.c.bf16 %v1693_v8, %v1677_v6  ;;  %v1707_v21 = vld [vmem:[#allocation11 + $0x1768] sm:$0xff]  ;;  %v1770_v8 = vld [vmem:[#allocation11 + $0x1960] sm:$0xff] }
 0x424   :  { %5530 = vmatpush1.bf16.msra.mxu0 %v5529_v48  ;;  %v1501_v48 = vld [vmem:[#allocation11 + $0x10f8] sm:$0xff] }
 0x425   :  { %5658 = vmatpush1.bf16.msra.mxu1 %v5657_v49  ;;  %5532 = vmatprep.subr.bf16.mxu0 %v5531_v50  ;;  %v5549_v49 = vpack.c.bf16 %v1466_v53, %v1450_v38  ;;  %v5677_v50 = vpack.c.bf16 %v1468_v45, %v1452_v39  ;;  %v5693_v53 = vpack.c.bf16 %v1596_v33, %v1580_v31  ;;  %v1626_v45 = vld [vmem:[#allocation11 + $0x14e0] sm:$0xff] }
 0x426   :  { %5660 = vmatprep.subr.bf16.mxu1 %v5659_v54  ;;  %v5679_v54 = vpack.c.bf16 %v1501_v48, %v1485_v57  ;;  %v1628_v57 = vld [vmem:[#allocation11 + $0x14f0] sm:$0xff]  ;;  %v1643_v48 = vld [vmem:[#allocation11 + $0x1568] sm:$0xff] }
 0x428   :  { %5534 = vmatpush1.bf16.msra.mxu0 %v5533_v61  ;;  %v1517_v61 = vld [vmem:[#allocation11 + $0x1178] sm:$0xff] }
 0x429   :  { %5662 = vmatpush1.bf16.msra.mxu1 %v5661_v62  ;;  %5536 = vmatprep.subr.bf16.mxu0 %v5535_v63  ;;  %v1533_v62 = vld [vmem:[#allocation11 + $0x11f8] sm:$0xff]  ;;  %v5681_v63 = vpack.c.bf16 %v1500_v56, %v1484_v55  ;;  %v2008_v55 = vsub.s32 5, %v6572_v41  ;;  %v5697_v56 = vpack.c.bf16 %v1628_v57, %v1612_v46  ;;  %v1739_v46 = vld [vmem:[#allocation11 + $0x1868] sm:$0xff] }
 0x42a   :  { %5664 = vmatprep.subr.bf16.mxu1 %v5663_v4  ;;  %v5555_v4 = vpack.c.bf16 %v1531_v59, %v1515_v58  ;;  %v5683_v10 = vpack.c.bf16 %v1533_v62, %v1517_v61  ;;  %v2016_v58 = vsub.s32 7, %v6572_v41  ;;  %v1658_v61 = vld [vmem:[#allocation11 + $0x15e0] sm:$0xff]  ;;  %v1644_v62 = vld [vmem:[#allocation11 + $0x1570] sm:$0xff] }
 0x42c   :  { %5538 = vmatpush1.bf16.msra.mxu0 %v5537_v11  ;;  %v1549_v11 = vld [vmem:[#allocation11 + $0x1278] sm:$0xff] }
 0x42d   :  { %5666 = vmatpush1.bf16.msra.mxu1 %v5665_v12  ;;  %5540 = vmatprep.subr.bf16.mxu0 %v5539_v13  ;;  %v1565_v12 = vld [vmem:[#allocation11 + $0x12f8] sm:$0xff]  ;;  %v5557_v13 = vpack.c.bf16 %v1530_v2, %v1514_v0  ;;  %v1660_v0 = vld [vmem:[#allocation11 + $0x15f0] sm:$0xff]  ;;  %v1675_v2 = vld [vmem:[#allocation11 + $0x1668] sm:$0xff] }
 0x42e   :  { %5668 = vmatprep.subr.bf16.mxu1 %v5667_v17  ;;  %v1546_v17 = vld [vmem:[#allocation11 + $0x1260] sm:$0xff]  ;;  %v5687_v20 = vpack.c.bf16 %v1565_v12, %v1549_v11 }
 0x42f   :  { %v5561_v26 = vpack.c.bf16 %v1562_v18, %v1546_v17  ;;  %v1676_v17 = vld [vmem:[#allocation11 + $0x1670] sm:$0xff] }
 0x430   :  { %5542 = vmatpush1.bf16.msra.mxu0 %v5541_v23  ;;  %v1595_v23 = vld [vmem:[#allocation11 + $0x13e8] sm:$0xff] }
 0x431   :  { %5670 = vmatpush1.bf16.msra.mxu1 %v5669_v24  ;;  %5544 = vmatprep.subr.bf16.mxu0 %v5543_v25  ;;  %v1581_v24 = vld [vmem:[#allocation11 + $0x1378] sm:$0xff]  ;;  %v5563_v28 = vpack.c.bf16 %v1595_v23, %v1579_v22  ;;  %v1723_v22 = vld [vmem:[#allocation11 + $0x17e8] sm:$0xff] }
 0x432   :  { %5672 = vmatprep.subr.bf16.mxu1 %v5671_v29  ;;  %v1597_v25 = vld [vmem:[#allocation11 + $0x13f8] sm:$0xff]  ;;  %v1578_v29 = vld [vmem:[#allocation11 + $0x1360] sm:$0xff] }
 0x433   :  { %v5691_v32 = vpack.c.bf16 %v1597_v25, %v1581_v24  ;;  %v5565_v38 = vpack.c.bf16 %v1594_v30, %v1578_v29 }
 0x434   :  { %5546 = vmatpush1.bf16.msra.mxu0 %v5545_v35  ;;  %v1627_v35 = vld [vmem:[#allocation11 + $0x14e8] sm:$0xff] }
 0x435   :  { %5674 = vmatpush1.bf16.msra.mxu1 %v5673_v36  ;;  %5548 = vmatprep.subr.bf16.mxu0 %v5547_v37  ;;  %v1613_v36 = vld [vmem:[#allocation11 + $0x1478] sm:$0xff]  ;;  %v5567_v39 = vpack.c.bf16 %v1627_v35, %v1611_v34  ;;  %v5579_v35 = vpack.c.bf16 %v1723_v22, %v1707_v21  ;;  %v1818_v21 = vld [vmem:[#allocation11 + $0x1ae0] sm:$0xff]  ;;  %v1804_v22 = vld [vmem:[#allocation11 + $0x1a70] sm:$0xff] }
 0x436   :  { %5676 = vmatprep.subr.bf16.mxu1 %v5675_v40  ;;  %v1629_v37 = vld [vmem:[#allocation11 + $0x14f8] sm:$0xff]  ;;  %v1610_v40 = vld [vmem:[#allocation11 + $0x1460] sm:$0xff] }
 0x437   :  { %v5695_v47 = vpack.c.bf16 %v1629_v37, %v1613_v36  ;;  %v5569_v43 = vpack.c.bf16 %v1626_v45, %v1610_v40  ;;  %v1706_v36 = vld [vmem:[#allocation11 + $0x1760] sm:$0xff]  ;;  %v1724_v45 = vld [vmem:[#allocation11 + $0x17f0] sm:$0xff] }
 0x438   :  { %5550 = vmatpush1.bf16.msra.mxu0 %v5549_v49  ;;  %v1659_v49 = vld [vmem:[#allocation11 + $0x15e8] sm:$0xff]  ;;  %v1722_v37 = vld [vmem:[#allocation11 + $0x17e0] sm:$0xff] }
 0x439   :  { %5678 = vmatpush1.bf16.msra.mxu1 %v5677_v50  ;;  %5552 = vmatprep.subr.bf16.mxu0 %v5551_v51  ;;  %v2004_v50 = vsub.s32 4, %v6572_v41  ;;  %v1645_v51 = vld [vmem:[#allocation11 + $0x1578] sm:$0xff]  ;;  %v5571_v59 = vpack.c.bf16 %v1659_v49, %v1643_v48 }
 0x43a   :  { %5680 = vmatprep.subr.bf16.mxu1 %v5679_v54  ;;  %v2012_v54 = vsub.s32 6, %v6572_v41  ;;  %v1741_v48 = vld [vmem:[#allocation11 + $0x1878] sm:$0xff] }
 0x43b   :  { %2983 = vmatmul.mubr.f32.vlgmr.msra.gmra.mrb[10].mxu0 %v6066_v9  ;;  %v1757_v49 = vld [vmem:[#allocation11 + $0x18f8] sm:$0xff] }
 0x43c   :  { %3125 = vmatmul.mubr.f32.vlgmr.msra.gmra.mrb[10].mxu1 %v6066_v9  ;;  %5554 = vmatpush1.bf16.msra.mxu0 %v5553_v60  ;;  %v1642_v60 = vld [vmem:[#allocation11 + $0x1560] sm:$0xff] }
 0x43d   :  { %3053 = vmatprep.mubr.f32.mxu0 %v6067_v14  ;;  %5682 = vmatpush1.bf16.msra.mxu1 %v5681_v63  ;;  %v5699_v63 = vpack.c.bf16 %v1661_v52, %v1645_v51  ;;  %v5573_v11 = vpack.c.bf16 %v1658_v61, %v1642_v60  ;;  %v5581_v51 = vpack.c.bf16 %v1722_v37, %v1706_v36  ;;  %v1740_v60 = vld [vmem:[#allocation11 + $0x1870] sm:$0xff]  ;;  %v1834_v37 = vld [vmem:[#allocation11 + $0x1b60] sm:$0xff] }
 0x43e   :  { %3195 = vmatprep.mubr.f32.mxu1 %v6067_v14  ;;  %5556 = vmatprep.subr.bf16.mxu0 %v5555_v4  ;;  %v6068_v4 = vld [vmem:[#allocation13] sm:$0xff]  ;;  %v5575_v14 = vpack.c.bf16 %v1691_v3, %v1675_v2  ;;  %v5711_v61 = vpack.c.bf16 %v1757_v49, %v1741_v48  ;;  %v1773_v2 = vld [vmem:[#allocation11 + $0x1978] sm:$0xff]  ;;  %v1883_v48 = vld [vmem:[#allocation11 + $0x1ce8] sm:$0xff] }
 0x43f   :  { %5684 = vmatprep.subr.bf16.mxu1 %v5683_v10  ;;  %v2005_v5 = vrot.slane %v6068_v4, %v2004_v50  ;;  %v2013_v9 = vrot.slane %v6068_v4, %v2012_v54  ;;  %v2009_v10 = vrot.slane %v6068_v4, %v2008_v55  ;;  %v2017_v12 = vrot.slane %v6068_v4, %v2016_v58  ;;  %v1789_v3 = vld [vmem:[#allocation11 + $0x19f8] sm:$0xff] }
 0x440   :  { %5558 = vmatpush1.bf16.msra.mxu0 %v5557_v13  ;;  %v5701_v13 = vpack.c.bf16 %v1660_v0, %v1644_v62  ;;  %v1756_v62 = vld [vmem:[#allocation11 + $0x18f0] sm:$0xff]  ;;  %v1787_v0 = vld [vmem:[#allocation11 + $0x19e8] sm:$0xff]  ;;  %v1869_v49 = vld [vmem:[#allocation11 + $0x1c78] sm:$0xff] }
 0x441   :  { %5686 = vmatpush1.bf16.msra.mxu1 %v5685_v15  ;;  %5560 = vmatprep.subr.bf16.mxu0 %v5559_v16  ;;  %v1674_v15 = vld [vmem:[#allocation11 + $0x1660] sm:$0xff] }
 0x442   :  { %5688 = vmatprep.subr.bf16.mxu1 %v5687_v20  ;;  %v1690_v16 = vld [vmem:[#allocation11 + $0x16e0] sm:$0xff]  ;;  %v1692_v20 = vld [vmem:[#allocation11 + $0x16f0] sm:$0xff] }
 0x443   :  { %v5577_v31 = vpack.c.bf16 %v1690_v16, %v1674_v15  ;;  %v5705_v34 = vpack.c.bf16 %v1692_v20, %v1676_v17  ;;  %v1805_v15 = vld [vmem:[#allocation11 + $0x1a78] sm:$0xff]  ;;  %v1802_v20 = vld [vmem:[#allocation11 + $0x1a60] sm:$0xff] }
 0x444   :  { %5562 = vmatpush1.bf16.msra.mxu0 %v5561_v26  ;;  %v1709_v26 = vld [vmem:[#allocation11 + $0x1778] sm:$0xff] }
 0x445   :  { %5690 = vmatpush1.bf16.msra.mxu1 %v5689_v27  ;;  %5564 = vmatprep.subr.bf16.mxu0 %v5563_v28  ;;  %v1725_v27 = vld [vmem:[#allocation11 + $0x17f8] sm:$0xff] }
 0x446   :  { %5692 = vmatprep.subr.bf16.mxu1 %v5691_v32  ;;  %v5707_v40 = vpack.c.bf16 %v1725_v27, %v1709_v26  ;;  %v1821_v16 = vld [vmem:[#allocation11 + $0x1af8] sm:$0xff]  ;;  %v1835_v26 = vld [vmem:[#allocation11 + $0x1b68] sm:$0xff] }
 0x447   :  { %v1851_v27 = vld [vmem:[#allocation11 + $0x1be8] sm:$0xff] }
 0x448   :  { %5566 = vmatpush1.bf16.msra.mxu0 %v5565_v38  ;;  %v1708_v38 = vld [vmem:[#allocation11 + $0x1770] sm:$0xff]  ;;  %v5595_v36 = vpack.c.bf16 %v1851_v27, %v1835_v26  ;;  %v1963_v27 = vld [vmem:[#allocation11 + $0x1f68] sm:$0xff] }
 0x449   :  { %5694 = vmatpush1.bf16.msra.mxu1 %v5693_v53  ;;  %5568 = vmatprep.subr.bf16.mxu0 %v5567_v39  ;;  %v5709_v52 = vpack.c.bf16 %v1724_v45, %v1708_v38  ;;  %v1850_v38 = vld [vmem:[#allocation11 + $0x1be0] sm:$0xff]  ;;  %v1948_v26 = vld [vmem:[#allocation11 + $0x1ef0] sm:$0xff] }
 0x44a   :  { %5696 = vmatprep.subr.bf16.mxu1 %v5695_v47  ;;  %v1755_v47 = vld [vmem:[#allocation11 + $0x18e8] sm:$0xff] }
 0x44c   :  { %5570 = vmatpush1.bf16.msra.mxu0 %v5569_v43  ;;  %v5583_v43 = vpack.c.bf16 %v1755_v47, %v1739_v46  ;;  %v1852_v46 = vld [vmem:[#allocation11 + $0x1bf0] sm:$0xff]  ;;  %v1867_v47 = vld [vmem:[#allocation11 + $0x1c68] sm:$0xff] }
 0x44d   :  { %5698 = vmatpush1.bf16.msra.mxu1 %v5697_v56  ;;  %5572 = vmatprep.subr.bf16.mxu0 %v5571_v59  ;;  %v1738_v56 = vld [vmem:[#allocation11 + $0x1860] sm:$0xff] }
 0x44e   :  { %v2487_v18 = vpop.f32.mrb[6].mxu0  ;;  %5700 = vmatprep.subr.bf16.mxu1 %v5699_v63  ;;  %v1754_v59 = vld [vmem:[#allocation11 + $0x18e0] sm:$0xff]  ;;  %v1771_v63 = vld [vmem:[#allocation11 + $0x1968] sm:$0xff] }
 0x44f   :  { %v6633_v23 = vadd.f32 %v2487_v18, %v2005_v5  ;;  %v2629_v24 = vpop.f32.mrb[6].mxu1  ;;  %v2489_v25 = vpop.f32.mrb[7].mxu0  ;;  %v5585_v4 = vpack.c.bf16 %v1754_v59, %v1738_v56  ;;  %v5713_v5 = vpack.c.bf16 %v1756_v62, %v1740_v60  ;;  %v5587_v6 = vpack.c.bf16 %v1787_v0, %v1771_v63  ;;  %v1866_v59 = vld [vmem:[#allocation11 + $0x1c60] sm:$0xff]  ;;  %v1884_v63 = vld [vmem:[#allocation11 + $0x1cf0] sm:$0xff]  ;;  %v1899_v0 = vld [vmem:[#allocation11 + $0x1d68] sm:$0xff] }
 0x450   :  { %v6635_v28 = vadd.f32 %v2629_v24, %v2013_v9  ;;  %v6637_v29 = vadd.f32 %v2489_v25, %v2009_v10  ;;  %v2631_v30 = vpop.f32.mrb[7].mxu1  ;;  %5574 = vmatpush1.bf16.msra.mxu0 %v5573_v11  ;;  %v1786_v9 = vld [vmem:[#allocation11 + $0x19e0] sm:$0xff]  ;;  %v1772_v10 = vld [vmem:[#allocation11 + $0x1970] sm:$0xff]  ;;  %v5715_v11 = vpack.c.bf16 %v1789_v3, %v1773_v2  ;;  %v5719_v24 = vpack.c.bf16 %v1821_v16, %v1805_v15  ;;  %v1915_v2 = vld [vmem:[#allocation11 + $0x1de8] sm:$0xff] }
 0x451   :  { %v3206_v32 = vmax.f32 %v6633_v23, 0.0  ;;  %v6640_v33 = vadd.f32 %v2631_v30, %v2017_v12  ;;  %5702 = vmatpush1.bf16.msra.mxu1 %v5701_v13  ;;  %5576 = vmatprep.subr.bf16.mxu0 %v5575_v14  ;;  %v1788_v12 = vld [vmem:[#allocation11 + $0x19f0] sm:$0xff]  ;;  %v1803_v13 = vld [vmem:[#allocation11 + $0x1a68] sm:$0xff]  ;;  %v5589_v17 = vpack.c.bf16 %v1786_v9, %v1770_v8  ;;  %v1837_v30 = vld [vmem:[#allocation11 + $0x1b78] sm:$0xff]  ;;  %v5599_v56 = vpack.c.bf16 %v1883_v48, %v1867_v47 }
 0x452   :  { %v3208_v53 = vmax.f32 %v6635_v28, 0.0  ;;  %v3207_v39 = vmax.f32 %v6637_v29, 0.0  ;;  %5704 = vmatprep.subr.bf16.mxu1 %v5703_v19  ;;  %v1819_v14 = vld [vmem:[#allocation11 + $0x1ae8] sm:$0xff]  ;;  %v5717_v18 = vpack.c.bf16 %v1788_v12, %v1772_v10  ;;  %v1820_v25 = vld [vmem:[#allocation11 + $0x1af0] sm:$0xff]  ;;  %v1882_v60 = vld [vmem:[#allocation11 + $0x1ce0] sm:$0xff]  ;;  %v5603_v8 = vpack.c.bf16 %v1915_v2, %v1899_v0 }
 0x453   :  { %3222 = vst [vmem:[#allocation20 + $0x20] sm:$0xff] %v3206_v32  ;;  %v3209_v57 = vmax.f32 %v6640_v33, 0.0  ;;  %v5591_v19 = vpack.c.bf16 %v1819_v14, %v1803_v13  ;;  %v1901_v3 = vld [vmem:[#allocation11 + $0x1d78] sm:$0xff]  ;;  %v1898_v9 = vld [vmem:[#allocation11 + $0x1d60] sm:$0xff]  ;;  %v1916_v13 = vld [vmem:[#allocation11 + $0x1df0] sm:$0xff] }
 0x454   :  { %3224 = vst [vmem:[#allocation20 + $0x30] sm:$0xff] %v3208_v53  ;;  %3223 = vst [vmem:[#allocation20 + $0x28] sm:$0xff] %v3207_v39  ;;  %5578 = vmatpush1.bf16.msra.mxu0 %v5577_v31  ;;  %v1853_v31 = vld [vmem:[#allocation11 + $0x1bf8] sm:$0xff]  ;;  %v1914_v10 = vld [vmem:[#allocation11 + $0x1de0] sm:$0xff] }
 0x455   :  { %3225 = vst [vmem:[#allocation20 + $0x38] sm:$0xff] %v3209_v57  ;;  %5706 = vmatpush1.bf16.msra.mxu1 %v5705_v34  ;;  %5580 = vmatprep.subr.bf16.mxu0 %v5579_v35  ;;  %v5593_v34 = vpack.c.bf16 %v1818_v21, %v1802_v20  ;;  %v5721_v35 = vpack.c.bf16 %v1820_v25, %v1804_v22  ;;  %v1931_v14 = vld [vmem:[#allocation11 + $0x1e68] sm:$0xff]  ;;  %v1933_v16 = vld [vmem:[#allocation11 + $0x1e78] sm:$0xff]  ;;  %v1930_v21 = vld [vmem:[#allocation11 + $0x1e60] sm:$0xff] }
 0x456   :  { %5708 = vmatprep.subr.bf16.mxu1 %v5707_v40  ;;  %v1836_v40 = vld [vmem:[#allocation11 + $0x1b70] sm:$0xff]  ;;  %v5723_v45 = vpack.c.bf16 %v1853_v31, %v1837_v30  ;;  %v1947_v15 = vld [vmem:[#allocation11 + $0x1ee8] sm:$0xff]  ;;  %v1946_v22 = vld [vmem:[#allocation11 + $0x1ee0] sm:$0xff] }
 0x457   :  { %v5607_v20 = vpack.c.bf16 %v1947_v15, %v1931_v14  ;;  %v1979_v30 = vld [vmem:[#allocation11 + $0x1fe8] sm:$0xff]  ;;  %v1965_v31 = vld [vmem:[#allocation11 + $0x1f78] sm:$0xff]  ;;  %v1980_v47 = vld [vmem:[#allocation11 + $0x1ff0] sm:$0xff] }
 0x458   :  { %5582 = vmatpush1.bf16.msra.mxu0 %v5581_v51  ;;  %v1885_v51 = vld [vmem:[#allocation11 + $0x1cf8] sm:$0xff]  ;;  %v3250_v48 = vld [vmem:[#allocation14 + $0x80] sm:$0xff]  ;;  %v3252_v2 = vld [vmem:[#allocation14 + $0x90] sm:$0xff] }
 0x459   :  { %5710 = vmatpush1.bf16.msra.mxu1 %v5709_v52  ;;  %5584 = vmatprep.subr.bf16.mxu0 %v5583_v43  ;;  %v5597_v52 = vpack.c.bf16 %v1850_v38, %v1834_v37  ;;  %v5725_v43 = vpack.c.bf16 %v1852_v46, %v1836_v40  ;;  %v5727_v62 = vpack.c.bf16 %v1885_v51, %v1869_v49  ;;  %v1962_v38 = vld [vmem:[#allocation11 + $0x1f60] sm:$0xff]  ;;  %v3251_v49 = vld [vmem:[#allocation14 + $0x88] sm:$0xff]  ;;  %v3282_v51 = vld [vmem:[#allocation14 + $0x180] sm:$0xff] }
 0x45a   :  { %5712 = vmatprep.subr.bf16.mxu1 %v5711_v61  ;;  %v1868_v61 = vld [vmem:[#allocation11 + $0x1c70] sm:$0xff]  ;;  %v5611_v37 = vpack.c.bf16 %v1979_v30, %v1963_v27  ;;  %v1978_v40 = vld [vmem:[#allocation11 + $0x1fe0] sm:$0xff]  ;;  %v3267_v0 = vld [vmem:[#allocation14 + $0x108] sm:$0xff] }
 0x45b   :  { %v3254_v14 = vld [vmem:[#allocation14 + $0xa0] sm:$0xff]  ;;  %v3255_v15 = vld [vmem:[#allocation14 + $0xa8] sm:$0xff]  ;;  %v3385_v23 = vld [vmem:[#allocation14 + $0x4b8] sm:$0xff] }
 0x45c   :  { %5586 = vmatpush1.bf16.msra.mxu0 %v5585_v4  ;;  %v1917_v4 = vld [vmem:[#allocation11 + $0x1df8] sm:$0xff]  ;;  %v3270_v27 = vld [vmem:[#allocation14 + $0x120] sm:$0xff] }
 0x45d   :  { %5714 = vmatpush1.bf16.msra.mxu1 %v5713_v5  ;;  %5588 = vmatprep.subr.bf16.mxu0 %v5587_v6  ;;  %v5601_v5 = vpack.c.bf16 %v1882_v60, %v1866_v59  ;;  %v5729_v6 = vpack.c.bf16 %v1884_v63, %v1868_v61  ;;  %v5731_v12 = vpack.c.bf16 %v1917_v4, %v1901_v3  ;;  %v3234_v60 = vld [vmem:[#allocation14] sm:$0xff]  ;;  %v3235_v61 = vld [vmem:[#allocation14 + $0x8] sm:$0xff]  ;;  %v3253_v3 = vld [vmem:[#allocation14 + $0x98] sm:$0xff] }
 0x45e   :  { %5716 = vmatprep.subr.bf16.mxu1 %v5715_v11  ;;  %v1900_v11 = vld [vmem:[#allocation11 + $0x1d70] sm:$0xff]  ;;  %v5743_v59 = vpack.c.bf16 %v3251_v49, %v3250_v48  ;;  %v5745_v4 = vpack.c.bf16 %v3235_v61, %v3234_v60  ;;  %v3241_v48 = vld [vmem:[#allocation14 + $0x38] sm:$0xff]  ;;  %v3272_v49 = vld [vmem:[#allocation14 + $0x130] sm:$0xff] }
 0x45f   :  { %v3266_v63 = vld [vmem:[#allocation14 + $0x100] sm:$0xff]  ;;  %v3291_v60 = vld [vmem:[#allocation14 + $0x1c8] sm:$0xff] }
 0x460   :  { %5590 = vmatpush1.bf16.msra.mxu0 %v5589_v17  ;;  %v1949_v17 = vld [vmem:[#allocation11 + $0x1ef8] sm:$0xff]  ;;  %v6071_v30 = vld [vmem:[#allocation20 + $0x18] sm:$0xff] }
 0x461   :  { %5718 = vmatpush1.bf16.msra.mxu1 %v5717_v18  ;;  %5592 = vmatprep.subr.bf16.mxu0 %v5591_v19  ;;  %v5605_v18 = vpack.c.bf16 %v1914_v10, %v1898_v9  ;;  %v5733_v19 = vpack.c.bf16 %v1916_v13, %v1900_v11  ;;  %v5735_v25 = vpack.c.bf16 %v1949_v17, %v1933_v16  ;;  %v3236_v9 = vld [vmem:[#allocation14 + $0x10] sm:$0xff]  ;;  %v3237_v10 = vld [vmem:[#allocation14 + $0x18] sm:$0xff] }
 0x462   :  { %5720 = vmatprep.subr.bf16.mxu1 %v5719_v24  ;;  %v1932_v24 = vld [vmem:[#allocation11 + $0x1e70] sm:$0xff]  ;;  %v3268_v11 = vld [vmem:[#allocation14 + $0x110] sm:$0xff]  ;;  %v3269_v13 = vld [vmem:[#allocation14 + $0x118] sm:$0xff] }
 0x463   :  { %v6069_v16 = vld [vmem:[#allocation18 + $0x10] sm:$0xff] }
 0x464   :  { %5594 = vmatpush1.bf16.msra.mxu0 %v5593_v34  ;;  %v1981_v34 = vld [vmem:[#allocation11 + $0x1ff8] sm:$0xff] }
 0x465   :  { %5722 = vmatpush1.bf16.msra.mxu1 %v5721_v35  ;;  %5596 = vmatprep.subr.bf16.mxu0 %v5595_v36  ;;  %v5609_v35 = vpack.c.bf16 %v1946_v22, %v1930_v21  ;;  %v5737_v36 = vpack.c.bf16 %v1948_v26, %v1932_v24  ;;  %v5739_v46 = vpack.c.bf16 %v1981_v34, %v1965_v31  ;;  %v6070_v21 = vld [vmem:[#allocation20 + $0x8] sm:$0xff] }
 0x466   :  { %5724 = vmatprep.subr.bf16.mxu1 %v5723_v45  ;;  %v1964_v45 = vld [vmem:[#allocation11 + $0x1f70] sm:$0xff]  ;;  %v5781_v22 = vpack.c.bf16 %v3269_v13, %v3268_v11  ;;  %v5751_v24 = vpack.c.bf16 %v3255_v15, %v3254_v14  ;;  %v3239_v26 = vld [vmem:[#allocation14 + $0x28] sm:$0xff]  ;;  %v3244_v14 = vld [vmem:[#allocation14 + $0x50] sm:$0xff] }
 0x467   :  { %v3271_v34 = vld [vmem:[#allocation14 + $0x128] sm:$0xff]  ;;  %v3245_v15 = vld [vmem:[#allocation14 + $0x58] sm:$0xff] }
 0x468   :  { %5598 = vmatpush1.bf16.msra.mxu0 %v5597_v52  ;;  %v3283_v52 = vld [vmem:[#allocation14 + $0x188] sm:$0xff] }
 0x469   :  { %5726 = vmatpush1.bf16.msra.mxu1 %v5725_v43  ;;  %5600 = vmatprep.subr.bf16.mxu0 %v5599_v56  ;;  %v5613_v43 = vpack.c.bf16 %v1978_v40, %v1962_v38  ;;  %v5741_v56 = vpack.c.bf16 %v1980_v47, %v1964_v45  ;;  %v3289_v38 = vld [vmem:[#allocation14 + $0x1b8] sm:$0xff]  ;;  %v5785_v45 = vpack.c.bf16 %v3271_v34, %v3270_v27  ;;  %v3240_v47 = vld [vmem:[#allocation14 + $0x30] sm:$0xff]  ;;  %v3246_v27 = vld [vmem:[#allocation14 + $0x60] sm:$0xff] }
 0x46a   :  { %5728 = vmatprep.subr.bf16.mxu1 %v5727_v62  ;;  %v5775_v62 = vpack.c.bf16 %v3283_v52, %v3282_v51  ;;  %v3273_v52 = vld [vmem:[#allocation14 + $0x138] sm:$0xff]  ;;  %v5757_v61 = vpack.c.bf16 %v3241_v48, %v3240_v47  ;;  %v3248_v48 = vld [vmem:[#allocation14 + $0x70] sm:$0xff] }
 0x46c   :  { %5602 = vmatpush1.bf16.msra.mxu0 %v5601_v5  ;;  %v3284_v5 = vld [vmem:[#allocation14 + $0x190] sm:$0xff] }
 0x46d   :  { %5730 = vmatpush1.bf16.msra.mxu1 %v5729_v6  ;;  %5604 = vmatprep.subr.bf16.mxu0 %v5603_v8  ;;  %v3285_v6 = vld [vmem:[#allocation14 + $0x198] sm:$0xff]  ;;  %v5777_v8 = vpack.c.bf16 %v3267_v0, %v3266_v63  ;;  %v3242_v0 = vld [vmem:[#allocation14 + $0x40] sm:$0xff] }
 0x46e   :  { %5732 = vmatprep.subr.bf16.mxu1 %v5731_v12  ;;  %v5747_v12 = vpack.c.bf16 %v3253_v3, %v3252_v2  ;;  %v5779_v17 = vpack.c.bf16 %v3285_v6, %v3284_v5  ;;  %v3243_v2 = vld [vmem:[#allocation14 + $0x48] sm:$0xff]  ;;  %v3274_v3 = vld [vmem:[#allocation14 + $0x140] sm:$0xff]  ;;  %v3260_v6 = vld [vmem:[#allocation14 + $0xd0] sm:$0xff] }
 0x46f   :  { %v3275_v5 = vld [vmem:[#allocation14 + $0x148] sm:$0xff]  ;;  %v5761_v11 = vpack.c.bf16 %v3243_v2, %v3242_v0  ;;  %v3298_v2 = vld [vmem:[#allocation14 + $0x200] sm:$0xff] }
 0x470   :  { %5606 = vmatpush1.bf16.msra.mxu0 %v5605_v18  ;;  %v3286_v18 = vld [vmem:[#allocation14 + $0x1a0] sm:$0xff] }
 0x471   :  { %5734 = vmatpush1.bf16.msra.mxu1 %v5733_v19  ;;  %5608 = vmatprep.subr.bf16.mxu0 %v5607_v20  ;;  %v3287_v19 = vld [vmem:[#allocation14 + $0x1a8] sm:$0xff]  ;;  %v5749_v20 = vpack.c.bf16 %v3237_v10, %v3236_v9  ;;  %v3292_v9 = vld [vmem:[#allocation14 + $0x1d0] sm:$0xff]  ;;  %v3293_v10 = vld [vmem:[#allocation14 + $0x1d8] sm:$0xff] }
 0x472   :  { %5736 = vmatprep.subr.bf16.mxu1 %v5735_v25  ;;  %v3238_v25 = vld [vmem:[#allocation14 + $0x20] sm:$0xff]  ;;  %v5783_v31 = vpack.c.bf16 %v3287_v19, %v3286_v18  ;;  %v3277_v18 = vld [vmem:[#allocation14 + $0x158] sm:$0xff] }
 0x473   :  { %v5753_v40 = vpack.c.bf16 %v3239_v26, %v3238_v25  ;;  %v3262_v19 = vld [vmem:[#allocation14 + $0xe0] sm:$0xff] }
 0x474   :  { %5610 = vmatpush1.bf16.msra.mxu0 %v5609_v35  ;;  %v3256_v35 = vld [vmem:[#allocation14 + $0xb0] sm:$0xff] }
 0x475   :  { %5738 = vmatpush1.bf16.msra.mxu1 %v5737_v36  ;;  %5612 = vmatprep.subr.bf16.mxu0 %v5611_v37  ;;  %v3257_v36 = vld [vmem:[#allocation14 + $0xb8] sm:$0xff]  ;;  %v3288_v37 = vld [vmem:[#allocation14 + $0x1b0] sm:$0xff] }
 0x476   :  { %5740 = vmatprep.subr.bf16.mxu1 %v5739_v46  ;;  %v5755_v46 = vpack.c.bf16 %v3257_v36, %v3256_v35  ;;  %v5787_v51 = vpack.c.bf16 %v3289_v38, %v3288_v37  ;;  %v3279_v35 = vld [vmem:[#allocation14 + $0x168] sm:$0xff]  ;;  %v3264_v36 = vld [vmem:[#allocation14 + $0xf0] sm:$0xff]  ;;  %v3265_v37 = vld [vmem:[#allocation14 + $0xf8] sm:$0xff] }
 0x477   :  { %v3296_v38 = vld [vmem:[#allocation14 + $0x1f0] sm:$0xff]  ;;  %v5771_v47 = vpack.c.bf16 %v3265_v37, %v3264_v36  ;;  %v3334_v36 = vld [vmem:[#allocation14 + $0x320] sm:$0xff] }
 0x478   :  { %5614 = vmatpush1.bf16.msra.mxu0 %v5613_v43  ;;  %v3258_v43 = vld [vmem:[#allocation14 + $0xc0] sm:$0xff] }
 0x479   :  { %5742 = vmatpush1.bf16.msra.mxu1 %v5741_v56  ;;  %5744 = vmatprep.subr.bf16.mxu0 %v5743_v59  ;;  %v3259_v56 = vld [vmem:[#allocation14 + $0xc8] sm:$0xff]  ;;  %v3290_v59 = vld [vmem:[#allocation14 + $0x1c0] sm:$0xff] }
 0x47a   :  { %5776 = vmatprep.subr.bf16.mxu1 %v5775_v62  ;;  %v5789_v62 = vpack.c.bf16 %v3273_v52, %v3272_v49  ;;  %v5759_v63 = vpack.c.bf16 %v3259_v56, %v3258_v43  ;;  %v3249_v49 = vld [vmem:[#allocation14 + $0x78] sm:$0xff]  ;;  %v3314_v56 = vld [vmem:[#allocation14 + $0x280] sm:$0xff] }
 0x47b   :  { %3054 = vmatmul.mubr.f32.vlgmr.msra.gmra.mrb[10].mxu0 %v6069_v16  ;;  %v3281_v43 = vld [vmem:[#allocation14 + $0x178] sm:$0xff] }
 0x47c   :  { %3196 = vmatmul.mubr.f32.vlgmr.msra.gmra.mrb[10].mxu1 %v6069_v16  ;;  %5746 = vmatpush3.bf16.msra.mxu0 %v5745_v4  ;;  %v5791_v4 = vpack.c.bf16 %v3291_v60, %v3290_v59  ;;  %v3276_v16 = vld [vmem:[#allocation14 + $0x150] sm:$0xff]  ;;  %v3315_v59 = vld [vmem:[#allocation14 + $0x288] sm:$0xff]  ;;  %v3346_v60 = vld [vmem:[#allocation14 + $0x380] sm:$0xff] }
 0x47d   :  { %3561 = vmatprep.mubr.f32.mxu0 %v6070_v21  ;;  %5778 = vmatpush3.bf16.msra.mxu1 %v5777_v8  ;;  %v3261_v8 = vld [vmem:[#allocation14 + $0xd8] sm:$0xff]  ;;  %v3294_v21 = vld [vmem:[#allocation14 + $0x1e0] sm:$0xff]  ;;  %v5797_v25 = vpack.c.bf16 %v3277_v18, %v3276_v16  ;;  %v5807_v0 = vpack.c.bf16 %v3315_v59, %v3314_v56  ;;  %v3332_v16 = vld [vmem:[#allocation14 + $0x310] sm:$0xff] }
 0x47e   :  { %3631 = vmatprep.mubr.f32.mxu1 %v6071_v30  ;;  %5748 = vmatprep.subr.bf16.mxu0 %v5747_v12  ;;  %v5793_v12 = vpack.c.bf16 %v3275_v5, %v3274_v3  ;;  %v5763_v13 = vpack.c.bf16 %v3261_v8, %v3260_v6  ;;  %v3247_v30 = vld [vmem:[#allocation14 + $0x68] sm:$0xff]  ;;  %v3330_v5 = vld [vmem:[#allocation14 + $0x300] sm:$0xff]  ;;  %v3316_v8 = vld [vmem:[#allocation14 + $0x290] sm:$0xff] }
 0x47f   :  { %5780 = vmatprep.subr.bf16.mxu1 %v5779_v17  ;;  %v5795_v17 = vpack.c.bf16 %v3293_v10, %v3292_v9  ;;  %v3299_v3 = vld [vmem:[#allocation14 + $0x208] sm:$0xff]  ;;  %v3317_v9 = vld [vmem:[#allocation14 + $0x298] sm:$0xff]  ;;  %v3354_v59 = vld [vmem:[#allocation14 + $0x3c0] sm:$0xff] }
 0x480   :  { %5750 = vmatpush3.bf16.msra.mxu0 %v5749_v20  ;;  %v3263_v20 = vld [vmem:[#allocation14 + $0xe8] sm:$0xff]  ;;  %v5809_v10 = vpack.c.bf16 %v3299_v3, %v3298_v2  ;;  %v3333_v18 = vld [vmem:[#allocation14 + $0x318] sm:$0xff]  ;;  %v3338_v3 = vld [vmem:[#allocation14 + $0x340] sm:$0xff] }
 0x481   :  { %5782 = vmatpush3.bf16.msra.mxu1 %v5781_v22  ;;  %5752 = vmatprep.subr.bf16.mxu0 %v5751_v24  ;;  %v3295_v22 = vld [vmem:[#allocation14 + $0x1e8] sm:$0xff]  ;;  %v5765_v24 = vpack.c.bf16 %v3245_v15, %v3244_v14  ;;  %v5767_v26 = vpack.c.bf16 %v3263_v20, %v3262_v19  ;;  %v3300_v14 = vld [vmem:[#allocation14 + $0x210] sm:$0xff]  ;;  %v3301_v15 = vld [vmem:[#allocation14 + $0x218] sm:$0xff] }
 0x482   :  { %5784 = vmatprep.subr.bf16.mxu1 %v5783_v31  ;;  %v3278_v31 = vld [vmem:[#allocation14 + $0x160] sm:$0xff]  ;;  %v5799_v34 = vpack.c.bf16 %v3295_v22, %v3294_v21  ;;  %v3331_v6 = vld [vmem:[#allocation14 + $0x308] sm:$0xff] }
 0x483   :  { %v3318_v19 = vld [vmem:[#allocation14 + $0x2a0] sm:$0xff]  ;;  %v3319_v20 = vld [vmem:[#allocation14 + $0x2a8] sm:$0xff] }
 0x484   :  { %5754 = vmatpush3.bf16.msra.mxu0 %v5753_v40  ;;  %v3297_v40 = vld [vmem:[#allocation14 + $0x1f8] sm:$0xff]  ;;  %v6072_v21 = vld [vmem:[#allocation20] sm:$0xff] }
 0x485   :  { %5786 = vmatpush3.bf16.msra.mxu1 %v5785_v45  ;;  %5756 = vmatprep.subr.bf16.mxu0 %v5755_v46  ;;  %v5769_v45 = vpack.c.bf16 %v3247_v30, %v3246_v27  ;;  %v5801_v46 = vpack.c.bf16 %v3279_v35, %v3278_v31  ;;  %v5803_v52 = vpack.c.bf16 %v3297_v40, %v3296_v38  ;;  %v3303_v35 = vld [vmem:[#allocation14 + $0x228] sm:$0xff]  ;;  %v3320_v40 = vld [vmem:[#allocation14 + $0x2b0] sm:$0xff] }
 0x486   :  { %5788 = vmatprep.subr.bf16.mxu1 %v5787_v51  ;;  %v3280_v51 = vld [vmem:[#allocation14 + $0x170] sm:$0xff]  ;;  %v5813_v27 = vpack.c.bf16 %v3301_v15, %v3300_v14  ;;  %v5845_v30 = vpack.c.bf16 %v3333_v18, %v3332_v16  ;;  %v5815_v31 = vpack.c.bf16 %v3319_v20, %v3318_v19  ;;  %v3335_v38 = vld [vmem:[#allocation14 + $0x328] sm:$0xff]  ;;  %v3309_v15 = vld [vmem:[#allocation14 + $0x258] sm:$0xff] }
 0x487   :  { %v3323_v56 = vld [vmem:[#allocation14 + $0x2c8] sm:$0xff]  ;;  %v3308_v14 = vld [vmem:[#allocation14 + $0x250] sm:$0xff]  ;;  %v3341_v18 = vld [vmem:[#allocation14 + $0x358] sm:$0xff] }
 0x488   :  { %5758 = vmatpush3.bf16.msra.mxu0 %v5757_v61  ;;  %v3347_v61 = vld [vmem:[#allocation14 + $0x388] sm:$0xff]  ;;  %v3340_v16 = vld [vmem:[#allocation14 + $0x350] sm:$0xff]  ;;  %v3326_v19 = vld [vmem:[#allocation14 + $0x2e0] sm:$0xff] }
 0x489   :  { %5790 = vmatpush3.bf16.msra.mxu1 %v5789_v62  ;;  %5760 = vmatprep.subr.bf16.mxu0 %v5759_v63  ;;  %v5773_v62 = vpack.c.bf16 %v3249_v49, %v3248_v48  ;;  %v5805_v63 = vpack.c.bf16 %v3281_v43, %v3280_v51  ;;  %v3304_v49 = vld [vmem:[#allocation14 + $0x230] sm:$0xff]  ;;  %v3305_v51 = vld [vmem:[#allocation14 + $0x238] sm:$0xff]  ;;  %v3322_v43 = vld [vmem:[#allocation14 + $0x2c0] sm:$0xff] }
 0x48a   :  { %5792 = vmatprep.subr.bf16.mxu1 %v5791_v4  ;;  %v5839_v4 = vpack.c.bf16 %v3347_v61, %v3346_v60  ;;  %v3355_v60 = vld [vmem:[#allocation14 + $0x3c8] sm:$0xff]  ;;  %v5821_v61 = vpack.c.bf16 %v3305_v51, %v3304_v49  ;;  %v3345_v51 = vld [vmem:[#allocation14 + $0x378] sm:$0xff] }
 0x48b   :  { %v3307_v2 = vld [vmem:[#allocation14 + $0x248] sm:$0xff] }
 0x48c   :  { %5762 = vmatpush3.bf16.msra.mxu0 %v5761_v11  ;;  %v3348_v11 = vld [vmem:[#allocation14 + $0x390] sm:$0xff]  ;;  %v3327_v20 = vld [vmem:[#allocation14 + $0x2e8] sm:$0xff] }
 0x48d   :  { %5794 = vmatpush3.bf16.msra.mxu1 %v5793_v12  ;;  %5764 = vmatprep.subr.bf16.mxu0 %v5763_v13  ;;  %v3349_v12 = vld [vmem:[#allocation14 + $0x398] sm:$0xff]  ;;  %v5841_v13 = vpack.c.bf16 %v3331_v6, %v3330_v5  ;;  %v3339_v5 = vld [vmem:[#allocation14 + $0x348] sm:$0xff]  ;;  %v3324_v6 = vld [vmem:[#allocation14 + $0x2d0] sm:$0xff] }
 0x48e   :  { %5796 = vmatprep.subr.bf16.mxu1 %v5795_v17  ;;  %v5811_v17 = vpack.c.bf16 %v3317_v9, %v3316_v8  ;;  %v5843_v22 = vpack.c.bf16 %v3349_v12, %v3348_v11  ;;  %v3325_v8 = vld [vmem:[#allocation14 + $0x2d8] sm:$0xff]  ;;  %v3356_v9 = vld [vmem:[#allocation14 + $0x3d0] sm:$0xff]  ;;  %v5857_v12 = vpack.c.bf16 %v3339_v5, %v3338_v3 }
 0x48f   :  { %v3380_v3 = vld [vmem:[#allocation14 + $0x490] sm:$0xff] }
 0x490   :  { %5766 = vmatpush3.bf16.msra.mxu0 %v5765_v24  ;;  %v3350_v24 = vld [vmem:[#allocation14 + $0x3a0] sm:$0xff]  ;;  %v3412_v5 = vld [vmem:[#allocation14 + $0x590] sm:$0xff] }
 0x491   :  { %5798 = vmatpush3.bf16.msra.mxu1 %v5797_v25  ;;  %5768 = vmatprep.subr.bf16.mxu0 %v5767_v26  ;;  %v3351_v25 = vld [vmem:[#allocation14 + $0x3a8] sm:$0xff]  ;;  %v6073_v26 = vld [vmem:[#allocation20 + $0x10] sm:$0xff] }
 0x492   :  { %5800 = vmatprep.subr.bf16.mxu1 %v5799_v34  ;;  %v3302_v34 = vld [vmem:[#allocation14 + $0x220] sm:$0xff]  ;;  %v5847_v37 = vpack.c.bf16 %v3351_v25, %v3350_v24  ;;  %v5829_v24 = vpack.c.bf16 %v3309_v15, %v3308_v14  ;;  %v5861_v25 = vpack.c.bf16 %v3341_v18, %v3340_v16  ;;  %v3397_v15 = vld [vmem:[#allocation14 + $0x518] sm:$0xff] }
 0x493   :  { %v5817_v29 = vpack.c.bf16 %v3303_v35, %v3302_v34  ;;  %v3343_v35 = vld [vmem:[#allocation14 + $0x368] sm:$0xff]  ;;  %v3382_v16 = vld [vmem:[#allocation14 + $0x4a0] sm:$0xff] }
 0x494   :  { %5770 = vmatpush3.bf16.msra.mxu0 %v5769_v45  ;;  %v3321_v45 = vld [vmem:[#allocation14 + $0x2b8] sm:$0xff]  ;;  %v3414_v18 = vld [vmem:[#allocation14 + $0x5a0] sm:$0xff] }
 0x495   :  { %5802 = vmatpush3.bf16.msra.mxu1 %v5801_v46  ;;  %5772 = vmatprep.subr.bf16.mxu0 %v5771_v47  ;;  %v3352_v46 = vld [vmem:[#allocation14 + $0x3b0] sm:$0xff]  ;;  %v3353_v47 = vld [vmem:[#allocation14 + $0x3b8] sm:$0xff]  ;;  %v5819_v48 = vpack.c.bf16 %v3321_v45, %v3320_v40 }
 0x496   :  { %5804 = vmatprep.subr.bf16.mxu1 %v5803_v52  ;;  %v3336_v52 = vld [vmem:[#allocation14 + $0x330] sm:$0xff]  ;;  %v5851_v33 = vpack.c.bf16 %v3353_v47, %v3352_v46  ;;  %v3361_v40 = vld [vmem:[#allocation14 + $0x3f8] sm:$0xff] }
 0x498   :  { %5774 = vmatpush3.bf16.msra.mxu0 %v5773_v62 }
 0x499   :  { %5806 = vmatpush3.bf16.msra.mxu1 %v5805_v63  ;;  %5808 = vmatprep.subr.bf16.mxu0 %v5807_v0  ;;  %v5823_v63 = vpack.c.bf16 %v3323_v56, %v3322_v43  ;;  %v3306_v0 = vld [vmem:[#allocation14 + $0x240] sm:$0xff]  ;;  %v3411_v43 = vld [vmem:[#allocation14 + $0x588] sm:$0xff] }
 0x49a   :  { %5840 = vmatprep.subr.bf16.mxu1 %v5839_v4  ;;  %v5855_v4 = vpack.c.bf16 %v3355_v60, %v3354_v59  ;;  %v5825_v11 = vpack.c.bf16 %v3307_v2, %v3306_v0  ;;  %v3395_v2 = vld [vmem:[#allocation14 + $0x508] sm:$0xff] }
 0x49b   :  { %3562 = vmatmul.mubr.f32.vlgmr.msra.gmra.mrb[12].mxu0 %v6072_v21  ;;  %v3358_v21 = vld [vmem:[#allocation14 + $0x3e0] sm:$0xff] }
 0x49c   :  { %3632 = vmatmul.mubr.f32.vlgmr.msra.gmra.mrb[12].mxu1 %v6073_v26  ;;  %5810 = vmatpush3.bf16.msra.mxu0 %v5809_v10  ;;  %v3357_v10 = vld [vmem:[#allocation14 + $0x3d8] sm:$0xff]  ;;  %v5831_v26 = vpack.c.bf16 %v3327_v20, %v3326_v19  ;;  %v3415_v19 = vld [vmem:[#allocation14 + $0x5a8] sm:$0xff] }
 0x49d   :  { %3701 = vmatprep.mubr.f32.mxu0 %v3207_v39  ;;  %5842 = vmatpush3.bf16.msra.mxu1 %v5841_v13  ;;  %v5849_v39 = vpack.c.bf16 %v3335_v38, %v3334_v36  ;;  %v5827_v13 = vpack.c.bf16 %v3325_v8, %v3324_v6  ;;  %v3328_v36 = vld [vmem:[#allocation14 + $0x2f0] sm:$0xff]  ;;  %v3413_v6 = vld [vmem:[#allocation14 + $0x598] sm:$0xff] }
 0x49e   :  { %3771 = vmatprep.mubr.f32.mxu1 %v3209_v57  ;;  %5812 = vmatprep.subr.bf16.mxu0 %v5811_v17  ;;  %v3337_v57 = vld [vmem:[#allocation14 + $0x338] sm:$0xff]  ;;  %v5859_v17 = vpack.c.bf16 %v3357_v10, %v3356_v9  ;;  %v3360_v38 = vld [vmem:[#allocation14 + $0x3f0] sm:$0xff]  ;;  %v5907_v14 = vpack.c.bf16 %v3413_v6, %v3412_v5 }
 0x49f   :  { %5844 = vmatprep.subr.bf16.mxu1 %v5843_v22  ;;  %v5853_v62 = vpack.c.bf16 %v3337_v57, %v3336_v52  ;;  %v3359_v22 = vld [vmem:[#allocation14 + $0x3e8] sm:$0xff]  ;;  %v5867_v49 = vpack.c.bf16 %v3361_v40, %v3360_v38  ;;  %v3378_v52 = vld [vmem:[#allocation14 + $0x480] sm:$0xff]  ;;  %v3400_v38 = vld [vmem:[#allocation14 + $0x530] sm:$0xff] }
 0x4a0   :  { %5814 = vmatpush3.bf16.msra.mxu0 %v5813_v27  ;;  %v3310_v27 = vld [vmem:[#allocation14 + $0x260] sm:$0xff]  ;;  %v5863_v34 = vpack.c.bf16 %v3359_v22, %v3358_v21  ;;  %v3373_v5 = vld [vmem:[#allocation14 + $0x458] sm:$0xff]  ;;  %v3404_v6 = vld [vmem:[#allocation14 + $0x550] sm:$0xff] }
 0x4a1   :  { %5846 = vmatpush3.bf16.msra.mxu1 %v5845_v30  ;;  %5816 = vmatprep.subr.bf16.mxu0 %v5815_v31  ;;  %v3311_v30 = vld [vmem:[#allocation14 + $0x268] sm:$0xff]  ;;  %v3342_v31 = vld [vmem:[#allocation14 + $0x360] sm:$0xff] }
 0x4a2   :  { %5848 = vmatprep.subr.bf16.mxu1 %v5847_v37  ;;  %v3329_v37 = vld [vmem:[#allocation14 + $0x2f8] sm:$0xff]  ;;  %v5833_v45 = vpack.c.bf16 %v3311_v30, %v3310_v27  ;;  %v5865_v46 = vpack.c.bf16 %v3343_v35, %v3342_v31  ;;  %v3410_v57 = vld [vmem:[#allocation14 + $0x580] sm:$0xff]  ;;  %v5911_v27 = vpack.c.bf16 %v3415_v19, %v3414_v18  ;;  %v3399_v30 = vld [vmem:[#allocation14 + $0x528] sm:$0xff] }
 0x4a3   :  { %v5835_v47 = vpack.c.bf16 %v3329_v37, %v3328_v36  ;;  %v5903_v0 = vpack.c.bf16 %v3411_v43, %v3410_v57  ;;  %v3384_v31 = vld [vmem:[#allocation14 + $0x4b0] sm:$0xff]  ;;  %v3369_v37 = vld [vmem:[#allocation14 + $0x438] sm:$0xff]  ;;  %v3402_v57 = vld [vmem:[#allocation14 + $0x540] sm:$0xff] }
 0x4a4   :  { %5818 = vmatpush3.bf16.msra.mxu0 %v5817_v29  ;;  %v3312_v29 = vld [vmem:[#allocation14 + $0x270] sm:$0xff] }
 0x4a5   :  { %5850 = vmatpush3.bf16.msra.mxu1 %v5849_v39  ;;  %5820 = vmatprep.subr.bf16.mxu0 %v5819_v48  ;;  %v3313_v39 = vld [vmem:[#allocation14 + $0x278] sm:$0xff]  ;;  %v3344_v48 = vld [vmem:[#allocation14 + $0x370] sm:$0xff] }
 0x4a6   :  { %5852 = vmatprep.subr.bf16.mxu1 %v5851_v33  ;;  %v3379_v33 = vld [vmem:[#allocation14 + $0x488] sm:$0xff]  ;;  %v5837_v56 = vpack.c.bf16 %v3313_v39, %v3312_v29  ;;  %v5869_v59 = vpack.c.bf16 %v3345_v51, %v3344_v48  ;;  %v3368_v36 = vld [vmem:[#allocation14 + $0x430] sm:$0xff]  ;;  %v3418_v29 = vld [vmem:[#allocation14 + $0x5c0] sm:$0xff] }
 0x4a7   :  { %v5871_v60 = vpack.c.bf16 %v3379_v33, %v3378_v52  ;;  %v3419_v39 = vld [vmem:[#allocation14 + $0x5c8] sm:$0xff]  ;;  %v5885_v48 = vpack.c.bf16 %v3369_v37, %v3368_v36  ;;  %v3370_v52 = vld [vmem:[#allocation14 + $0x440] sm:$0xff] }
 0x4a8   :  { %5822 = vmatpush3.bf16.msra.mxu0 %v5821_v61  ;;  %v3362_v61 = vld [vmem:[#allocation14 + $0x400] sm:$0xff]  ;;  %v3371_v33 = vld [vmem:[#allocation14 + $0x448] sm:$0xff]  ;;  %v5919_v43 = vpack.c.bf16 %v3419_v39, %v3418_v29 }
 0x4a9   :  { %5854 = vmatpush3.bf16.msra.mxu1 %v5853_v62  ;;  %5824 = vmatprep.subr.bf16.mxu0 %v5823_v63  ;;  %v3363_v62 = vld [vmem:[#allocation14 + $0x408] sm:$0xff]  ;;  %v3394_v63 = vld [vmem:[#allocation14 + $0x500] sm:$0xff] }
 0x4aa   :  { %5856 = vmatprep.subr.bf16.mxu1 %v5855_v4  ;;  %v3381_v4 = vld [vmem:[#allocation14 + $0x498] sm:$0xff]  ;;  %v5873_v8 = vpack.c.bf16 %v3363_v62, %v3362_v61  ;;  %v5905_v9 = vpack.c.bf16 %v3395_v2, %v3394_v63  ;;  %v3420_v61 = vld [vmem:[#allocation14 + $0x5d0] sm:$0xff]  ;;  %v5889_v63 = vpack.c.bf16 %v3371_v33, %v3370_v52  ;;  %v3474_v33 = vld [vmem:[#allocation14 + $0x780] sm:$0xff] }
 0x4ab   :  { %v5875_v10 = vpack.c.bf16 %v3381_v4, %v3380_v3  ;;  %v3421_v62 = vld [vmem:[#allocation14 + $0x5d8] sm:$0xff]  ;;  %v3372_v4 = vld [vmem:[#allocation14 + $0x450] sm:$0xff] }
 0x4ac   :  { %5826 = vmatpush3.bf16.msra.mxu0 %v5825_v11  ;;  %v3364_v11 = vld [vmem:[#allocation14 + $0x410] sm:$0xff] }
 0x4ad   :  { %5858 = vmatpush3.bf16.msra.mxu1 %v5857_v12  ;;  %5828 = vmatprep.subr.bf16.mxu0 %v5827_v13  ;;  %v3365_v12 = vld [vmem:[#allocation14 + $0x418] sm:$0xff]  ;;  %v3396_v13 = vld [vmem:[#allocation14 + $0x510] sm:$0xff] }
 0x4ae   :  { %5860 = vmatprep.subr.bf16.mxu1 %v5859_v17  ;;  %v3383_v17 = vld [vmem:[#allocation14 + $0x4a8] sm:$0xff]  ;;  %v5877_v20 = vpack.c.bf16 %v3365_v12, %v3364_v11  ;;  %v5909_v21 = vpack.c.bf16 %v3397_v15, %v3396_v13  ;;  %v3422_v13 = vld [vmem:[#allocation14 + $0x5e0] sm:$0xff] }
 0x4af   :  { %v5879_v22 = vpack.c.bf16 %v3383_v17, %v3382_v16  ;;  %v3391_v11 = vld [vmem:[#allocation14 + $0x4e8] sm:$0xff]  ;;  %v5893_v17 = vpack.c.bf16 %v3373_v5, %v3372_v4  ;;  %v3445_v4 = vld [vmem:[#allocation14 + $0x698] sm:$0xff]  ;;  %v3476_v5 = vld [vmem:[#allocation14 + $0x790] sm:$0xff] }
 0x4b0   :  { %5830 = vmatpush3.bf16.msra.mxu0 %v5829_v24  ;;  %v3366_v24 = vld [vmem:[#allocation14 + $0x420] sm:$0xff] }
 0x4b1   :  { %5862 = vmatpush3.bf16.msra.mxu1 %v5861_v25  ;;  %5832 = vmatprep.subr.bf16.mxu0 %v5831_v26  ;;  %v3367_v25 = vld [vmem:[#allocation14 + $0x428] sm:$0xff]  ;;  %v3398_v26 = vld [vmem:[#allocation14 + $0x520] sm:$0xff] }
 0x4b2   :  { %5864 = vmatprep.subr.bf16.mxu1 %v5863_v34  ;;  %v3417_v34 = vld [vmem:[#allocation14 + $0x5b8] sm:$0xff]  ;;  %v5881_v35 = vpack.c.bf16 %v3367_v25, %v3366_v24  ;;  %v5913_v28 = vpack.c.bf16 %v3399_v30, %v3398_v26  ;;  %v3406_v25 = vld [vmem:[#allocation14 + $0x560] sm:$0xff]  ;;  %v3407_v26 = vld [vmem:[#allocation14 + $0x568] sm:$0xff] }
 0x4b3   :  { %v5929_v37 = vpack.c.bf16 %v3407_v26, %v3406_v25  ;;  %v3462_v25 = vld [vmem:[#allocation14 + $0x720] sm:$0xff] }
 0x4b4   :  { %5834 = vmatpush3.bf16.msra.mxu0 %v5833_v45  ;;  %v3401_v45 = vld [vmem:[#allocation14 + $0x538] sm:$0xff] }
 0x4b5   :  { %5866 = vmatpush3.bf16.msra.mxu1 %v5865_v46  ;;  %5836 = vmatprep.subr.bf16.mxu0 %v5835_v47  ;;  %v3386_v46 = vld [vmem:[#allocation14 + $0x4c0] sm:$0xff]  ;;  %v3387_v47 = vld [vmem:[#allocation14 + $0x4c8] sm:$0xff] }
 0x4b6   :  { %5868 = vmatprep.subr.bf16.mxu1 %v5867_v49  ;;  %v5917_v49 = vpack.c.bf16 %v3401_v45, %v3400_v38  ;;  %v5887_v51 = vpack.c.bf16 %v3387_v47, %v3386_v46  ;;  %v3376_v38 = vld [vmem:[#allocation14 + $0x470] sm:$0xff] }
 0x4b7   :  { %v3408_v45 = vld [vmem:[#allocation14 + $0x570] sm:$0xff] }
 0x4b8   :  { %5838 = vmatpush3.bf16.msra.mxu0 %v5837_v56  ;;  %v3403_v56 = vld [vmem:[#allocation14 + $0x548] sm:$0xff] }
 0x4b9   :  { %5870 = vmatpush3.bf16.msra.mxu1 %v5869_v59  ;;  %5872 = vmatprep.subr.bf16.mxu0 %v5871_v60  ;;  %v3388_v59 = vld [vmem:[#allocation14 + $0x4d0] sm:$0xff]  ;;  %v3389_v60 = vld [vmem:[#allocation14 + $0x4d8] sm:$0xff]  ;;  %v5921_v2 = vpack.c.bf16 %v3403_v56, %v3402_v57  ;;  %v3475_v57 = vld [vmem:[#allocation14 + $0x788] sm:$0xff] }
 0x4ba   :  { %5904 = vmatprep.subr.bf16.mxu1 %v5903_v0  ;;  %v6661_v0 = vld [vmem:[#allocation13 + $0x8] sm:$0xff]  ;;  %v5891_v3 = vpack.c.bf16 %v3389_v60, %v3388_v59  ;;  %v3426_v60 = vld [vmem:[#allocation14 + $0x600] sm:$0xff] }
 0x4bb   :  { %3702 = vmatmul.mubr.f32.vlgmr.msra.gmra.mrb[14].mxu0 %v3206_v32  ;;  %v3416_v32 = vld [vmem:[#allocation14 + $0x5b0] sm:$0xff]  ;;  %v2021_v12 = vrot.slane %v6661_v0, %v6575_v42  ;;  %v2029_v15 = vrot.slane %v6661_v0, %v6587_v1  ;;  %v2025_v16 = vrot.slane %v6661_v0, %v6580_v44  ;;  %v2033_v18 = vrot.slane %v6661_v0, %v6590_v7 }
 0x4bc   :  { %3772 = vmatmul.mubr.f32.vlgmr.msra.gmra.mrb[14].mxu1 %v3208_v53  ;;  %5874 = vmatpush3.bf16.msra.mxu0 %v5873_v8  ;;  %v5883_v53 = vpack.c.bf16 %v3385_v23, %v3384_v31  ;;  %v5915_v40 = vpack.c.bf16 %v3417_v34, %v3416_v32  ;;  %v5923_v8 = vpack.c.bf16 %v3421_v62, %v3420_v61  ;;  %v3393_v31 = vld [vmem:[#allocation14 + $0x4f8] sm:$0xff]  ;;  %v3424_v23 = vld [vmem:[#allocation14 + $0x5f0] sm:$0xff]  ;;  %v3427_v61 = vld [vmem:[#allocation14 + $0x608] sm:$0xff] }
 0x4bd   :  { %5906 = vmatpush3.bf16.msra.mxu1 %v5905_v9  ;;  %5876 = vmatprep.subr.bf16.mxu0 %v5875_v10  ;;  %v3405_v9 = vld [vmem:[#allocation14 + $0x558] sm:$0xff]  ;;  %v3390_v10 = vld [vmem:[#allocation14 + $0x4e0] sm:$0xff] }
 0x4be   :  { %5908 = vmatprep.subr.bf16.mxu1 %v5907_v14  ;;  %v3423_v14 = vld [vmem:[#allocation14 + $0x5e8] sm:$0xff]  ;;  %v5925_v19 = vpack.c.bf16 %v3405_v9, %v3404_v6  ;;  %v3425_v32 = vld [vmem:[#allocation14 + $0x5f8] sm:$0xff]  ;;  %v3458_v62 = vld [vmem:[#allocation14 + $0x700] sm:$0xff] }
 0x4bf   :  { %v5927_v24 = vpack.c.bf16 %v3423_v14, %v3422_v13  ;;  %v5931_v39 = vpack.c.bf16 %v3425_v32, %v3424_v23  ;;  %v3477_v6 = vld [vmem:[#allocation14 + $0x798] sm:$0xff]  ;;  %v3460_v13 = vld [vmem:[#allocation14 + $0x710] sm:$0xff] }
 0x4c0   :  { %5878 = vmatpush3.bf16.msra.mxu0 %v5877_v20  ;;  %v5895_v20 = vpack.c.bf16 %v3391_v11, %v3390_v10  ;;  %v3428_v11 = vld [vmem:[#allocation14 + $0x610] sm:$0xff]  ;;  %v5971_v14 = vpack.c.bf16 %v3477_v6, %v3476_v5  ;;  %v3454_v5 = vld [vmem:[#allocation14 + $0x6e0] sm:$0xff]  ;;  %v3455_v6 = vld [vmem:[#allocation14 + $0x6e8] sm:$0xff] }
 0x4c1   :  { %5910 = vmatpush3.bf16.msra.mxu1 %v5909_v21  ;;  %5880 = vmatprep.subr.bf16.mxu0 %v5879_v22  ;;  %v3374_v21 = vld [vmem:[#allocation14 + $0x460] sm:$0xff]  ;;  %v3375_v22 = vld [vmem:[#allocation14 + $0x468] sm:$0xff] }
 0x4c2   :  { %5912 = vmatprep.subr.bf16.mxu1 %v5911_v27  ;;  %v3392_v27 = vld [vmem:[#allocation14 + $0x4f0] sm:$0xff] }
 0x4c3   :  { %v5899_v29 = vpack.c.bf16 %v3393_v31, %v3392_v27  ;;  %v3463_v27 = vld [vmem:[#allocation14 + $0x728] sm:$0xff]  ;;  %v3481_v31 = vld [vmem:[#allocation14 + $0x7b8] sm:$0xff] }
 0x4c4   :  { %5882 = vmatpush3.bf16.msra.mxu0 %v5881_v35  ;;  %v5977_v32 = vpack.c.bf16 %v3463_v27, %v3462_v25  ;;  %v3440_v25 = vld [vmem:[#allocation14 + $0x670] sm:$0xff] }
 0x4c5   :  { %5914 = vmatpush3.bf16.msra.mxu1 %v5913_v28  ;;  %5884 = vmatprep.subr.bf16.mxu0 %v5883_v53  ;;  %v5897_v28 = vpack.c.bf16 %v3375_v22, %v3374_v21 }
 0x4c6   :  { %5916 = vmatprep.subr.bf16.mxu1 %v5915_v40  ;;  %v3377_v40 = vld [vmem:[#allocation14 + $0x478] sm:$0xff] }
 0x4c8   :  { %5886 = vmatpush3.bf16.msra.mxu0 %v5885_v48  ;;  %v3409_v48 = vld [vmem:[#allocation14 + $0x578] sm:$0xff] }
 0x4c9   :  { %5918 = vmatpush3.bf16.msra.mxu1 %v5917_v49  ;;  %5888 = vmatprep.subr.bf16.mxu0 %v5887_v51  ;;  %v3442_v49 = vld [vmem:[#allocation14 + $0x680] sm:$0xff]  ;;  %v3443_v51 = vld [vmem:[#allocation14 + $0x688] sm:$0xff]  ;;  %v5933_v56 = vpack.c.bf16 %v3409_v48, %v3408_v45 }
 0x4ca   :  { %5920 = vmatprep.subr.bf16.mxu1 %v5919_v43  ;;  %v5901_v43 = vpack.c.bf16 %v3377_v40, %v3376_v38  ;;  %v5935_v59 = vpack.c.bf16 %v3443_v51, %v3442_v49  ;;  %v3451_v38 = vld [vmem:[#allocation14 + $0x6c8] sm:$0xff]  ;;  %v3482_v40 = vld [vmem:[#allocation14 + $0x7c0] sm:$0xff] }
 0x4cb   :  { %v3483_v45 = vld [vmem:[#allocation14 + $0x7c8] sm:$0xff]  ;;  %v3466_v49 = vld [vmem:[#allocation14 + $0x740] sm:$0xff] }
 0x4cc   :  { %5890 = vmatpush3.bf16.msra.mxu0 %v5889_v63  ;;  %v5967_v63 = vpack.c.bf16 %v3475_v57, %v3474_v33  ;;  %v3435_v48 = vld [vmem:[#allocation14 + $0x648] sm:$0xff]  ;;  %v5983_v51 = vpack.c.bf16 %v3483_v45, %v3482_v40  ;;  %v3452_v33 = vld [vmem:[#allocation14 + $0x6d0] sm:$0xff]  ;;  %v3453_v57 = vld [vmem:[#allocation14 + $0x6d8] sm:$0xff] }
 0x4cd   :  { %5922 = vmatpush3.bf16.msra.mxu1 %v5921_v2  ;;  %5892 = vmatprep.subr.bf16.mxu0 %v5891_v3  ;;  %v3459_v2 = vld [vmem:[#allocation14 + $0x708] sm:$0xff]  ;;  %v3444_v3 = vld [vmem:[#allocation14 + $0x690] sm:$0xff] }
 0x4ce   :  { %v2771_v42 = vpop.f32.mrb[8].mxu0  ;;  %5924 = vmatprep.subr.bf16.mxu1 %v5923_v8  ;;  %v5937_v8 = vpack.c.bf16 %v3427_v61, %v3426_v60  ;;  %v5969_v9 = vpack.c.bf16 %v3459_v2, %v3458_v62  ;;  %v5939_v10 = vpack.c.bf16 %v3445_v4, %v3444_v3  ;;  %v5955_v61 = vpack.c.bf16 %v3453_v57, %v3452_v33  ;;  %v3436_v62 = vld [vmem:[#allocation14 + $0x650] sm:$0xff]  ;;  %v3469_v4 = vld [vmem:[#allocation14 + $0x758] sm:$0xff] }
 0x4cf   :  { %v6671_v1 = vadd.f32 %v2771_v42, %v2021_v12  ;;  %v2913_v30 = vpop.f32.mrb[8].mxu1  ;;  %v2773_v44 = vpop.f32.mrb[9].mxu0  ;;  %v3429_v12 = vld [vmem:[#allocation14 + $0x618] sm:$0xff]  ;;  %v3430_v42 = vld [vmem:[#allocation14 + $0x620] sm:$0xff]  ;;  %v3468_v2 = vld [vmem:[#allocation14 + $0x750] sm:$0xff] }
 0x4d0   :  { %v6673_v34 = vadd.f32 %v2913_v30, %v2029_v15  ;;  %v6012_v7 = vadd.f32 %v2773_v44, %v2025_v16  ;;  %v2915_v35 = vpop.f32.mrb[9].mxu1  ;;  %5894 = vmatpush3.bf16.msra.mxu0 %v5893_v17  ;;  %v3461_v15 = vld [vmem:[#allocation14 + $0x718] sm:$0xff]  ;;  %v3446_v16 = vld [vmem:[#allocation14 + $0x6a0] sm:$0xff]  ;;  %v3447_v17 = vld [vmem:[#allocation14 + $0x6a8] sm:$0xff] }
 0x4d1   :  { %v3210_v53 = vmax.f32 %v6671_v1, 0.0  ;;  %v6014_v36 = vadd.f32 %v2915_v35, %v2033_v18  ;;  %5926 = vmatpush3.bf16.msra.mxu1 %v5925_v19  ;;  %5896 = vmatprep.subr.bf16.mxu0 %v5895_v20  ;;  %v3478_v18 = vld [vmem:[#allocation14 + $0x7a0] sm:$0xff]  ;;  %v3479_v19 = vld [vmem:[#allocation14 + $0x7a8] sm:$0xff]  ;;  %v5941_v20 = vpack.c.bf16 %v3429_v12, %v3428_v11  ;;  %v5973_v21 = vpack.c.bf16 %v3461_v15, %v3460_v13  ;;  %v3448_v1 = vld [vmem:[#allocation14 + $0x6b0] sm:$0xff] }
 0x4d2   :  { %v3212_v46 = vmax.f32 %v6673_v34, 0.0  ;;  %v3211_v47 = vmax.f32 %v6012_v7, 0.0  ;;  %5928 = vmatprep.subr.bf16.mxu1 %v5927_v24  ;;  %v5943_v22 = vpack.c.bf16 %v3447_v17, %v3446_v16  ;;  %v3431_v24 = vld [vmem:[#allocation14 + $0x628] sm:$0xff]  ;;  %v5975_v26 = vpack.c.bf16 %v3479_v19, %v3478_v18  ;;  %v3449_v30 = vld [vmem:[#allocation14 + $0x6b8] sm:$0xff]  ;;  %v3480_v44 = vld [vmem:[#allocation14 + $0x7b0] sm:$0xff] }
 0x4d3   :  { %3226 = vst [vmem:[#allocation20 + $0x40] sm:$0xff] %v3210_v53  ;;  %v3213_v52 = vmax.f32 %v6014_v36, 0.0  ;;  %v5945_v23 = vpack.c.bf16 %v3431_v24, %v3430_v42  ;;  %v5947_v34 = vpack.c.bf16 %v3449_v30, %v3448_v1  ;;  %v3432_v7 = vld [vmem:[#allocation14 + $0x630] sm:$0xff]  ;;  %v3433_v35 = vld [vmem:[#allocation14 + $0x638] sm:$0xff]  ;;  %v5989_v11 = vpack.c.bf16 %v3469_v4, %v3468_v2  ;;  %v3438_v13 = vld [vmem:[#allocation14 + $0x660] sm:$0xff] }
 0x4d4   :  { %3228 = vst [vmem:[#allocation20 + $0x50] sm:$0xff] %v3212_v46  ;;  %3227 = vst [vmem:[#allocation20 + $0x48] sm:$0xff] %v3211_v47  ;;  %5898 = vmatpush3.bf16.msra.mxu0 %v5897_v28  ;;  %3841 = vmatprep.mubr.f32.mxu0 %v3211_v47  ;;  %v3464_v28 = vld [vmem:[#allocation14 + $0x730] sm:$0xff]  ;;  %v3465_v36 = vld [vmem:[#allocation14 + $0x738] sm:$0xff]  ;;  %v5959_v12 = vpack.c.bf16 %v3455_v6, %v3454_v5 }
 0x4d5   :  { %3229 = vst [vmem:[#allocation20 + $0x58] sm:$0xff] %v3213_v52  ;;  %5930 = vmatpush3.bf16.msra.mxu1 %v5929_v37  ;;  %3911 = vmatprep.mubr.f32.mxu1 %v3213_v52  ;;  %v3450_v37 = vld [vmem:[#allocation14 + $0x6c0] sm:$0xff]  ;;  %v5981_v47 = vpack.c.bf16 %v3465_v36, %v3464_v28  ;;  %v3467_v52 = vld [vmem:[#allocation14 + $0x748] sm:$0xff]  ;;  %v3456_v18 = vld [vmem:[#allocation14 + $0x6f0] sm:$0xff] }
 0x4d6   :  { %5900 = vmatprep.subr.bf16.mxu0 %v5899_v29  ;;  %5932 = vmatprep.subr.bf16.mxu1 %v5931_v39  ;;  %v5951_v29 = vpack.c.bf16 %v3451_v38, %v3450_v37  ;;  %v3434_v39 = vld [vmem:[#allocation14 + $0x640] sm:$0xff]  ;;  %v5985_v60 = vpack.c.bf16 %v3467_v52, %v3466_v49  ;;  %v3471_v17 = vld [vmem:[#allocation14 + $0x768] sm:$0xff]  ;;  %v3457_v19 = vld [vmem:[#allocation14 + $0x6f8] sm:$0xff] }
 0x4d7   :  { %v3470_v15 = vld [vmem:[#allocation14 + $0x760] sm:$0xff]  ;;  %v5963_v24 = vpack.c.bf16 %v3457_v19, %v3456_v18  ;;  %v3472_v1 = vld [vmem:[#allocation14 + $0x770] sm:$0xff]  ;;  %v3473_v30 = vld [vmem:[#allocation14 + $0x778] sm:$0xff] }
 0x4d8   :  { %5902 = vmatpush3.bf16.msra.mxu0 %v5901_v43  ;;  %v3484_v43 = vld [vmem:[#allocation14 + $0x7d0] sm:$0xff]  ;;  %v5993_v42 = vpack.c.bf16 %v3471_v17, %v3470_v15 }
 0x4d9   :  { %5934 = vmatpush3.bf16.msra.mxu1 %v5933_v56  ;;  %5936 = vmatprep.subr.bf16.mxu0 %v5935_v59  ;;  %v3485_v56 = vld [vmem:[#allocation14 + $0x7d8] sm:$0xff]  ;;  %v5953_v59 = vpack.c.bf16 %v3435_v48, %v3434_v39 }
 0x4da   :  { %5968 = vmatprep.subr.bf16.mxu1 %v5967_v63  ;;  %v3437_v63 = vld [vmem:[#allocation14 + $0x658] sm:$0xff]  ;;  %v5987_v3 = vpack.c.bf16 %v3485_v56, %v3484_v43 }
 0x4db   :  { %3842 = vmatmul.mubr.f32.vlgmr.msra.gmra.mrb[16].mxu0 %v3210_v53  ;;  %v5979_v53 = vpack.c.bf16 %v3481_v31, %v3480_v44  ;;  %v5997_v31 = vpack.c.bf16 %v3473_v30, %v3472_v1 }
 0x4dc   :  { %3912 = vmatmul.mubr.f32.vlgmr.msra.gmra.mrb[16].mxu1 %v3212_v46  ;;  %5938 = vmatpush3.bf16.msra.mxu0 %v5937_v8  ;;  %v5949_v46 = vpack.c.bf16 %v3433_v35, %v3432_v7  ;;  %v3486_v8 = vld [vmem:[#allocation14 + $0x7e0] sm:$0xff]  ;;  %v2049_v7 = vrot.slane %v6661_v0, %v2016_v58 }
 0x4dd   :  { %5970 = vmatpush3.bf16.msra.mxu1 %v5969_v9  ;;  %5940 = vmatprep.subr.bf16.mxu0 %v5939_v10  ;;  %v3487_v9 = vld [vmem:[#allocation14 + $0x7e8] sm:$0xff]  ;;  %v5957_v10 = vpack.c.bf16 %v3437_v63, %v3436_v62  ;;  %v4118_v58 = vld [vmem:[#allocation16] ss:$0 sm:$0xff] }
 0x4de   :  { %5972 = vmatprep.subr.bf16.mxu1 %v5971_v14  ;;  %v3439_v14 = vld [vmem:[#allocation14 + $0x668] sm:$0xff]  ;;  %v5991_v16 = vpack.c.bf16 %v3487_v9, %v3486_v8 }
 0x4e0   :  { %5942 = vmatpush3.bf16.msra.mxu0 %v5941_v20  ;;  %v3488_v20 = vld [vmem:[#allocation14 + $0x7f0] sm:$0xff] }
 0x4e1   :  { %5974 = vmatpush3.bf16.msra.mxu1 %v5973_v21  ;;  %5944 = vmatprep.subr.bf16.mxu0 %v5943_v22  ;;  %v3489_v21 = vld [vmem:[#allocation14 + $0x7f8] sm:$0xff]  ;;  %v5961_v22 = vpack.c.bf16 %v3439_v14, %v3438_v13 }
 0x4e2   :  { %5976 = vmatprep.subr.bf16.mxu1 %v5975_v26  ;;  %v3441_v26 = vld [vmem:[#allocation14 + $0x678] sm:$0xff]  ;;  %v5995_v27 = vpack.c.bf16 %v3489_v21, %v3488_v20 }
 0x4e3   :  { %v5965_v44 = vpack.c.bf16 %v3441_v26, %v3440_v25 }
 0x4e4   :  { %5946 = vmatpush3.bf16.msra.mxu0 %v5945_v23  ;;  %v2037_v23 = vrot.slane %v6661_v0, %v2004_v50 }
 0x4e5   :  { %5978 = vmatpush3.bf16.msra.mxu1 %v5977_v32  ;;  %5948 = vmatprep.subr.bf16.mxu0 %v5947_v34  ;;  %v2045_v32 = vrot.slane %v6661_v0, %v2012_v54  ;;  %v2041_v34 = vrot.slane %v6661_v0, %v2008_v55 }
 0x4e6   :  { %5980 = vmatprep.subr.bf16.mxu1 %v5979_v53 }
 0x4e8   :  { %5950 = vmatpush3.bf16.msra.mxu0 %v5949_v46 }
 0x4e9   :  { %5982 = vmatpush3.bf16.msra.mxu1 %v5981_v47  ;;  %5952 = vmatprep.subr.bf16.mxu0 %v5951_v29 }
 0x4ea   :  { %5984 = vmatprep.subr.bf16.mxu1 %v5983_v51 }
 0x4ec   :  { %5954 = vmatpush3.bf16.msra.mxu0 %v5953_v59 }
 0x4ed   :  { %5986 = vmatpush3.bf16.msra.mxu1 %v5985_v60  ;;  %5956 = vmatprep.subr.bf16.mxu0 %v5955_v61 }
 0x4ee   :  { %5988 = vmatprep.subr.bf16.mxu1 %v5987_v3 }
 0x4f0   :  { %5958 = vmatpush3.bf16.msra.mxu0 %v5957_v10 }
 0x4f1   :  { %5990 = vmatpush3.bf16.msra.mxu1 %v5989_v11  ;;  %5960 = vmatprep.subr.bf16.mxu0 %v5959_v12 }
 0x4f2   :  { %5992 = vmatprep.subr.bf16.mxu1 %v5991_v16 }
 0x4f4   :  { %5962 = vmatpush3.bf16.msra.mxu0 %v5961_v22 }
 0x4f5   :  { %5994 = vmatpush3.bf16.msra.mxu1 %v5993_v42  ;;  %5964 = vmatprep.subr.bf16.mxu0 %v5963_v24 }
 0x4f6   :  { %5996 = vmatprep.subr.bf16.mxu1 %v5995_v27 }
 0x4f8   :  { %5966 = vmatpush3.bf16.msra.mxu0 %v5965_v44 }
 0x4f9   :  { %5998 = vmatpush3.bf16.msra.mxu1 %v5997_v31 }
 0x54e   :  { %v3055_v35 = vpop.f32.mrb[10].mxu0 }
 0x54f   :  { %v6015_v28 = vadd.f32 %v3055_v35, %v2037_v23  ;;  %v3197_v53 = vpop.f32.mrb[10].mxu1  ;;  %v3057_v36 = vpop.f32.mrb[11].mxu0 }
 0x550   :  { %v6017_v37 = vadd.f32 %v3197_v53, %v2045_v32  ;;  %v6016_v38 = vadd.f32 %v3057_v36, %v2041_v34  ;;  %v3199_v40 = vpop.f32.mrb[11].mxu1 }
 0x551   :  { %v3214_v50 = vmax.f32 %v6015_v28, 0.0  ;;  %v6018_v45 = vadd.f32 %v3199_v40, %v2049_v7 }
 0x552   :  { %v3216_v46 = vmax.f32 %v6017_v37, 0.0  ;;  %v3215_v47 = vmax.f32 %v6016_v38, 0.0 }
 0x553   :  { %3230 = vst [vmem:[#allocation20 + $0x60] sm:$0xff] %v3214_v50  ;;  %v3217_v54 = vmax.f32 %v6018_v45, 0.0 }
 0x554   :  { %3232 = vst [vmem:[#allocation20 + $0x70] sm:$0xff] %v3216_v46  ;;  %3231 = vst [vmem:[#allocation20 + $0x68] sm:$0xff] %v3215_v47  ;;  %3981 = vmatprep.mubr.f32.mxu0 %v3215_v47 }
 0x555   :  { %3233 = vst [vmem:[#allocation20 + $0x78] sm:$0xff] %v3217_v54  ;;  %4051 = vmatprep.mubr.f32.mxu1 %v3217_v54  ;;  %3982 = vmatmul.mubr.f32.vlgmr.msra.gmra.mrb[18].mxu0 %v3214_v50 }
 0x556   :  { %4052 = vmatmul.mubr.f32.vlgmr.msra.gmra.mrb[18].mxu1 %v3216_v46 }
 0x56e   :  { %v4151_v41 = vpop.f32.mrb[12].mxu0 }
 0x56f   :  { %v4186_v55 = vpop.f32.mrb[12].mxu1  ;;  %v4152_v0 = vpop.f32.mrb[13].mxu0 }
 0x570   :  { %v4153_v29 = vadd.f32 %v4152_v0, %v4151_v41  ;;  %v4187_v39 = vpop.f32.mrb[13].mxu1 }
 0x571   :  { %v4188_v48 = vadd.f32 %v4187_v39, %v4186_v55 }
 0x572   :  { %v3564_v49 = vadd.f32 %v4153_v29, %v4118_v58 }
 0x574   :  { %v3634_v51 = vadd.f32 %v4188_v48, %v3564_v49 }
 0x58e   :  { %v4221_v52 = vpop.f32.mrb[14].mxu0 }
 0x58f   :  { %v4256_v33 = vpop.f32.mrb[14].mxu1  ;;  %v4222_v57 = vpop.f32.mrb[15].mxu0 }
 0x590   :  { %v4223_v43 = vadd.f32 %v4222_v57, %v4221_v52  ;;  %v4257_v56 = vpop.f32.mrb[15].mxu1 }
 0x591   :  { %v4258_v59 = vadd.f32 %v4257_v56, %v4256_v33 }
 0x592   :  { %v3704_v60 = vadd.f32 %v4223_v43, %v3634_v51 }
 0x594   :  { %v3774_v61 = vadd.f32 %v4258_v59, %v3704_v60 }
 0x5ae   :  { %v4291_v62 = vpop.f32.mrb[16].mxu0 }
 0x5af   :  { %v4326_v63 = vpop.f32.mrb[16].mxu1  ;;  %v4292_v2 = vpop.f32.mrb[17].mxu0 }
 0x5b0   :  { %v4293_v3 = vadd.f32 %v4292_v2, %v4291_v62  ;;  %v4327_v4 = vpop.f32.mrb[17].mxu1 }
 0x5b1   :  { %v4328_v5 = vadd.f32 %v4327_v4, %v4326_v63 }
 0x5b2   :  { %v3844_v6 = vadd.f32 %v4293_v3, %v3774_v61 }
 0x5b3   :  { %6283 = shalt.err (!%p6280_p6)
}
 0x5b4   :  { %s6284_s15 = scalar_lea.hbm %s6747_s10, 512 }
 0x5b5   :  { %p6285_p7 = scmp.ne.s32.totalorder %s6747_s10, %s6284_s15  ;;  %p6288_p8 = scmp.lt.u32.totalorder %s6284_s15, %s6747_s10 }
 0x5b7   :  { %p6290_p9 = pnand %p6288_p8, %p6285_p7 }
 0x5b9   :  { %6293 = shalt.err (!%p6290_p9)
}
 0x5ba   :  { %4077 = dma.vmem_to_hbm [thread:$0]  %s4075_s2, 512, %s6747_s10, [#allocation19]   ;;  %v3914_v8 = vadd.f32 %v4328_v5, %v3844_v6 }
 0x5bb   :  { %s6294_s19 = scalar_lea.vmem %s4065_s26, 512  ;;  %p6299_p11 = scmp.lt.s32.totalorder %s4065_s26, %s4065_s26 }
 0x5bc   :  { %p6295_p10 = scmp.ne.s32.totalorder %s4065_s26, %s6294_s19  ;;  %p6300_p12 = scmp.lt.s32.totalorder %s6294_s19, %s6294_s19 }
 0x5be   :  { %p6301_p13 = por %p6300_p12, %p6299_p11 }
 0x5c0   :  { %p6302_p0 = pnand %p6301_p13, %p6295_p10 }
 0x5c2   :  { %6305 = shalt.err (!%p6302_p0)
}
 0x5c3   :  { %s6306_s3 = scalar_lea.hbm %s6746_s9, 512 }
 0x5c4   :  { %p6307_p1 = scmp.ne.s32.totalorder %s6746_s9, %s6306_s3  ;;  %p6310_p2 = scmp.lt.u32.totalorder %s6306_s3, %s6746_s9 }
 0x5c6   :  { %p6312_p3 = pnand %p6310_p2, %p6307_p1 }
 0x5c8   :  { %6315 = shalt.err (!%p6312_p3)
}
 0x5c9   :  { %4067 = dma.vmem_to_hbm [thread:$0]  %s4065_s26, 512, %s6746_s9, [#allocation4]  }
 0x5ca   :  { %s6393_s7 = smov [#allocation20]  }
 0x5cb   :  { %s4084_s6 = sshll.u32 %s6393_s7, 4  ;;  %s4085_s6 = int_to_ptr.vmem [resolvable:$true] %s4084_s6 }
 0x5cc   :  { %s6316_s14 = scalar_lea.vmem %s4085_s6, 2048  ;;  %p6321_p5 = scmp.lt.s32.totalorder %s4085_s6, %s4085_s6 }
 0x5cd   :  { %p6317_p4 = scmp.ne.s32.totalorder %s4085_s6, %s6316_s14  ;;  %p6322_p6 = scmp.lt.s32.totalorder %s6316_s14, %s6316_s14 }
 0x5cf   :  { %p6323_p7 = por %p6322_p6, %p6321_p5 }
 0x5d1   :  { %p6324_p8 = pnand %p6323_p7, %p6317_p4 }
 0x5d3   :  { %6327 = shalt.err (!%p6324_p8)
}
 0x5d4   :  { %s6328_s2 = scalar_lea.hbm %s6748_s11, 2048 }
 0x5d5   :  { %p6329_p9 = scmp.ne.s32.totalorder %s6748_s11, %s6328_s2  ;;  %p6332_p10 = scmp.lt.u32.totalorder %s6328_s2, %s6748_s11 }
 0x5d7   :  { %p6334_p11 = pnand %p6332_p10, %p6329_p9 }
 0x5d9   :  { %6337 = shalt.err (!%p6334_p11)
}
 0x5da   :  { %4087 = dma.vmem_to_hbm [thread:$0]  %s4085_s6, 2048, %s6748_s11, [#allocation19]  }
 0x5db   :  { %s6394_s15 = smov [#allocation21]  }
 0x5dc   :  { %s4094_s16 = sshll.u32 %s6394_s15, 4  ;;  %s4095_s16 = int_to_ptr.vmem [resolvable:$true] %s4094_s16 }
 0x5dd   :  { %s6338_s5 = scalar_lea.vmem %s4095_s16, 128  ;;  %p6343_p13 = scmp.lt.s32.totalorder %s4095_s16, %s4095_s16 }
 0x5de   :  { %p6339_p12 = scmp.ne.s32.totalorder %s4095_s16, %s6338_s5  ;;  %p6344_p0 = scmp.lt.s32.totalorder %s6338_s5, %s6338_s5 }
 0x5e0   :  { %p6345_p1 = por %p6344_p0, %p6343_p13 }
 0x5e2   :  { %p6346_p2 = pnand %p6345_p1, %p6339_p12 }
 0x628   :  { %v4361_v9 = vpop.f32.mrb[18].mxu0 }
 0x629   :  { %v4396_v10 = vpop.f32.mrb[18].mxu1  ;;  %v4362_v11 = vpop.f32.mrb[19].mxu0 }
 0x62a   :  { %v4363_v12 = vadd.f32 %v4362_v11, %v4361_v9  ;;  %v4397_v13 = vpop.f32.mrb[19].mxu1 }
 0x62b   :  { %v4398_v14 = vadd.f32 %v4397_v13, %v4396_v10 }
 0x62c   :  { %v3984_v15 = vadd.f32 %v4363_v12, %v3914_v8 }
 0x62e   :  { %v4054_v16 = vadd.f32 %v4398_v14, %v3984_v15 }
 0x630   :  { %4057 = vst [vmem:[#allocation21] sm:$0xff] %v4054_v16 }
 0x631   :  { %6349 = shalt.err (!%p6346_p2)
}
 0x632   :  { %s6350_s17 = scalar_lea.hbm %s6749_s12, 128 }
 0x633   :  { %p6351_p3 = scmp.ne.s32.totalorder %s6749_s12, %s6350_s17  ;;  %p6354_p4 = scmp.lt.u32.totalorder %s6350_s17, %s6749_s12 }
 0x635   :  { %p6356_p5 = pnand %p6354_p4, %p6351_p3 }
 0x637   :  { %6359 = shalt.err (!%p6356_p5)
}
 0x638   :  { %4097 = dma.vmem_to_hbm [thread:$0]  %s4095_s16, 128, %s6749_s12, [#allocation22]  }
 0x639   :  { %6370 = dma.done.wait [#allocation4], 512  }
 0x63a   :  { %6371 = vsyncadd [#allocation4], 4294966784 }
 0x63b   :  { %6372 = dma.done.wait [#allocation19], 2560  }
 0x63c   :  { %6373 = vsyncadd [#allocation19], 4294964736 }
 0x63d   :  { %6374 = dma.done.wait [#allocation22], 128  }
 0x63e   :  { %6375 = vsyncadd [#allocation22], 4294967168 }
 0x63f   :  { %4110 = vsyncpa [#allocation3], 1 }
 0x640   :  { %4111 = vsyncpa [#allocation6], 1 }
 0x641   :  { %4112 = vsyncpa [#allocation9], 1 }
 0x642   :  { %4113 = vsyncpa [#allocation12], 1 }
 0x643   :  { %4114 = vsyncpa [#allocation15], 1 }
 0x644   :  { %4115 = vsyncpa [#allocation4], 1 }
 0x645   :  { %4116 = vsyncpa [#allocation19], 1 }
 0x646   :  { %4117 = vsyncpa [#allocation22], 1 }

</bundles_post_ra>
